<compile_context>
chip_gen: v6e
topology: v6e:2x2x1
jax: 0.10.0
libtpu: 0.0.40
codegen_flags: <defaults>
</compile_context>

<pallas_src>
import functools

import jax
import jax.numpy as jnp
from jax.experimental import pallas as pl
from jax.experimental.pallas import tpu as pltpu


# ----------------------------------------------------------------------------
# In-kernel sin/cos: range reduction to [-pi/2, pi/2] + Taylor polynomials.
# Only mul/add/where/abs/int-casts (all guaranteed Mosaic lowerings).
# The int32 truncation used for round-to-nearest is exact for |theta| up to
# ~1e9 rad -- far beyond any realistic predicted angle.
# ----------------------------------------------------------------------------
def _sin_cos(t):
    inv_pi = 0.3183098861837907
    pi_hi = 3.140625                       # exactly representable in f32
    pi_lo = 9.67653589793e-4               # pi - pi_hi
    u = t * inv_pi
    kf = jnp.where(u >= 0.0, u + 0.5, u - 0.5)
    kf = kf.astype(jnp.int32).astype(jnp.float32)        # round-to-nearest
    r = (t - kf * pi_hi) - kf * pi_lo                    # r in [-pi/2, pi/2]
    half = kf * 0.5
    frac = half - half.astype(jnp.int32).astype(jnp.float32)
    sign = 1.0 - 4.0 * jnp.abs(frac)                     # (-1) ** k
    r2 = r * r
    sin_r = r * (1.0 + r2 * (-1.0 / 6.0 + r2 * (1.0 / 120.0 + r2 * (
        -1.0 / 5040.0 + r2 * (1.0 / 362880.0 + r2 * (-1.0 / 39916800.0))))))
    cos_r = 1.0 + r2 * (-0.5 + r2 * (1.0 / 24.0 + r2 * (-1.0 / 720.0 + r2 * (
        1.0 / 40320.0 + r2 * (-1.0 / 3628800.0 + r2 * (1.0 / 479001600.0))))))
    return sign * sin_r, sign * cos_r


# ----------------------------------------------------------------------------
# Fused kernel: encoder#1 -> Rodrigues R -> rotate -> encoder#2 -> mirror
# Channel-major: points live on the lane axis everywhere.
# ----------------------------------------------------------------------------
def _fused_kernel(x_ref, dir_ref, slab_ref, w2_ref,
                  wf1_ref, wf2_ref, wf4_ref, wf5_ref,
                  patch_ref, rmat_ref):
    bt, _, n = x_ref.shape                                # n = padded #points

    slab = slab_ref[...]                                  # (256, 13) f32
    # conv1 params, lane-broadcast ONCE per grid step (trunk runs 2*bt times
    # and JAX does not CSE broadcast_in_dim).
    w1xb = jnp.broadcast_to(slab[0:64, 0:1], (64, n))
    w1yb = jnp.broadcast_to(slab[0:64, 1:2], (64, n))
    w1zb = jnp.broadcast_to(slab[0:64, 2:3], (64, n))
    b1b = jnp.broadcast_to(slab[0:64, 3:4], (64, n))
    b2b = jnp.broadcast_to(slab[:, 4:5], (256, n))
    bf1 = slab[0:64, 5:6]
    bf2 = slab[0:16, 6:7]
    bf3 = slab[0:1, 7:8]
    bf4 = slab[0:64, 8:9]
    bf5 = slab[0:16, 9:10]
    bf6 = slab[0:1, 10:11]
    wf3c = slab[0:16, 11:12]
    wf6c = slab[0:16, 12:13]

    w2t = w2_ref[...]                                     # (256, 64) bf16
    wf1t = wf1_ref[...]                                   # (64, 256) f32
    wf2t = wf2_ref[...]                                   # (16, 64)  f32
    wf4t = wf4_ref[...]
    wf5t = wf5_ref[...]

    def trunk_pool(px, py, pz):
        # px/py/pz: (1, n) f32, lane-dense over the points.
        # conv1 (Cin=3): three VPU broadcast-FMAs (a K=3 MXU dot would waste
        # >97% of the contraction depth).  BN1 already folded into w1/b1.
        h1 = jnp.maximum(w1xb * px + w1yb * py + w1zb * pz + b1b, 0.0)  # (64,n)
        # conv2 (64 -> 256): bf16 MXU feed, f32 accumulate. M=256, K=64, lanes=n.
        h2 = jnp.maximum(
            jnp.dot(w2t, h1.astype(jnp.bfloat16),
                    preferred_element_type=jnp.float32) + b2b, 0.0)      # (256,n)
        # global max-pool over points = lane reduce
        return jnp.max(h2, axis=1, keepdims=True)                        # (256,1)

    def head(g_t, wa, ba, wb, bb, wc, bc):
        # g_t: (256, bt) -- channels on sublanes, batch on lanes (f32 heads;
        # negligible FLOPs, keeps theta accurate for sin/cos downstream).
        f = jnp.maximum(
            jnp.dot(wa, g_t, preferred_element_type=jnp.float32) + ba, 0.0)
        f = jnp.maximum(
            jnp.dot(wb, f, preferred_element_type=jnp.float32) + bb, 0.0)
        # Dropout layers are identity in eval mode.
        return jnp.sum(f * wc, axis=0, keepdims=True) + bc               # (1,bt)

    # ---------------- encoder #1 -> theta1 ----------------
    pts, g_cols = [], []
    for b in range(bt):
        xb = x_ref[b]                                     # (3, n)
        px, py, pz = xb[0:1, :], xb[1:2, :], xb[2:3, :]
        pts.append((px, py, pz))
        g_cols.append(trunk_pool(px, py, pz))
    theta1 = head(jnp.concatenate(g_cols, axis=1),
                  wf1t, bf1, wf2t, bf2, wf3c, bf3)        # (1, bt)

    sin1, cos1 = _sin_cos(theta1)
    omc1 = 1.0 - cos1

    # --- Rodrigues R per batch, rotate points, encoder #2 trunk ---
    # NOTE: matches the PyTorch module -- `direction` is used as given
    # (assumed to be a unit axis; no in-kernel normalization).
    rots, g2_cols = [], []
    for b in range(bt):
        px, py, pz = pts[b]
        db = dir_ref[b]                                   # (1, 3)
        axv, ayv, azv = db[:, 0:1], db[:, 1:2], db[:, 2:3]
        sb = sin1[:, b:b + 1]
        ob = omc1[:, b:b + 1]
        kxy, kxz, kyz = axv * ayv, axv * azv, ayv * azv
        r00 = 1.0 - ob * (azv * azv + ayv * ayv)
        r01 = -sb * azv + ob * kxy
        r02 = sb * ayv + ob * kxz
        r10 = sb * azv + ob * kxy
        r11 = 1.0 - ob * (azv * azv + axv * axv)
        r12 = -sb * axv + ob * kyz
        r20 = -sb * ayv + ob * kxz
        r21 = sb * axv + ob * kyz
        r22 = 1.0 - ob * (ayv * ayv + axv * axv)
        rmat_ref[b] = jnp.concatenate(
            [r00, r01, r02, r10, r11, r12, r20, r21, r22], axis=1)   # (1, 9)
        # p' = R @ p, lane-dense over the n points
        rx = r00 * px + r01 * py + r02 * pz
        ry = r10 * px + r11 * py + r12 * pz
        rz = r20 * px + r21 * py + r22 * pz
        rots.append((rx, ry, rz))
        g2_cols.append(trunk_pool(rx, ry, rz))
    theta2 = head(jnp.concatenate(g2_cols, axis=1),
                  wf4t, bf4, wf5t, bf5, wf6c, bf6)        # (1, bt)

    # --- mirror about plane with normal [cos(theta2), sin(theta2), 0] ---
    sin2, cos2 = _sin_cos(theta2)
    for b in range(bt):
        rx, ry, rz = rots[b]
        mvx = cos2[:, b:b + 1]
        mvy = sin2[:, b:b + 1]
        inner = mvx * rx + mvy * ry                       # mv_z == 0
        mx = rx - 2.0 * inner * mvx
        my = ry - 2.0 * inner * mvy
        # channel order (mx,my,mz,rx,ry,rz); mz == rz.  Dense (6, n) store.
        patch_ref[b] = jnp.concatenate([mx, my, rz, rx, ry, rz], axis=0)


# ----------------------------------------------------------------------------
# Host-side wrapper
# ----------------------------------------------------------------------------
def _pick_bt(B, n_points, max_points=4096):
    """Largest divisor bt of B with bt*n_points <= max_points, preferring to
    keep the grid length >= 2 so both v7x TensorCores get work."""
    divs = [d for d in range(1, B + 1)
            if B % d == 0 and d * n_points <= max_points]
    if not divs:
        return 1
    two_step = [d for d in divs if B // d >= 2]
    return max(two_step) if two_step else max(divs)


def fold_bn(w, b, gamma, beta, mean, var, eps=1e-5):
    """Fold an eval-mode BatchNorm1d (with running stats) into (w, b)."""
    scale = gamma / jnp.sqrt(var + eps)
    return w * scale[None, :], ((b - mean) * scale + beta)[None, :]


def forward(x, direction, params, max_points=4096):
    """x: (B, N, 3) f32, direction: (B, 3) f32 -> ((B, N, 6), (B, 3, 3))."""
    B, N, _ = x.shape
    p = params

    w1, b1 = fold_bn(p['conv1_w'], p['conv1_b'], p['bn1_gamma'], p['bn1_beta'],
                     p['bn1_mean'], p['bn1_var'])
    w2, b2 = fold_bn(p['conv2_w'], p['conv2_b'], p['bn2_gamma'], p['bn2_beta'],
                     p['bn2_mean'], p['bn2_var'])
    wf1, bf1 = fold_bn(p['fc1_w'], p['fc1_b'], p['bn3_gamma'], p['bn3_beta'],
                       p['bn3_mean'], p['bn3_var'])
    wf2, bf2 = fold_bn(p['fc2_w'], p['fc2_b'], p['bn4_gamma'], p['bn4_beta'],
                       p['bn4_mean'], p['bn4_var'])
    wf4, bf4 = fold_bn(p['fc4_w'], p['fc4_b'], p['bn5_gamma'], p['bn5_beta'],
                       p['bn5_mean'], p['bn5_var'])
    wf5, bf5 = fold_bn(p['fc5_w'], p['fc5_b'], p['bn6_gamma'], p['bn6_beta'],
                       p['bn6_mean'], p['bn6_var'])
    wf3, bf3 = p['fc3_w'], p['fc3_b']
    wf6, bf6 = p['fc6_w'], p['fc6_b']

    # ---- channel-major layout + lane padding to a multiple of 128 ----
    xcm = jnp.transpose(x.astype(jnp.float32), (0, 2, 1))        # (B, 3, N)
    Np = ((N + 127) // 128) * 128
    if Np != N:
        # Pad with copies of point 0 (a REAL point): post-ReLU activations are
        # >= 0, so zero columns could win the global max-pool and change theta.
        pad = jnp.broadcast_to(xcm[:, :, 0:1], (B, 3, Np - N))
        xcm = jnp.concatenate([xcm, pad], axis=2)

    bt = _pick_bt(B, Np, max_points)
    grid = (B // bt,)

    # ---- pack the small per-channel params into one resident (256,13) slab ----
    def col(v):
        v = jnp.asarray(v, jnp.float32).reshape(-1)
        return jnp.pad(v, (0, 256 - v.shape[0]))
    slab = jnp.stack(
        [col(w1[0]), col(w1[1]), col(w1[2]), col(b1),     # conv1 weight cols + b1
         col(b2),                                         # conv2 bias
         col(bf1), col(bf2), col(bf3),                    # head 1 biases
         col(bf4), col(bf5), col(bf6),                    # head 2 biases
         col(wf3[:, 0]), col(wf6[:, 0])], axis=1)         # fc3 / fc6 weights

    w2t = w2.T.astype(jnp.bfloat16)                       # (256, 64) bf16 MXU feed
    wf1t, wf2t = wf1.T, wf2.T                             # (64,256), (16,64)
    wf4t, wf5t = wf4.T, wf5.T
    dir3 = direction.reshape(B, 1, 3).astype(jnp.float32)

    def wspec(shape):
        # Constant index_map: fetched once, VMEM buffer re-used across steps.
        return pl.BlockSpec(shape, lambda i: (0,) * len(shape))

    patch_cm, r_flat = pl.pallas_call(
        _fused_kernel,
        out_shape=(jax.ShapeDtypeStruct((B, 6, Np), jnp.float32),
                   jax.ShapeDtypeStruct((B, 1, 9), jnp.float32)),
        grid=grid,
        in_specs=[
            pl.BlockSpec((bt, 3, Np), lambda i: (i, 0, 0)),
            pl.BlockSpec((bt, 1, 3), lambda i: (i, 0, 0)),
            wspec((256, 13)),
            wspec((256, 64)),
            wspec((64, 256)), wspec((16, 64)),
            wspec((64, 256)), wspec((16, 64)),
        ],
        out_specs=(pl.BlockSpec((bt, 6, Np), lambda i: (i, 0, 0)),
                   pl.BlockSpec((bt, 1, 9), lambda i: (i, 0, 0))),
        compiler_params=pltpu.CompilerParams(
            dimension_semantics=("parallel",),             # batch tiles independent
            vmem_limit_bytes=48 * 1024 * 1024),            # > v5e's 16 MiB default,
                                                           # < v7x's 64 MiB physical
    )(xcm, dir3, slab, w2t, wf1t, wf2t, wf4t, wf5t)

    patch = jnp.transpose(patch_cm[:, :, :N], (0, 2, 1))   # (B, N, 6)
    return patch, r_flat.reshape(B, 3, 3)


# ----------------------------------------------------------------------------
# Pure-JAX reference (same eval-mode semantics) and parameter init
# ----------------------------------------------------------------------------
def forward_ref(x, direction, params):
    p = params
    eps = 1e-5

    def bn(h, i):
        return ((h - p[f'bn{i}_mean']) / jnp.sqrt(p[f'bn{i}_var'] + eps)
                * p[f'bn{i}_gamma'] + p[f'bn{i}_beta'])

    def encoder(pts, fa, fb, fc, bna, bnb):
        h = jnp.maximum(bn(pts @ p['conv1_w'] + p['conv1_b'], 1), 0.0)
        h = jnp.maximum(bn(h @ p['conv2_w'] + p['conv2_b'], 2), 0.0)
        g = jnp.max(h, axis=1)
        f = jnp.maximum(bn(g @ p[fa + '_w'] + p[fa + '_b'], bna), 0.0)
        f = jnp.maximum(bn(f @ p[fb + '_w'] + p[fb + '_b'], bnb), 0.0)
        return f @ p[fc + '_w'] + p[fc + '_b']            # (B, 1)

    B = x.shape[0]
    theta1 = encoder(x, 'fc1', 'fc2', 'fc3', 3, 4)
    ax, ay, az = direction[:, 0], direction[:, 1], direction[:, 2]
    zeros = jnp.zeros_like(ax)
    K = jnp.stack([zeros, -az, ay, az, zeros, -ax, -ay, ax, zeros],
                  axis=-1).reshape(B, 3, 3)
    R = (jnp.eye(3, dtype=jnp.float32)[None]
         + jnp.sin(theta1)[:, :, None] * K
         + (1.0 - jnp.cos(theta1))[:, :, None] * jnp.matmul(K, K))
    rot = jnp.einsum('bij,bnj->bni', R, x)
    theta2 = encoder(rot, 'fc4', 'fc5', 'fc6', 5, 6)
    mv = jnp.concatenate([jnp.cos(theta2), jnp.sin(theta2),
                          jnp.zeros((B, 1), jnp.float32)], axis=-1)     # (B, 3)
    inner = jnp.einsum('bc,bnc->bn', mv, rot)[..., None]                # (B, N, 1)
    mirrored = rot - 2.0 * inner * mv[:, None, :]
    return jnp.concatenate([mirrored, rot], axis=-1), R


def init_params(key):
    ks = jax.random.split(key, 32)

    def rnd(k, shape, scale=0.1):
        return jax.random.normal(k, shape, dtype=jnp.float32) * scale

    p = {
        'conv1_w': rnd(ks[0], (3, 64)),    'conv1_b': rnd(ks[1], (64,)),
        'conv2_w': rnd(ks[2], (64, 256)),  'conv2_b': rnd(ks[3], (256,)),
        'fc1_w':   rnd(ks[4], (256, 64)),  'fc1_b':   rnd(ks[5], (64,)),
        'fc2_w':   rnd(ks[6], (64, 16)),   'fc2_b':   rnd(ks[7], (16,)),
        'fc3_w':   rnd(ks[8], (16, 1)),    'fc3_b':   rnd(ks[9], (1,)),
        'fc4_w':   rnd(ks[10], (256, 64)), 'fc4_b':   rnd(ks[11], (64,)),
        'fc5_w':   rnd(ks[12], (64, 16)),  'fc5_b':   rnd(ks[13], (16,)),
        'fc6_w':   rnd(ks[14], (16, 1)),   'fc6_b':   rnd(ks[15], (1,)),
    }
    bn_dims = (64, 256, 64, 16, 64, 16)
    for i, c in enumerate(bn_dims, start=1):
        p[f'bn{i}_gamma'] = 1.0 + rnd(ks[16 + 2 * (i - 1)], (c,), 0.05)
        p[f'bn{i}_beta'] = rnd(ks[17 + 2 * (i - 1)], (c,), 0.05)
        p[f'bn{i}_mean'] = jnp.zeros((c,), jnp.float32)   # fresh-module stats
        p[f'bn{i}_var'] = jnp.ones((c,), jnp.float32)
    return p


if __name__ == "__main__":
    key = jax.random.PRNGKey(0)
    kx, kd, kp = jax.random.split(key, 3)

    # N deliberately NOT a multiple of 128 to exercise the real-point padding
    # path; B=4 so the batch tile is 2 and the grid has 2 steps.
    B, N = 4, 200
    x = jax.random.normal(kx, (B, N, 3), dtype=jnp.float32)
    direction = jax.random.normal(kd, (B, 3), dtype=jnp.float32)
    direction = direction / jnp.linalg.norm(direction, axis=-1, keepdims=True)

    params = init_params(kp)

    fwd = jax.jit(functools.partial(forward, params=params))
    patch_out, R = fwd(x, direction)
    jax.block_until_ready((patch_out, R))

    assert patch_out.shape == (B, N, 6), patch_out.shape
    assert R.shape == (B, 3, 3), R.shape
    assert bool(jnp.all(jnp.isfinite(patch_out))) and bool(jnp.all(jnp.isfinite(R)))

    # Sanity check against a pure-JAX reference of the same eval-mode forward.
    # Loose tolerance: the kernel feeds conv2 in bf16 (reference uses TPU
    # default-precision f32 matmuls, which also truncate to bf16 multiplies),
    # plus the in-kernel polynomial sin/cos (~1e-6 err).
    patch_ref, R_ref = jax.jit(functools.partial(forward_ref, params=params))(x, direction)
    err_p = float(jnp.max(jnp.abs(patch_out - patch_ref)))
    err_r = float(jnp.max(jnp.abs(R - R_ref)))
    assert err_p < 5e-2 and err_r < 2e-2, (err_p, err_r)

    print("KERNEL_OK")
</pallas_src>

<mosaic_0001>
module attributes {stable_mosaic.version = 11 : i64} {
  func.func @_fused_kernel(%arg0: i32, %arg1: memref<2x3x256xf32, #tpu.memory_space<vmem>>, %arg2: memref<2x1x3xf32, #tpu.memory_space<vmem>>, %arg3: memref<256x13xf32, #tpu.memory_space<vmem>>, %arg4: memref<256x64xbf16, #tpu.memory_space<vmem>>, %arg5: memref<64x256xf32, #tpu.memory_space<vmem>>, %arg6: memref<16x64xf32, #tpu.memory_space<vmem>>, %arg7: memref<64x256xf32, #tpu.memory_space<vmem>>, %arg8: memref<16x64xf32, #tpu.memory_space<vmem>>, %arg9: memref<2x6x256xf32, #tpu.memory_space<vmem>>, %arg10: memref<2x1x9xf32, #tpu.memory_space<vmem>>) attributes {dimension_semantics = [#tpu.dimension_semantics<parallel>], iteration_bounds = array<i64: 2>, scalar_prefetch = 0 : i64, scratch_operands = 0 : i64, tpu.core_type = #tpu.core_type<tc>, window_params = [{transform_indices = @transform_0, window_bounds = array<i64: 2, 3, 256>}, {transform_indices = @transform_1, window_bounds = array<i64: 2, 1, 3>}, {pipeline_mode = #tpu.pipeline_mode<synchronous>, transform_indices = @transform_2, window_bounds = array<i64: 256, 13>}, {pipeline_mode = #tpu.pipeline_mode<synchronous>, transform_indices = @transform_3, window_bounds = array<i64: 256, 64>}, {pipeline_mode = #tpu.pipeline_mode<synchronous>, transform_indices = @transform_4, window_bounds = array<i64: 64, 256>}, {pipeline_mode = #tpu.pipeline_mode<synchronous>, transform_indices = @transform_5, window_bounds = array<i64: 16, 64>}, {pipeline_mode = #tpu.pipeline_mode<synchronous>, transform_indices = @transform_6, window_bounds = array<i64: 64, 256>}, {pipeline_mode = #tpu.pipeline_mode<synchronous>, transform_indices = @transform_7, window_bounds = array<i64: 16, 64>}, {transform_indices = @transform_8, window_bounds = array<i64: 2, 6, 256>}, {transform_indices = @transform_9, window_bounds = array<i64: 2, 1, 9>}]} {
    %c0 = arith.constant 0 : index
    %c0_0 = arith.constant 0 : index
    %0 = vector.load %arg3[%c0, %c0_0] : memref<256x13xf32, #tpu.memory_space<vmem>>, vector<256x13xf32>
    %1 = vector.extract_strided_slice %0 {offsets = [0, 0], sizes = [64, 1], strides = [1, 1]} : vector<256x13xf32> to vector<64x1xf32>
    %2 = vector.shape_cast %1 : vector<64x1xf32> to vector<64x1xf32>
    %3 = vector.broadcast %2 : vector<64x1xf32> to vector<64x256xf32>
    %4 = vector.extract_strided_slice %0 {offsets = [0, 1], sizes = [64, 1], strides = [1, 1]} : vector<256x13xf32> to vector<64x1xf32>
    %5 = vector.shape_cast %4 : vector<64x1xf32> to vector<64x1xf32>
    %6 = vector.broadcast %5 : vector<64x1xf32> to vector<64x256xf32>
    %7 = vector.extract_strided_slice %0 {offsets = [0, 2], sizes = [64, 1], strides = [1, 1]} : vector<256x13xf32> to vector<64x1xf32>
    %8 = vector.shape_cast %7 : vector<64x1xf32> to vector<64x1xf32>
    %9 = vector.broadcast %8 : vector<64x1xf32> to vector<64x256xf32>
    %10 = vector.extract_strided_slice %0 {offsets = [0, 3], sizes = [64, 1], strides = [1, 1]} : vector<256x13xf32> to vector<64x1xf32>
    %11 = vector.shape_cast %10 : vector<64x1xf32> to vector<64x1xf32>
    %12 = vector.broadcast %11 : vector<64x1xf32> to vector<64x256xf32>
    %13 = vector.extract_strided_slice %0 {offsets = [0, 4], sizes = [256, 1], strides = [1, 1]} : vector<256x13xf32> to vector<256x1xf32>
    %14 = vector.shape_cast %13 : vector<256x1xf32> to vector<256x1xf32>
    %15 = vector.broadcast %14 : vector<256x1xf32> to vector<256x256xf32>
    %16 = vector.extract_strided_slice %0 {offsets = [0, 5], sizes = [64, 1], strides = [1, 1]} : vector<256x13xf32> to vector<64x1xf32>
    %17 = vector.extract_strided_slice %0 {offsets = [0, 6], sizes = [16, 1], strides = [1, 1]} : vector<256x13xf32> to vector<16x1xf32>
    %18 = vector.extract_strided_slice %0 {offsets = [0, 7], sizes = [1, 1], strides = [1, 1]} : vector<256x13xf32> to vector<1x1xf32>
    %19 = vector.extract_strided_slice %0 {offsets = [0, 8], sizes = [64, 1], strides = [1, 1]} : vector<256x13xf32> to vector<64x1xf32>
    %20 = vector.extract_strided_slice %0 {offsets = [0, 9], sizes = [16, 1], strides = [1, 1]} : vector<256x13xf32> to vector<16x1xf32>
    %21 = vector.extract_strided_slice %0 {offsets = [0, 10], sizes = [1, 1], strides = [1, 1]} : vector<256x13xf32> to vector<1x1xf32>
    %22 = vector.extract_strided_slice %0 {offsets = [0, 11], sizes = [16, 1], strides = [1, 1]} : vector<256x13xf32> to vector<16x1xf32>
    %23 = vector.extract_strided_slice %0 {offsets = [0, 12], sizes = [16, 1], strides = [1, 1]} : vector<256x13xf32> to vector<16x1xf32>
    %c0_1 = arith.constant 0 : index
    %c0_2 = arith.constant 0 : index
    %24 = vector.load %arg4[%c0_1, %c0_2] : memref<256x64xbf16, #tpu.memory_space<vmem>>, vector<256x64xbf16>
    %c0_3 = arith.constant 0 : index
    %c0_4 = arith.constant 0 : index
    %25 = vector.load %arg5[%c0_3, %c0_4] : memref<64x256xf32, #tpu.memory_space<vmem>>, vector<64x256xf32>
    %c0_5 = arith.constant 0 : index
    %c0_6 = arith.constant 0 : index
    %26 = vector.load %arg6[%c0_5, %c0_6] : memref<16x64xf32, #tpu.memory_space<vmem>>, vector<16x64xf32>
    %c0_7 = arith.constant 0 : index
    %c0_8 = arith.constant 0 : index
    %27 = vector.load %arg7[%c0_7, %c0_8] : memref<64x256xf32, #tpu.memory_space<vmem>>, vector<64x256xf32>
    %c0_9 = arith.constant 0 : index
    %c0_10 = arith.constant 0 : index
    %28 = vector.load %arg8[%c0_9, %c0_10] : memref<16x64xf32, #tpu.memory_space<vmem>>, vector<16x64xf32>
    %c0_11 = arith.constant 0 : index
    %c0_12 = arith.constant 0 : index
    %c0_13 = arith.constant 0 : index
    %29 = vector.load %arg1[%c0_11, %c0_12, %c0_13] : memref<2x3x256xf32, #tpu.memory_space<vmem>>, vector<1x3x256xf32>
    %30 = vector.shape_cast %29 : vector<1x3x256xf32> to vector<3x256xf32>
    %31 = vector.extract_strided_slice %30 {offsets = [0, 0], sizes = [1, 256], strides = [1, 1]} : vector<3x256xf32> to vector<1x256xf32>
    %32 = vector.extract_strided_slice %30 {offsets = [1, 0], sizes = [1, 256], strides = [1, 1]} : vector<3x256xf32> to vector<1x256xf32>
    %33 = vector.extract_strided_slice %30 {offsets = [2, 0], sizes = [1, 256], strides = [1, 1]} : vector<3x256xf32> to vector<1x256xf32>
    %34 = vector.broadcast %31 : vector<1x256xf32> to vector<64x256xf32>
    %35 = arith.mulf %3, %34 : vector<64x256xf32>
    %36 = vector.broadcast %32 : vector<1x256xf32> to vector<64x256xf32>
    %37 = arith.mulf %6, %36 : vector<64x256xf32>
    %38 = arith.addf %35, %37 : vector<64x256xf32>
    %39 = vector.broadcast %33 : vector<1x256xf32> to vector<64x256xf32>
    %40 = arith.mulf %9, %39 : vector<64x256xf32>
    %41 = arith.addf %38, %40 : vector<64x256xf32>
    %42 = arith.addf %41, %12 : vector<64x256xf32>
    %cst = arith.constant 0.000000e+00 : f32
    %43 = vector.broadcast %cst : f32 to vector<64x256xf32>
    %44 = arith.maximumf %42, %43 : vector<64x256xf32>
    %45 = arith.truncf %44 : vector<64x256xf32> to vector<64x256xbf16>
    %cst_14 = arith.constant dense<0.000000e+00> : vector<256x256xf32>
    %46 = tpu.matmul %24, %45, %cst_14 {dimension_numbers = #tpu.dot_dimension_numbers<[1], [0], [0], [1], [0, 0, 1, 1], [], []>} : vector<256x64xbf16>, vector<64x256xbf16>, vector<256x256xf32> -> vector<256x256xf32>
    %47 = arith.addf %46, %15 : vector<256x256xf32>
    %cst_15 = arith.constant 0.000000e+00 : f32
    %48 = vector.broadcast %cst_15 : f32 to vector<256x256xf32>
    %49 = arith.maximumf %47, %48 : vector<256x256xf32>
    %cst_16 = arith.constant dense<0xFF800000> : vector<256xf32>
    %50 = vector.multi_reduction <maximumf>, %49, %cst_16 [1] : vector<256x256xf32> to vector<256xf32>
    %51 = vector.shape_cast %50 : vector<256xf32> to vector<256x1xf32>
    %c1 = arith.constant 1 : index
    %c0_17 = arith.constant 0 : index
    %c0_18 = arith.constant 0 : index
    %52 = vector.load %arg1[%c1, %c0_17, %c0_18] : memref<2x3x256xf32, #tpu.memory_space<vmem>>, vector<1x3x256xf32>
    %53 = vector.shape_cast %52 : vector<1x3x256xf32> to vector<3x256xf32>
    %54 = vector.extract_strided_slice %53 {offsets = [0, 0], sizes = [1, 256], strides = [1, 1]} : vector<3x256xf32> to vector<1x256xf32>
    %55 = vector.extract_strided_slice %53 {offsets = [1, 0], sizes = [1, 256], strides = [1, 1]} : vector<3x256xf32> to vector<1x256xf32>
    %56 = vector.extract_strided_slice %53 {offsets = [2, 0], sizes = [1, 256], strides = [1, 1]} : vector<3x256xf32> to vector<1x256xf32>
    %57 = vector.broadcast %54 : vector<1x256xf32> to vector<64x256xf32>
    %58 = arith.mulf %3, %57 : vector<64x256xf32>
    %59 = vector.broadcast %55 : vector<1x256xf32> to vector<64x256xf32>
    %60 = arith.mulf %6, %59 : vector<64x256xf32>
    %61 = arith.addf %58, %60 : vector<64x256xf32>
    %62 = vector.broadcast %56 : vector<1x256xf32> to vector<64x256xf32>
    %63 = arith.mulf %9, %62 : vector<64x256xf32>
    %64 = arith.addf %61, %63 : vector<64x256xf32>
    %65 = arith.addf %64, %12 : vector<64x256xf32>
    %cst_19 = arith.constant 0.000000e+00 : f32
    %66 = vector.broadcast %cst_19 : f32 to vector<64x256xf32>
    %67 = arith.maximumf %65, %66 : vector<64x256xf32>
    %68 = arith.truncf %67 : vector<64x256xf32> to vector<64x256xbf16>
    %cst_20 = arith.constant dense<0.000000e+00> : vector<256x256xf32>
    %69 = tpu.matmul %24, %68, %cst_20 {dimension_numbers = #tpu.dot_dimension_numbers<[1], [0], [0], [1], [0, 0, 1, 1], [], []>} : vector<256x64xbf16>, vector<64x256xbf16>, vector<256x256xf32> -> vector<256x256xf32>
    %70 = arith.addf %69, %15 : vector<256x256xf32>
    %cst_21 = arith.constant 0.000000e+00 : f32
    %71 = vector.broadcast %cst_21 : f32 to vector<256x256xf32>
    %72 = arith.maximumf %70, %71 : vector<256x256xf32>
    %cst_22 = arith.constant dense<0xFF800000> : vector<256xf32>
    %73 = vector.multi_reduction <maximumf>, %72, %cst_22 [1] : vector<256x256xf32> to vector<256xf32>
    %74 = vector.shape_cast %73 : vector<256xf32> to vector<256x1xf32>
    %75 = tpu.concatenate %51, %74 in 1 : vector<256x1xf32>, vector<256x1xf32> -> vector<256x2xf32>
    %cst_23 = arith.constant dense<0.000000e+00> : vector<64x2xf32>
    %76 = tpu.matmul %25, %75, %cst_23 {dimension_numbers = #tpu.dot_dimension_numbers<[1], [0], [0], [1], [0, 0, 1, 1], [], []>} : vector<64x256xf32>, vector<256x2xf32>, vector<64x2xf32> -> vector<64x2xf32>
    %77 = vector.broadcast %16 : vector<64x1xf32> to vector<64x2xf32>
    %78 = arith.addf %76, %77 : vector<64x2xf32>
    %cst_24 = arith.constant 0.000000e+00 : f32
    %79 = vector.broadcast %cst_24 : f32 to vector<64x2xf32>
    %80 = arith.maximumf %78, %79 : vector<64x2xf32>
    %cst_25 = arith.constant dense<0.000000e+00> : vector<16x2xf32>
    %81 = tpu.matmul %26, %80, %cst_25 {dimension_numbers = #tpu.dot_dimension_numbers<[1], [0], [0], [1], [0, 0, 1, 1], [], []>} : vector<16x64xf32>, vector<64x2xf32>, vector<16x2xf32> -> vector<16x2xf32>
    %82 = vector.broadcast %17 : vector<16x1xf32> to vector<16x2xf32>
    %83 = arith.addf %81, %82 : vector<16x2xf32>
    %cst_26 = arith.constant 0.000000e+00 : f32
    %84 = vector.broadcast %cst_26 : f32 to vector<16x2xf32>
    %85 = arith.maximumf %83, %84 : vector<16x2xf32>
    %86 = vector.broadcast %22 : vector<16x1xf32> to vector<16x2xf32>
    %87 = arith.mulf %85, %86 : vector<16x2xf32>
    %cst_27 = arith.constant dense<0.000000e+00> : vector<2xf32>
    %88 = vector.multi_reduction <add>, %87, %cst_27 [0] : vector<16x2xf32> to vector<2xf32>
    %89 = vector.shape_cast %88 : vector<2xf32> to vector<1x2xf32>
    %90 = vector.broadcast %18 : vector<1x1xf32> to vector<1x2xf32>
    %91 = arith.addf %89, %90 : vector<1x2xf32>
    %cst_28 = arith.constant 0.318309873 : f32
    %92 = vector.broadcast %cst_28 : f32 to vector<1x2xf32>
    %93 = arith.mulf %91, %92 : vector<1x2xf32>
    %cst_29 = arith.constant 0.000000e+00 : f32
    %94 = vector.broadcast %cst_29 : f32 to vector<1x2xf32>
    %95 = arith.cmpf oge, %93, %94 : vector<1x2xf32>
    %cst_30 = arith.constant 5.000000e-01 : f32
    %96 = vector.broadcast %cst_30 : f32 to vector<1x2xf32>
    %97 = arith.addf %93, %96 : vector<1x2xf32>
    %cst_31 = arith.constant 5.000000e-01 : f32
    %98 = vector.broadcast %cst_31 : f32 to vector<1x2xf32>
    %99 = arith.subf %93, %98 : vector<1x2xf32>
    %100 = arith.select %95, %97, %99 : vector<1x2xi1>, vector<1x2xf32>
    %101 = arith.fptosi %100 : vector<1x2xf32> to vector<1x2xi32>
    %102 = arith.sitofp %101 : vector<1x2xi32> to vector<1x2xf32>
    %cst_32 = arith.constant 3.140625 : f32
    %103 = vector.broadcast %cst_32 : f32 to vector<1x2xf32>
    %104 = arith.mulf %102, %103 : vector<1x2xf32>
    %105 = arith.subf %91, %104 : vector<1x2xf32>
    %cst_33 = arith.constant 9.67653584E-4 : f32
    %106 = vector.broadcast %cst_33 : f32 to vector<1x2xf32>
    %107 = arith.mulf %102, %106 : vector<1x2xf32>
    %108 = arith.subf %105, %107 : vector<1x2xf32>
    %cst_34 = arith.constant 5.000000e-01 : f32
    %109 = vector.broadcast %cst_34 : f32 to vector<1x2xf32>
    %110 = arith.mulf %102, %109 : vector<1x2xf32>
    %111 = arith.fptosi %110 : vector<1x2xf32> to vector<1x2xi32>
    %112 = arith.sitofp %111 : vector<1x2xi32> to vector<1x2xf32>
    %113 = arith.subf %110, %112 : vector<1x2xf32>
    %114 = math.absf %113 : vector<1x2xf32>
    %cst_35 = arith.constant 4.000000e+00 : f32
    %115 = vector.broadcast %cst_35 : f32 to vector<1x2xf32>
    %116 = arith.mulf %115, %114 : vector<1x2xf32>
    %cst_36 = arith.constant 1.000000e+00 : f32
    %117 = vector.broadcast %cst_36 : f32 to vector<1x2xf32>
    %118 = arith.subf %117, %116 : vector<1x2xf32>
    %119 = arith.mulf %108, %108 : vector<1x2xf32>
    %cst_37 = arith.constant -2.50521079E-8 : f32
    %120 = vector.broadcast %cst_37 : f32 to vector<1x2xf32>
    %121 = arith.mulf %119, %120 : vector<1x2xf32>
    %cst_38 = arith.constant 2.75573188E-6 : f32
    %122 = vector.broadcast %cst_38 : f32 to vector<1x2xf32>
    %123 = arith.addf %122, %121 : vector<1x2xf32>
    %124 = arith.mulf %119, %123 : vector<1x2xf32>
    %cst_39 = arith.constant -1.98412701E-4 : f32
    %125 = vector.broadcast %cst_39 : f32 to vector<1x2xf32>
    %126 = arith.addf %125, %124 : vector<1x2xf32>
    %127 = arith.mulf %119, %126 : vector<1x2xf32>
    %cst_40 = arith.constant 0.00833333377 : f32
    %128 = vector.broadcast %cst_40 : f32 to vector<1x2xf32>
    %129 = arith.addf %128, %127 : vector<1x2xf32>
    %130 = arith.mulf %119, %129 : vector<1x2xf32>
    %cst_41 = arith.constant -0.166666672 : f32
    %131 = vector.broadcast %cst_41 : f32 to vector<1x2xf32>
    %132 = arith.addf %131, %130 : vector<1x2xf32>
    %133 = arith.mulf %119, %132 : vector<1x2xf32>
    %cst_42 = arith.constant 1.000000e+00 : f32
    %134 = vector.broadcast %cst_42 : f32 to vector<1x2xf32>
    %135 = arith.addf %134, %133 : vector<1x2xf32>
    %136 = arith.mulf %108, %135 : vector<1x2xf32>
    %cst_43 = arith.constant 2.08767559E-9 : f32
    %137 = vector.broadcast %cst_43 : f32 to vector<1x2xf32>
    %138 = arith.mulf %119, %137 : vector<1x2xf32>
    %cst_44 = arith.constant -2.755732E-7 : f32
    %139 = vector.broadcast %cst_44 : f32 to vector<1x2xf32>
    %140 = arith.addf %139, %138 : vector<1x2xf32>
    %141 = arith.mulf %119, %140 : vector<1x2xf32>
    %cst_45 = arith.constant 2.48015876E-5 : f32
    %142 = vector.broadcast %cst_45 : f32 to vector<1x2xf32>
    %143 = arith.addf %142, %141 : vector<1x2xf32>
    %144 = arith.mulf %119, %143 : vector<1x2xf32>
    %cst_46 = arith.constant -0.00138888892 : f32
    %145 = vector.broadcast %cst_46 : f32 to vector<1x2xf32>
    %146 = arith.addf %145, %144 : vector<1x2xf32>
    %147 = arith.mulf %119, %146 : vector<1x2xf32>
    %cst_47 = arith.constant 0.0416666679 : f32
    %148 = vector.broadcast %cst_47 : f32 to vector<1x2xf32>
    %149 = arith.addf %148, %147 : vector<1x2xf32>
    %150 = arith.mulf %119, %149 : vector<1x2xf32>
    %cst_48 = arith.constant -5.000000e-01 : f32
    %151 = vector.broadcast %cst_48 : f32 to vector<1x2xf32>
    %152 = arith.addf %151, %150 : vector<1x2xf32>
    %153 = arith.mulf %119, %152 : vector<1x2xf32>
    %cst_49 = arith.constant 1.000000e+00 : f32
    %154 = vector.broadcast %cst_49 : f32 to vector<1x2xf32>
    %155 = arith.addf %154, %153 : vector<1x2xf32>
    %156 = arith.mulf %118, %136 : vector<1x2xf32>
    %157 = arith.mulf %118, %155 : vector<1x2xf32>
    %cst_50 = arith.constant 1.000000e+00 : f32
    %158 = vector.broadcast %cst_50 : f32 to vector<1x2xf32>
    %159 = arith.subf %158, %157 : vector<1x2xf32>
    %c0_51 = arith.constant 0 : index
    %c0_52 = arith.constant 0 : index
    %c0_53 = arith.constant 0 : index
    %160 = vector.load %arg2[%c0_51, %c0_52, %c0_53] : memref<2x1x3xf32, #tpu.memory_space<vmem>>, vector<1x1x3xf32>
    %161 = vector.shape_cast %160 : vector<1x1x3xf32> to vector<1x3xf32>
    %162 = vector.extract_strided_slice %161 {offsets = [0, 0], sizes = [1, 1], strides = [1, 1]} : vector<1x3xf32> to vector<1x1xf32>
    %163 = vector.extract_strided_slice %161 {offsets = [0, 1], sizes = [1, 1], strides = [1, 1]} : vector<1x3xf32> to vector<1x1xf32>
    %164 = vector.extract_strided_slice %161 {offsets = [0, 2], sizes = [1, 1], strides = [1, 1]} : vector<1x3xf32> to vector<1x1xf32>
    %165 = vector.extract_strided_slice %156 {offsets = [0, 0], sizes = [1, 1], strides = [1, 1]} : vector<1x2xf32> to vector<1x1xf32>
    %166 = vector.extract_strided_slice %159 {offsets = [0, 0], sizes = [1, 1], strides = [1, 1]} : vector<1x2xf32> to vector<1x1xf32>
    %167 = arith.mulf %162, %163 : vector<1x1xf32>
    %168 = arith.mulf %162, %164 : vector<1x1xf32>
    %169 = arith.mulf %163, %164 : vector<1x1xf32>
    %170 = arith.mulf %164, %164 : vector<1x1xf32>
    %171 = arith.mulf %163, %163 : vector<1x1xf32>
    %172 = arith.addf %170, %171 : vector<1x1xf32>
    %173 = arith.mulf %166, %172 : vector<1x1xf32>
    %cst_54 = arith.constant 1.000000e+00 : f32
    %174 = vector.broadcast %cst_54 : f32 to vector<1x1xf32>
    %175 = arith.subf %174, %173 : vector<1x1xf32>
    %cst_55 = arith.constant 0.000000e+00 : f32
    %176 = vector.broadcast %cst_55 : f32 to vector<1x1xf32>
    %177 = arith.subf %176, %165 : vector<1x1xf32>
    %178 = arith.mulf %177, %164 : vector<1x1xf32>
    %179 = arith.mulf %166, %167 : vector<1x1xf32>
    %180 = arith.addf %178, %179 : vector<1x1xf32>
    %181 = arith.mulf %165, %163 : vector<1x1xf32>
    %182 = arith.mulf %166, %168 : vector<1x1xf32>
    %183 = arith.addf %181, %182 : vector<1x1xf32>
    %184 = arith.mulf %165, %164 : vector<1x1xf32>
    %185 = arith.mulf %166, %167 : vector<1x1xf32>
    %186 = arith.addf %184, %185 : vector<1x1xf32>
    %187 = arith.mulf %164, %164 : vector<1x1xf32>
    %188 = arith.mulf %162, %162 : vector<1x1xf32>
    %189 = arith.addf %187, %188 : vector<1x1xf32>
    %190 = arith.mulf %166, %189 : vector<1x1xf32>
    %cst_56 = arith.constant 1.000000e+00 : f32
    %191 = vector.broadcast %cst_56 : f32 to vector<1x1xf32>
    %192 = arith.subf %191, %190 : vector<1x1xf32>
    %cst_57 = arith.constant 0.000000e+00 : f32
    %193 = vector.broadcast %cst_57 : f32 to vector<1x1xf32>
    %194 = arith.subf %193, %165 : vector<1x1xf32>
    %195 = arith.mulf %194, %162 : vector<1x1xf32>
    %196 = arith.mulf %166, %169 : vector<1x1xf32>
    %197 = arith.addf %195, %196 : vector<1x1xf32>
    %cst_58 = arith.constant 0.000000e+00 : f32
    %198 = vector.broadcast %cst_58 : f32 to vector<1x1xf32>
    %199 = arith.subf %198, %165 : vector<1x1xf32>
    %200 = arith.mulf %199, %163 : vector<1x1xf32>
    %201 = arith.mulf %166, %168 : vector<1x1xf32>
    %202 = arith.addf %200, %201 : vector<1x1xf32>
    %203 = arith.mulf %165, %162 : vector<1x1xf32>
    %204 = arith.mulf %166, %169 : vector<1x1xf32>
    %205 = arith.addf %203, %204 : vector<1x1xf32>
    %206 = arith.mulf %163, %163 : vector<1x1xf32>
    %207 = arith.mulf %162, %162 : vector<1x1xf32>
    %208 = arith.addf %206, %207 : vector<1x1xf32>
    %209 = arith.mulf %166, %208 : vector<1x1xf32>
    %cst_59 = arith.constant 1.000000e+00 : f32
    %210 = vector.broadcast %cst_59 : f32 to vector<1x1xf32>
    %211 = arith.subf %210, %209 : vector<1x1xf32>
    %212 = tpu.concatenate %175, %180, %183, %186, %192, %197, %202, %205, %211 in 1 : vector<1x1xf32>, vector<1x1xf32>, vector<1x1xf32>, vector<1x1xf32>, vector<1x1xf32>, vector<1x1xf32>, vector<1x1xf32>, vector<1x1xf32>, vector<1x1xf32> -> vector<1x9xf32>
    %c0_60 = arith.constant 0 : index
    %c0_61 = arith.constant 0 : index
    %c0_62 = arith.constant 0 : index
    %213 = vector.load %arg10[%c0_60, %c0_61, %c0_62] : memref<2x1x9xf32, #tpu.memory_space<vmem>>, vector<1x1x9xf32>
    %214 = vector.shape_cast %213 : vector<1x1x9xf32> to vector<1x9xf32>
    %215 = vector.shape_cast %212 : vector<1x9xf32> to vector<1x1x9xf32>
    tpu.vector_store %arg10[%c0_60, %c0_61, %c0_62], %215 {strides = array<i32>} : memref<2x1x9xf32, #tpu.memory_space<vmem>>, vector<1x1x9xf32>,
    %216 = vector.broadcast %175 : vector<1x1xf32> to vector<1x256xf32>
    %217 = arith.mulf %216, %31 : vector<1x256xf32>
    %218 = vector.broadcast %180 : vector<1x1xf32> to vector<1x256xf32>
    %219 = arith.mulf %218, %32 : vector<1x256xf32>
    %220 = arith.addf %217, %219 : vector<1x256xf32>
    %221 = vector.broadcast %183 : vector<1x1xf32> to vector<1x256xf32>
    %222 = arith.mulf %221, %33 : vector<1x256xf32>
    %223 = arith.addf %220, %222 : vector<1x256xf32>
    %224 = vector.broadcast %186 : vector<1x1xf32> to vector<1x256xf32>
    %225 = arith.mulf %224, %31 : vector<1x256xf32>
    %226 = vector.broadcast %192 : vector<1x1xf32> to vector<1x256xf32>
    %227 = arith.mulf %226, %32 : vector<1x256xf32>
    %228 = arith.addf %225, %227 : vector<1x256xf32>
    %229 = vector.broadcast %197 : vector<1x1xf32> to vector<1x256xf32>
    %230 = arith.mulf %229, %33 : vector<1x256xf32>
    %231 = arith.addf %228, %230 : vector<1x256xf32>
    %232 = vector.broadcast %202 : vector<1x1xf32> to vector<1x256xf32>
    %233 = arith.mulf %232, %31 : vector<1x256xf32>
    %234 = vector.broadcast %205 : vector<1x1xf32> to vector<1x256xf32>
    %235 = arith.mulf %234, %32 : vector<1x256xf32>
    %236 = arith.addf %233, %235 : vector<1x256xf32>
    %237 = vector.broadcast %211 : vector<1x1xf32> to vector<1x256xf32>
    %238 = arith.mulf %237, %33 : vector<1x256xf32>
    %239 = arith.addf %236, %238 : vector<1x256xf32>
    %240 = vector.broadcast %223 : vector<1x256xf32> to vector<64x256xf32>
    %241 = arith.mulf %3, %240 : vector<64x256xf32>
    %242 = vector.broadcast %231 : vector<1x256xf32> to vector<64x256xf32>
    %243 = arith.mulf %6, %242 : vector<64x256xf32>
    %244 = arith.addf %241, %243 : vector<64x256xf32>
    %245 = vector.broadcast %239 : vector<1x256xf32> to vector<64x256xf32>
    %246 = arith.mulf %9, %245 : vector<64x256xf32>
    %247 = arith.addf %244, %246 : vector<64x256xf32>
    %248 = arith.addf %247, %12 : vector<64x256xf32>
    %cst_63 = arith.constant 0.000000e+00 : f32
    %249 = vector.broadcast %cst_63 : f32 to vector<64x256xf32>
    %250 = arith.maximumf %248, %249 : vector<64x256xf32>
    %251 = arith.truncf %250 : vector<64x256xf32> to vector<64x256xbf16>
    %cst_64 = arith.constant dense<0.000000e+00> : vector<256x256xf32>
    %252 = tpu.matmul %24, %251, %cst_64 {dimension_numbers = #tpu.dot_dimension_numbers<[1], [0], [0], [1], [0, 0, 1, 1], [], []>} : vector<256x64xbf16>, vector<64x256xbf16>, vector<256x256xf32> -> vector<256x256xf32>
    %253 = arith.addf %252, %15 : vector<256x256xf32>
    %cst_65 = arith.constant 0.000000e+00 : f32
    %254 = vector.broadcast %cst_65 : f32 to vector<256x256xf32>
    %255 = arith.maximumf %253, %254 : vector<256x256xf32>
    %cst_66 = arith.constant dense<0xFF800000> : vector<256xf32>
    %256 = vector.multi_reduction <maximumf>, %255, %cst_66 [1] : vector<256x256xf32> to vector<256xf32>
    %257 = vector.shape_cast %256 : vector<256xf32> to vector<256x1xf32>
    %c1_67 = arith.constant 1 : index
    %c0_68 = arith.constant 0 : index
    %c0_69 = arith.constant 0 : index
    %258 = vector.load %arg2[%c1_67, %c0_68, %c0_69] : memref<2x1x3xf32, #tpu.memory_space<vmem>>, vector<1x1x3xf32>
    %259 = vector.shape_cast %258 : vector<1x1x3xf32> to vector<1x3xf32>
    %260 = vector.extract_strided_slice %259 {offsets = [0, 0], sizes = [1, 1], strides = [1, 1]} : vector<1x3xf32> to vector<1x1xf32>
    %261 = vector.extract_strided_slice %259 {offsets = [0, 1], sizes = [1, 1], strides = [1, 1]} : vector<1x3xf32> to vector<1x1xf32>
    %262 = vector.extract_strided_slice %259 {offsets = [0, 2], sizes = [1, 1], strides = [1, 1]} : vector<1x3xf32> to vector<1x1xf32>
    %263 = vector.extract_strided_slice %156 {offsets = [0, 1], sizes = [1, 1], strides = [1, 1]} : vector<1x2xf32> to vector<1x1xf32>
    %264 = vector.extract_strided_slice %159 {offsets = [0, 1], sizes = [1, 1], strides = [1, 1]} : vector<1x2xf32> to vector<1x1xf32>
    %265 = arith.mulf %260, %261 : vector<1x1xf32>
    %266 = arith.mulf %260, %262 : vector<1x1xf32>
    %267 = arith.mulf %261, %262 : vector<1x1xf32>
    %268 = arith.mulf %262, %262 : vector<1x1xf32>
    %269 = arith.mulf %261, %261 : vector<1x1xf32>
    %270 = arith.addf %268, %269 : vector<1x1xf32>
    %271 = arith.mulf %264, %270 : vector<1x1xf32>
    %cst_70 = arith.constant 1.000000e+00 : f32
    %272 = vector.broadcast %cst_70 : f32 to vector<1x1xf32>
    %273 = arith.subf %272, %271 : vector<1x1xf32>
    %cst_71 = arith.constant 0.000000e+00 : f32
    %274 = vector.broadcast %cst_71 : f32 to vector<1x1xf32>
    %275 = arith.subf %274, %263 : vector<1x1xf32>
    %276 = arith.mulf %275, %262 : vector<1x1xf32>
    %277 = arith.mulf %264, %265 : vector<1x1xf32>
    %278 = arith.addf %276, %277 : vector<1x1xf32>
    %279 = arith.mulf %263, %261 : vector<1x1xf32>
    %280 = arith.mulf %264, %266 : vector<1x1xf32>
    %281 = arith.addf %279, %280 : vector<1x1xf32>
    %282 = arith.mulf %263, %262 : vector<1x1xf32>
    %283 = arith.mulf %264, %265 : vector<1x1xf32>
    %284 = arith.addf %282, %283 : vector<1x1xf32>
    %285 = arith.mulf %262, %262 : vector<1x1xf32>
    %286 = arith.mulf %260, %260 : vector<1x1xf32>
    %287 = arith.addf %285, %286 : vector<1x1xf32>
    %288 = arith.mulf %264, %287 : vector<1x1xf32>
    %cst_72 = arith.constant 1.000000e+00 : f32
    %289 = vector.broadcast %cst_72 : f32 to vector<1x1xf32>
    %290 = arith.subf %289, %288 : vector<1x1xf32>
    %cst_73 = arith.constant 0.000000e+00 : f32
    %291 = vector.broadcast %cst_73 : f32 to vector<1x1xf32>
    %292 = arith.subf %291, %263 : vector<1x1xf32>
    %293 = arith.mulf %292, %260 : vector<1x1xf32>
    %294 = arith.mulf %264, %267 : vector<1x1xf32>
    %295 = arith.addf %293, %294 : vector<1x1xf32>
    %cst_74 = arith.constant 0.000000e+00 : f32
    %296 = vector.broadcast %cst_74 : f32 to vector<1x1xf32>
    %297 = arith.subf %296, %263 : vector<1x1xf32>
    %298 = arith.mulf %297, %261 : vector<1x1xf32>
    %299 = arith.mulf %264, %266 : vector<1x1xf32>
    %300 = arith.addf %298, %299 : vector<1x1xf32>
    %301 = arith.mulf %263, %260 : vector<1x1xf32>
    %302 = arith.mulf %264, %267 : vector<1x1xf32>
    %303 = arith.addf %301, %302 : vector<1x1xf32>
    %304 = arith.mulf %261, %261 : vector<1x1xf32>
    %305 = arith.mulf %260, %260 : vector<1x1xf32>
    %306 = arith.addf %304, %305 : vector<1x1xf32>
    %307 = arith.mulf %264, %306 : vector<1x1xf32>
    %cst_75 = arith.constant 1.000000e+00 : f32
    %308 = vector.broadcast %cst_75 : f32 to vector<1x1xf32>
    %309 = arith.subf %308, %307 : vector<1x1xf32>
    %310 = tpu.concatenate %273, %278, %281, %284, %290, %295, %300, %303, %309 in 1 : vector<1x1xf32>, vector<1x1xf32>, vector<1x1xf32>, vector<1x1xf32>, vector<1x1xf32>, vector<1x1xf32>, vector<1x1xf32>, vector<1x1xf32>, vector<1x1xf32> -> vector<1x9xf32>
    %c1_76 = arith.constant 1 : index
    %c0_77 = arith.constant 0 : index
    %c0_78 = arith.constant 0 : index
    %311 = vector.load %arg10[%c1_76, %c0_77, %c0_78] : memref<2x1x9xf32, #tpu.memory_space<vmem>>, vector<1x1x9xf32>
    %312 = vector.shape_cast %311 : vector<1x1x9xf32> to vector<1x9xf32>
    %313 = vector.shape_cast %310 : vector<1x9xf32> to vector<1x1x9xf32>
    tpu.vector_store %arg10[%c1_76, %c0_77, %c0_78], %313 {strides = array<i32>} : memref<2x1x9xf32, #tpu.memory_space<vmem>>, vector<1x1x9xf32>,
    %314 = vector.broadcast %273 : vector<1x1xf32> to vector<1x256xf32>
    %315 = arith.mulf %314, %54 : vector<1x256xf32>
    %316 = vector.broadcast %278 : vector<1x1xf32> to vector<1x256xf32>
    %317 = arith.mulf %316, %55 : vector<1x256xf32>
    %318 = arith.addf %315, %317 : vector<1x256xf32>
    %319 = vector.broadcast %281 : vector<1x1xf32> to vector<1x256xf32>
    %320 = arith.mulf %319, %56 : vector<1x256xf32>
    %321 = arith.addf %318, %320 : vector<1x256xf32>
    %322 = vector.broadcast %284 : vector<1x1xf32> to vector<1x256xf32>
    %323 = arith.mulf %322, %54 : vector<1x256xf32>
    %324 = vector.broadcast %290 : vector<1x1xf32> to vector<1x256xf32>
    %325 = arith.mulf %324, %55 : vector<1x256xf32>
    %326 = arith.addf %323, %325 : vector<1x256xf32>
    %327 = vector.broadcast %295 : vector<1x1xf32> to vector<1x256xf32>
    %328 = arith.mulf %327, %56 : vector<1x256xf32>
    %329 = arith.addf %326, %328 : vector<1x256xf32>
    %330 = vector.broadcast %300 : vector<1x1xf32> to vector<1x256xf32>
    %331 = arith.mulf %330, %54 : vector<1x256xf32>
    %332 = vector.broadcast %303 : vector<1x1xf32> to vector<1x256xf32>
    %333 = arith.mulf %332, %55 : vector<1x256xf32>
    %334 = arith.addf %331, %333 : vector<1x256xf32>
    %335 = vector.broadcast %309 : vector<1x1xf32> to vector<1x256xf32>
    %336 = arith.mulf %335, %56 : vector<1x256xf32>
    %337 = arith.addf %334, %336 : vector<1x256xf32>
    %338 = vector.broadcast %321 : vector<1x256xf32> to vector<64x256xf32>
    %339 = arith.mulf %3, %338 : vector<64x256xf32>
    %340 = vector.broadcast %329 : vector<1x256xf32> to vector<64x256xf32>
    %341 = arith.mulf %6, %340 : vector<64x256xf32>
    %342 = arith.addf %339, %341 : vector<64x256xf32>
    %343 = vector.broadcast %337 : vector<1x256xf32> to vector<64x256xf32>
    %344 = arith.mulf %9, %343 : vector<64x256xf32>
    %345 = arith.addf %342, %344 : vector<64x256xf32>
    %346 = arith.addf %345, %12 : vector<64x256xf32>
    %cst_79 = arith.constant 0.000000e+00 : f32
    %347 = vector.broadcast %cst_79 : f32 to vector<64x256xf32>
    %348 = arith.maximumf %346, %347 : vector<64x256xf32>
    %349 = arith.truncf %348 : vector<64x256xf32> to vector<64x256xbf16>
    %cst_80 = arith.constant dense<0.000000e+00> : vector<256x256xf32>
    %350 = tpu.matmul %24, %349, %cst_80 {dimension_numbers = #tpu.dot_dimension_numbers<[1], [0], [0], [1], [0, 0, 1, 1], [], []>} : vector<256x64xbf16>, vector<64x256xbf16>, vector<256x256xf32> -> vector<256x256xf32>
    %351 = arith.addf %350, %15 : vector<256x256xf32>
    %cst_81 = arith.constant 0.000000e+00 : f32
    %352 = vector.broadcast %cst_81 : f32 to vector<256x256xf32>
    %353 = arith.maximumf %351, %352 : vector<256x256xf32>
    %cst_82 = arith.constant dense<0xFF800000> : vector<256xf32>
    %354 = vector.multi_reduction <maximumf>, %353, %cst_82 [1] : vector<256x256xf32> to vector<256xf32>
    %355 = vector.shape_cast %354 : vector<256xf32> to vector<256x1xf32>
    %356 = tpu.concatenate %257, %355 in 1 : vector<256x1xf32>, vector<256x1xf32> -> vector<256x2xf32>
    %cst_83 = arith.constant dense<0.000000e+00> : vector<64x2xf32>
    %357 = tpu.matmul %27, %356, %cst_83 {dimension_numbers = #tpu.dot_dimension_numbers<[1], [0], [0], [1], [0, 0, 1, 1], [], []>} : vector<64x256xf32>, vector<256x2xf32>, vector<64x2xf32> -> vector<64x2xf32>
    %358 = vector.broadcast %19 : vector<64x1xf32> to vector<64x2xf32>
    %359 = arith.addf %357, %358 : vector<64x2xf32>
    %cst_84 = arith.constant 0.000000e+00 : f32
    %360 = vector.broadcast %cst_84 : f32 to vector<64x2xf32>
    %361 = arith.maximumf %359, %360 : vector<64x2xf32>
    %cst_85 = arith.constant dense<0.000000e+00> : vector<16x2xf32>
    %362 = tpu.matmul %28, %361, %cst_85 {dimension_numbers = #tpu.dot_dimension_numbers<[1], [0], [0], [1], [0, 0, 1, 1], [], []>} : vector<16x64xf32>, vector<64x2xf32>, vector<16x2xf32> -> vector<16x2xf32>
    %363 = vector.broadcast %20 : vector<16x1xf32> to vector<16x2xf32>
    %364 = arith.addf %362, %363 : vector<16x2xf32>
    %cst_86 = arith.constant 0.000000e+00 : f32
    %365 = vector.broadcast %cst_86 : f32 to vector<16x2xf32>
    %366 = arith.maximumf %364, %365 : vector<16x2xf32>
    %367 = vector.broadcast %23 : vector<16x1xf32> to vector<16x2xf32>
    %368 = arith.mulf %366, %367 : vector<16x2xf32>
    %cst_87 = arith.constant dense<0.000000e+00> : vector<2xf32>
    %369 = vector.multi_reduction <add>, %368, %cst_87 [0] : vector<16x2xf32> to vector<2xf32>
    %370 = vector.shape_cast %369 : vector<2xf32> to vector<1x2xf32>
    %371 = vector.broadcast %21 : vector<1x1xf32> to vector<1x2xf32>
    %372 = arith.addf %370, %371 : vector<1x2xf32>
    %cst_88 = arith.constant 0.318309873 : f32
    %373 = vector.broadcast %cst_88 : f32 to vector<1x2xf32>
    %374 = arith.mulf %372, %373 : vector<1x2xf32>
    %cst_89 = arith.constant 0.000000e+00 : f32
    %375 = vector.broadcast %cst_89 : f32 to vector<1x2xf32>
    %376 = arith.cmpf oge, %374, %375 : vector<1x2xf32>
    %cst_90 = arith.constant 5.000000e-01 : f32
    %377 = vector.broadcast %cst_90 : f32 to vector<1x2xf32>
    %378 = arith.addf %374, %377 : vector<1x2xf32>
    %cst_91 = arith.constant 5.000000e-01 : f32
    %379 = vector.broadcast %cst_91 : f32 to vector<1x2xf32>
    %380 = arith.subf %374, %379 : vector<1x2xf32>
    %381 = arith.select %376, %378, %380 : vector<1x2xi1>, vector<1x2xf32>
    %382 = arith.fptosi %381 : vector<1x2xf32> to vector<1x2xi32>
    %383 = arith.sitofp %382 : vector<1x2xi32> to vector<1x2xf32>
    %cst_92 = arith.constant 3.140625 : f32
    %384 = vector.broadcast %cst_92 : f32 to vector<1x2xf32>
    %385 = arith.mulf %383, %384 : vector<1x2xf32>
    %386 = arith.subf %372, %385 : vector<1x2xf32>
    %cst_93 = arith.constant 9.67653584E-4 : f32
    %387 = vector.broadcast %cst_93 : f32 to vector<1x2xf32>
    %388 = arith.mulf %383, %387 : vector<1x2xf32>
    %389 = arith.subf %386, %388 : vector<1x2xf32>
    %cst_94 = arith.constant 5.000000e-01 : f32
    %390 = vector.broadcast %cst_94 : f32 to vector<1x2xf32>
    %391 = arith.mulf %383, %390 : vector<1x2xf32>
    %392 = arith.fptosi %391 : vector<1x2xf32> to vector<1x2xi32>
    %393 = arith.sitofp %392 : vector<1x2xi32> to vector<1x2xf32>
    %394 = arith.subf %391, %393 : vector<1x2xf32>
    %395 = math.absf %394 : vector<1x2xf32>
    %cst_95 = arith.constant 4.000000e+00 : f32
    %396 = vector.broadcast %cst_95 : f32 to vector<1x2xf32>
    %397 = arith.mulf %396, %395 : vector<1x2xf32>
    %cst_96 = arith.constant 1.000000e+00 : f32
    %398 = vector.broadcast %cst_96 : f32 to vector<1x2xf32>
    %399 = arith.subf %398, %397 : vector<1x2xf32>
    %400 = arith.mulf %389, %389 : vector<1x2xf32>
    %cst_97 = arith.constant -2.50521079E-8 : f32
    %401 = vector.broadcast %cst_97 : f32 to vector<1x2xf32>
    %402 = arith.mulf %400, %401 : vector<1x2xf32>
    %cst_98 = arith.constant 2.75573188E-6 : f32
    %403 = vector.broadcast %cst_98 : f32 to vector<1x2xf32>
    %404 = arith.addf %403, %402 : vector<1x2xf32>
    %405 = arith.mulf %400, %404 : vector<1x2xf32>
    %cst_99 = arith.constant -1.98412701E-4 : f32
    %406 = vector.broadcast %cst_99 : f32 to vector<1x2xf32>
    %407 = arith.addf %406, %405 : vector<1x2xf32>
    %408 = arith.mulf %400, %407 : vector<1x2xf32>
    %cst_100 = arith.constant 0.00833333377 : f32
    %409 = vector.broadcast %cst_100 : f32 to vector<1x2xf32>
    %410 = arith.addf %409, %408 : vector<1x2xf32>
    %411 = arith.mulf %400, %410 : vector<1x2xf32>
    %cst_101 = arith.constant -0.166666672 : f32
    %412 = vector.broadcast %cst_101 : f32 to vector<1x2xf32>
    %413 = arith.addf %412, %411 : vector<1x2xf32>
    %414 = arith.mulf %400, %413 : vector<1x2xf32>
    %cst_102 = arith.constant 1.000000e+00 : f32
    %415 = vector.broadcast %cst_102 : f32 to vector<1x2xf32>
    %416 = arith.addf %415, %414 : vector<1x2xf32>
    %417 = arith.mulf %389, %416 : vector<1x2xf32>
    %cst_103 = arith.constant 2.08767559E-9 : f32
    %418 = vector.broadcast %cst_103 : f32 to vector<1x2xf32>
    %419 = arith.mulf %400, %418 : vector<1x2xf32>
    %cst_104 = arith.constant -2.755732E-7 : f32
    %420 = vector.broadcast %cst_104 : f32 to vector<1x2xf32>
    %421 = arith.addf %420, %419 : vector<1x2xf32>
    %422 = arith.mulf %400, %421 : vector<1x2xf32>
    %cst_105 = arith.constant 2.48015876E-5 : f32
    %423 = vector.broadcast %cst_105 : f32 to vector<1x2xf32>
    %424 = arith.addf %423, %422 : vector<1x2xf32>
    %425 = arith.mulf %400, %424 : vector<1x2xf32>
    %cst_106 = arith.constant -0.00138888892 : f32
    %426 = vector.broadcast %cst_106 : f32 to vector<1x2xf32>
    %427 = arith.addf %426, %425 : vector<1x2xf32>
    %428 = arith.mulf %400, %427 : vector<1x2xf32>
    %cst_107 = arith.constant 0.0416666679 : f32
    %429 = vector.broadcast %cst_107 : f32 to vector<1x2xf32>
    %430 = arith.addf %429, %428 : vector<1x2xf32>
    %431 = arith.mulf %400, %430 : vector<1x2xf32>
    %cst_108 = arith.constant -5.000000e-01 : f32
    %432 = vector.broadcast %cst_108 : f32 to vector<1x2xf32>
    %433 = arith.addf %432, %431 : vector<1x2xf32>
    %434 = arith.mulf %400, %433 : vector<1x2xf32>
    %cst_109 = arith.constant 1.000000e+00 : f32
    %435 = vector.broadcast %cst_109 : f32 to vector<1x2xf32>
    %436 = arith.addf %435, %434 : vector<1x2xf32>
    %437 = arith.mulf %399, %417 : vector<1x2xf32>
    %438 = arith.mulf %399, %436 : vector<1x2xf32>
    %439 = vector.extract_strided_slice %438 {offsets = [0, 0], sizes = [1, 1], strides = [1, 1]} : vector<1x2xf32> to vector<1x1xf32>
    %440 = vector.extract_strided_slice %437 {offsets = [0, 0], sizes = [1, 1], strides = [1, 1]} : vector<1x2xf32> to vector<1x1xf32>
    %441 = vector.broadcast %439 : vector<1x1xf32> to vector<1x256xf32>
    %442 = arith.mulf %441, %223 : vector<1x256xf32>
    %443 = vector.broadcast %440 : vector<1x1xf32> to vector<1x256xf32>
    %444 = arith.mulf %443, %231 : vector<1x256xf32>
    %445 = arith.addf %442, %444 : vector<1x256xf32>
    %cst_110 = arith.constant 2.000000e+00 : f32
    %446 = vector.broadcast %cst_110 : f32 to vector<1x256xf32>
    %447 = arith.mulf %446, %445 : vector<1x256xf32>
    %448 = vector.broadcast %439 : vector<1x1xf32> to vector<1x256xf32>
    %449 = arith.mulf %447, %448 : vector<1x256xf32>
    %450 = arith.subf %223, %449 : vector<1x256xf32>
    %cst_111 = arith.constant 2.000000e+00 : f32
    %451 = vector.broadcast %cst_111 : f32 to vector<1x256xf32>
    %452 = arith.mulf %451, %445 : vector<1x256xf32>
    %453 = vector.broadcast %440 : vector<1x1xf32> to vector<1x256xf32>
    %454 = arith.mulf %452, %453 : vector<1x256xf32>
    %455 = arith.subf %231, %454 : vector<1x256xf32>
    %456 = tpu.concatenate %450, %455, %239, %223, %231, %239 in 0 : vector<1x256xf32>, vector<1x256xf32>, vector<1x256xf32>, vector<1x256xf32>, vector<1x256xf32>, vector<1x256xf32> -> vector<6x256xf32>
    %c0_112 = arith.constant 0 : index
    %c0_113 = arith.constant 0 : index
    %c0_114 = arith.constant 0 : index
    %457 = vector.load %arg9[%c0_112, %c0_113, %c0_114] : memref<2x6x256xf32, #tpu.memory_space<vmem>>, vector<1x6x256xf32>
    %458 = vector.shape_cast %457 : vector<1x6x256xf32> to vector<6x256xf32>
    %459 = vector.shape_cast %456 : vector<6x256xf32> to vector<1x6x256xf32>
    tpu.vector_store %arg9[%c0_112, %c0_113, %c0_114], %459 {strides = array<i32>} : memref<2x6x256xf32, #tpu.memory_space<vmem>>, vector<1x6x256xf32>,
    %460 = vector.extract_strided_slice %438 {offsets = [0, 1], sizes = [1, 1], strides = [1, 1]} : vector<1x2xf32> to vector<1x1xf32>
    %461 = vector.extract_strided_slice %437 {offsets = [0, 1], sizes = [1, 1], strides = [1, 1]} : vector<1x2xf32> to vector<1x1xf32>
    %462 = vector.broadcast %460 : vector<1x1xf32> to vector<1x256xf32>
    %463 = arith.mulf %462, %321 : vector<1x256xf32>
    %464 = vector.broadcast %461 : vector<1x1xf32> to vector<1x256xf32>
    %465 = arith.mulf %464, %329 : vector<1x256xf32>
    %466 = arith.addf %463, %465 : vector<1x256xf32>
    %cst_115 = arith.constant 2.000000e+00 : f32
    %467 = vector.broadcast %cst_115 : f32 to vector<1x256xf32>
    %468 = arith.mulf %467, %466 : vector<1x256xf32>
    %469 = vector.broadcast %460 : vector<1x1xf32> to vector<1x256xf32>
    %470 = arith.mulf %468, %469 : vector<1x256xf32>
    %471 = arith.subf %321, %470 : vector<1x256xf32>
    %cst_116 = arith.constant 2.000000e+00 : f32
    %472 = vector.broadcast %cst_116 : f32 to vector<1x256xf32>
    %473 = arith.mulf %472, %466 : vector<1x256xf32>
    %474 = vector.broadcast %461 : vector<1x1xf32> to vector<1x256xf32>
    %475 = arith.mulf %473, %474 : vector<1x256xf32>
    %476 = arith.subf %329, %475 : vector<1x256xf32>
    %477 = tpu.concatenate %471, %476, %337, %321, %329, %337 in 0 : vector<1x256xf32>, vector<1x256xf32>, vector<1x256xf32>, vector<1x256xf32>, vector<1x256xf32>, vector<1x256xf32> -> vector<6x256xf32>
    %c1_117 = arith.constant 1 : index
    %c0_118 = arith.constant 0 : index
    %c0_119 = arith.constant 0 : index
    %478 = vector.load %arg9[%c1_117, %c0_118, %c0_119] : memref<2x6x256xf32, #tpu.memory_space<vmem>>, vector<1x6x256xf32>
    %479 = vector.shape_cast %478 : vector<1x6x256xf32> to vector<6x256xf32>
    %480 = vector.shape_cast %477 : vector<6x256xf32> to vector<1x6x256xf32>
    tpu.vector_store %arg9[%c1_117, %c0_118, %c0_119], %480 {strides = array<i32>} : memref<2x6x256xf32, #tpu.memory_space<vmem>>, vector<1x6x256xf32>,
    return
  }
  func.func @transform_0(%arg0: i32) -> (i32, i32, i32) {
    %c0_i32 = arith.constant 0 : i32
    %c0_i32_0 = arith.constant 0 : i32
    %c0_i32_1 = arith.constant 0 : i32
    return %arg0, %c0_i32, %c0_i32_0 : i32, i32, i32
  }
  func.func @transform_1(%arg0: i32) -> (i32, i32, i32) {
    %c0_i32 = arith.constant 0 : i32
    %c0_i32_0 = arith.constant 0 : i32
    %c0_i32_1 = arith.constant 0 : i32
    return %arg0, %c0_i32, %c0_i32_0 : i32, i32, i32
  }
  func.func @transform_2(%arg0: i32) -> (i32, i32) {
    %c0_i32 = arith.constant 0 : i32
    %c0_i32_0 = arith.constant 0 : i32
    %c0_i32_1 = arith.constant 0 : i32
    return %c0_i32, %c0_i32_0 : i32, i32
  }
  func.func @transform_3(%arg0: i32) -> (i32, i32) {
    %c0_i32 = arith.constant 0 : i32
    %c0_i32_0 = arith.constant 0 : i32
    %c0_i32_1 = arith.constant 0 : i32
    return %c0_i32, %c0_i32_0 : i32, i32
  }
  func.func @transform_4(%arg0: i32) -> (i32, i32) {
    %c0_i32 = arith.constant 0 : i32
    %c0_i32_0 = arith.constant 0 : i32
    %c0_i32_1 = arith.constant 0 : i32
    return %c0_i32, %c0_i32_0 : i32, i32
  }
  func.func @transform_5(%arg0: i32) -> (i32, i32) {
    %c0_i32 = arith.constant 0 : i32
    %c0_i32_0 = arith.constant 0 : i32
    %c0_i32_1 = arith.constant 0 : i32
    return %c0_i32, %c0_i32_0 : i32, i32
  }
  func.func @transform_6(%arg0: i32) -> (i32, i32) {
    %c0_i32 = arith.constant 0 : i32
    %c0_i32_0 = arith.constant 0 : i32
    %c0_i32_1 = arith.constant 0 : i32
    return %c0_i32, %c0_i32_0 : i32, i32
  }
  func.func @transform_7(%arg0: i32) -> (i32, i32) {
    %c0_i32 = arith.constant 0 : i32
    %c0_i32_0 = arith.constant 0 : i32
    %c0_i32_1 = arith.constant 0 : i32
    return %c0_i32, %c0_i32_0 : i32, i32
  }
  func.func @transform_8(%arg0: i32) -> (i32, i32, i32) {
    %c0_i32 = arith.constant 0 : i32
    %c0_i32_0 = arith.constant 0 : i32
    %c0_i32_1 = arith.constant 0 : i32
    return %arg0, %c0_i32, %c0_i32_0 : i32, i32, i32
  }
  func.func @transform_9(%arg0: i32) -> (i32, i32, i32) {
    %c0_i32 = arith.constant 0 : i32
    %c0_i32_0 = arith.constant 0 : i32
    %c0_i32_1 = arith.constant 0 : i32
    return %arg0, %c0_i32, %c0_i32_0 : i32, i32, i32
  }
}

</mosaic_0001>

<bundles_post_ra>
// kernel: forward.1
= control target key start
LH: loop header
LB: loop body
LE: loop exit
PB: predicated region body
PF: predicated region fallthrough
CT: control target
= control target key end

     0   :  { %15 = vsyncpa [#allocation3], 0  ;;  %s7077_s0 = inlined_call_operand.vmem [shape: f32[4,3,256], index: 0, kind: input, shape index: {}]   ;;  %s7078_s1 = inlined_call_operand.vmem [shape: f32[4,1,3], index: 1, kind: input, shape index: {}]   ;;  %s7079_s2 = inlined_call_operand.hbm [shape: f32[256,13], index: 2, kind: input, shape index: {}]   ;;  %s7080_s3 = inlined_call_operand.vmem [shape: bf16[256,64], index: 3, kind: input, shape index: {}]   ;;  %s7081_s4 = inlined_call_operand.hbm [shape: f32[64,256], index: 4, kind: input, shape index: {}]   ;;  %s7082_s5 = inlined_call_operand.vmem [shape: f32[16,64], index: 5, kind: input, shape index: {}]   ;;  %s7083_s6 = inlined_call_operand.hbm [shape: f32[64,256], index: 6, kind: input, shape index: {}]   ;;  %s7084_s7 = inlined_call_operand.vmem [shape: f32[16,64], index: 7, kind: input, shape index: {}]   ;;  %s7085_s8 = inlined_call_operand.vmem [shape: f32[4,6,256], index: 8, kind: output, shape index: {0}]   ;;  %s7086_s9 = inlined_call_operand.vmem [shape: f32[4,1,9], index: 9, kind: output, shape index: {1}]  }
   0x1   :  { %16 = vsyncpa [#allocation5], 0  ;;  %s4939_s30 = smov 0  }
   0x2 LB: > { %s4859_s10 = smov [#allocation4]   ;;  %s4311_s12 = sadd.s32 4294967295, %s4857_s30   ;;  %s4857_s30 = sphi %s4939_s30, %s22_s30  }
   0x3   : > { %s285_s11 = sshll.u32 %s4859_s10, 4  ;;  %p4313_p0 = scmp.ge.s32.totalorder %s4857_s30, 1  ;;  %s286_s11 = int_to_ptr.vmem [resolvable:$true] %s285_s11 }
   0x4   : > { %p257_p1 = scmp.lt.s32.totalorder %s4857_s30, 3  ;;  %p4949_p2 = scmp.eq.s32.totalorder %s4311_s12, 0 }
   0x5   : > { %s4860_s15 = smov [#allocation2]   ;;  %s4861_s18 = smov [#allocation6]  }
   0x6   : > { %p4953_p3 = pnand %p4313_p0, %p257_p1  ;;  %s269_s16 = sshll.u32 %s4860_s15, 4  ;;  %s4959_s16 = int_to_ptr.vmem [resolvable:$true] %s269_s16 }
   0x7   : > { %s4967_s19 = sshll.u32 %s4861_s18, 4  ;;  %s4776_s20 = scalar_lea.vmem %s286_s11, 2048  ;;  %s302_s19 = int_to_ptr.vmem [resolvable:$true] %s4967_s19 }
   0x8   : > { %p4615_p4 = pneg %p4953_p3  ;;  %p4777_p7 = scmp.ne.s32.totalorder %s286_s11, %s4776_s20 }
   0x9   : > { %p4784_p10 = scmp.lt.s32.totalorder %s286_s11, %s286_s11  ;;  %p4785_p11 = scmp.lt.s32.totalorder %s4776_s20, %s4776_s20 }
   0xa   : > { %p4963_p5 = pnand %p4949_p2, %p4615_p4 }
   0xb   : > { %p4786_p12 = por %p4785_p11, %p4784_p10 }
   0xc   : > { %p4767_p6 = pneg %p4963_p5 }
   0xe   : > { %p4779_p8 = pnand %p4777_p7, %p4767_p6 }
  0x10   : > { %p4780_p9 = pneg %p4779_p8 }
  0x12   : > { %p4787_p13 = pnand %p4786_p12, %p4780_p9 }
  0x14   : > { %4790 = shalt.err (!%p4787_p13)
}
  0x15   : > { %s4862_s21 = smov 256   ;;  %s4863_s22 = smov 16  }
  0x16   : > { %4621 = dma.hbm_to_vmem [thread:$0]  (!%p4963_p5), %s7081_s4, 2048, %s286_s11, [#allocation5], %s4862_s21, %s4862_s21, %s4863_s22  }
  0x17   : > { %s4802_s25 = scalar_lea.vmem %s4959_s16, 4096  ;;  %p4810_p7 = scmp.lt.s32.totalorder %s4959_s16, %s4959_s16 }
  0x18   : > { %p4803_p0 = scmp.ne.s32.totalorder %s4959_s16, %s4802_s25  ;;  %p4811_p8 = scmp.lt.s32.totalorder %s4802_s25, %s4802_s25 }
  0x1a   : > { %p4805_p1 = pnand %p4803_p0, %p4767_p6  ;;  %p4812_p9 = por %p4811_p8, %p4810_p7 }
  0x1c   : > { %p4806_p4 = pneg %p4805_p1 }
  0x1e   : > { %p4813_p10 = pnand %p4812_p9, %p4806_p4 }
  0x20   : > { %4816 = shalt.err (!%p4813_p10)
}
  0x21   : > { %s4864_s26 = smov 128   ;;  %s4865_s27 = smov 8  }
  0x22   : > { %4618 = dma.hbm_to_vmem [thread:$0]  (!%p4963_p5), %s7079_s2, 4096, %s4959_s16, [#allocation3], %s4864_s26, %s4864_s26, %s4865_s27  }
  0x23   : > { %s4828_s10 = scalar_lea.vmem %s302_s19, 2048  ;;  %p4836_p0 = scmp.lt.s32.totalorder %s302_s19, %s302_s19 }
  0x24   : > { %p4829_p11 = scmp.ne.s32.totalorder %s302_s19, %s4828_s10  ;;  %p4837_p1 = scmp.lt.s32.totalorder %s4828_s10, %s4828_s10 }
  0x26   : > { %p4831_p12 = pnand %p4829_p11, %p4767_p6  ;;  %p4838_p4 = por %p4837_p1, %p4836_p0 }
  0x28   : > { %p4832_p13 = pneg %p4831_p12 }
  0x2a   : > { %p4839_p7 = pnand %p4838_p4, %p4832_p13 }
  0x2c   : > { %4842 = shalt.err (!%p4839_p7)
}
  0x2d   : > { %4624 = dma.hbm_to_vmem [thread:$0]  (!%p4963_p5), %s7083_s6, 2048, %s302_s19, [#allocation5], %s4862_s21, %s4862_s21, %s4863_s22  }
  0x2e   : > { %338 = sbr.rel (%p4953_p3) target bundleno = 2682 (0xa7a), region = 52 }
  0x33   : > { %4848 = dma.done.wait (%p4949_p2), [#allocation3], 4096  }
  0x34   : > { %4850 = vsyncadd (%p4949_p2), [#allocation3], 4294963200 }
  0x35   : > { %4852 = dma.done.wait (%p4949_p2), [#allocation5], 4096  }
  0x36   : > { %4854 = vsyncadd (%p4949_p2), [#allocation5], 4294963200  ;;  %v4866_v0 = vmov 3   ;;  %v7087_v1 = vmov 1   ;;  %v7089_v2 = vmov 0   ;;  %v5015_v3 = vld [vmem:[#allocation2 + $0x38] sm:$0xff]  ;;  %v807_v23 = vlaneseq }
  0x37   : > { %4675 = vset.pattern.permute.xlu0 %v4866_v0  ;;  %4669 = vset.pattern.permute.xlu1 %v7087_v1  ;;  %v5017_v4 = vld [vmem:[#allocation2 + $0x30] sm:$0xff]  ;;  %v4869_v5 = vmov 2   ;;  %v5022_v6 = vld [vmem:[#allocation2 + $0x20] sm:$0xff]  ;;  %v5025_v7 = vld [vmem:[#allocation2 + $0x18] sm:$0xff]  ;;  %v4870_v12 = vmov 4   ;;  %s4322_s13 = sshll.u32 %s4311_s12, 1 }
  0x38   : > { %1142 = vmatprep.mubr.bf16.mxu0 %v7089_v2  ;;  %1672 = vmatprep.mubr.bf16.mxu1 %v7089_v2  ;;  %v5036_v8 = vld [vmem:[#allocation2 + $0x28] sm:$0xff]  ;;  %v5041_v9 = vld [vmem:[#allocation2] sm:$0xff]  ;;  %v5046_v10 = vld [vmem:[#allocation2 + $0x10] sm:$0xff]  ;;  %p393_p2 = scmp.lt.s32.totalorder %s4322_s13, 3  ;;  %v808_v26 = vshrl.u32 %v807_v23, 7  ;;  %vm1061_vm0 = vcmask 523264  }
  0x39   : > { %582 = vperm.xlu0 %4675, %v5015_v3   ;;  %514 = vperm.xlu1 %4669, %v5017_v4   ;;  %v5051_v11 = vld [vmem:[#allocation2 + $0x8] sm:$0xff]  ;;  %v448_v13 = vld [vmem:[#allocation2 + $0xf8] sm:$0xff]  ;;  %v447_v14 = vld [vmem:[#allocation2 + $0xf0] sm:$0xff]  ;;  %vm1993_vm1 = vcmask 7168   ;;  %s4876_s18 = smov 2   ;;  %s4877_s19 = smov 127  }
  0x3a   : > { %v431_v15 = vld [vmem:[#allocation2 + $0x70] sm:$0xff]  ;;  %v430_v16 = vld [vmem:[#allocation2 + $0x68] sm:$0xff]  ;;  %v429_v17 = vld [vmem:[#allocation2 + $0x60] sm:$0xff]  ;;  %s7540_s13 = smov (!%p393_p2, %s4322_s13), 3  ;;  %v843_v28 = vsub.s32 1, %v808_v26  ;;  %v847_v29 = vsub.s32 5, %v808_v26 }
  0x3b   : > { %v428_v18 = vld [vmem:[#allocation2 + $0x58] sm:$0xff]  ;;  %v427_v19 = vld [vmem:[#allocation2 + $0x50] sm:$0xff]  ;;  %v426_v20 = vld [vmem:[#allocation2 + $0x48] sm:$0xff]  ;;  %s4423_s14 = sshll.u32 %s7540_s13, 3  ;;  %v893_v34 = vsub.s32 2, %v808_v26  ;;  %v897_v35 = vsub.s32 6, %v808_v26  ;;  %s402_s16 = scalar_lea.vmem %s7078_s1, %s7540_s13 }
  0x3c   : > { %v425_v24 = vld [vmem:[#allocation2 + $0x40] sm:$0xff]  ;;  %s397_s17 = scalar_lea.vmem %s7077_s0, %s4423_s14  ;;  %v5096_v36 = vsub.s32 0, %v808_v26  ;;  %v813_v37 = vsub.s32 4, %v808_v26  ;;  %s4878_s20 = smov 126   ;;  %vm2272_vm2 = vcmask 15360   ;;  %vm4103_vm5 = vcmask 1040384  }
  0x3d   : > { %4676 = vset.pattern.permute.xlu0 %v4869_v5  ;;  %518 = vperm.xlu1 %4669, %v5015_v3   ;;  %v805_v32 = vld [vmem:[%s397_s17] sm:$0x77]  ;;  %v4362_v33 = vld [vmem:[%s397_s17 + $0x8] sm:$0x77]  ;;  %s4875_s17 = smov 1   ;;  %s4884_s26 = smov 4  }
  0x3e   : > { %546 = vperm.xlu0 %4676, %v5017_v4   ;;  %7312 = vst [vmem:[#allocation15_spill] sm:$0xff] %v5096_v36  ;;  %v5099_v38 = vrot.slane %v805_v32, %v847_v29  ;;  %v5101_v39 = vrot.slane %v4362_v33, %v847_v29  ;;  %v5103_v40 = vrot.slane %v805_v32, %v843_v28  ;;  %s4885_s27 = smov 5   ;;  %s4887_s28 = smov 7   ;;  %vm4106_vm6 = vcmask 1041408  }
  0x3f   : > { %v5105_v41 = vrot.slane %v4362_v33, %v843_v28  ;;  %v5111_v44 = vrot.slane %v805_v32, %v897_v35  ;;  %v5113_v45 = vrot.slane %v4362_v33, %v897_v35  ;;  %v5115_v46 = vrot.slane %v805_v32, %v893_v34  ;;  %s4888_s29 = smov 8   ;;  %s4424_s10 = sshll.u32 %s7540_s13, 4 }
  0x40   : > { %7313 = vst [vmem:[#allocation16_spill] sm:$0xff] %v5099_v38  ;;  %7314 = vst [vmem:[#allocation17_spill] sm:$0xff] %v5101_v39  ;;  %v5117_v47 = vrot.slane %v4362_v33, %v893_v34  ;;  %v5119_v48 = vrot.slane %v805_v32, %v813_v37  ;;  %v5121_v49 = vrot.slane %v4362_v33, %v813_v37  ;;  %vm4109_vm7 = vcmask 1042432   ;;  %s7008_s14 = scalar_lea.vmem %s7085_s8, %s4424_s10 }
  0x41   : > { %4670 = vset.pattern.permute.xlu1 %v4869_v5  ;;  %7315 = vst [vmem:[#allocation18_spill] sm:$0xff] %v5103_v40  ;;  %7316 = vst [vmem:[#allocation19_spill] sm:$0xff] %v5105_v41  ;;  %v5124_v50 = vrot.slane %v805_v32, %v5096_v36  ;;  %v5127_v51 = vrot.slane %v4362_v33, %v5096_v36  ;;  %v5131_v52 = vrot.slane %v5099_v38, %v843_v28  ;;  %vm4112_vm8 = vcmask 1043456  }
  0x42   : > { %550 = vperm.xlu1 %4670, %v5015_v3   ;;  %538 = vperm.xlu0 %4676, %v5022_v6   ;;  %7319 = vst [vmem:[#allocation22_spill] sm:$0xff] %v5111_v44  ;;  %7320 = vst [vmem:[#allocation23_spill] sm:$0xff] %v5113_v45  ;;  %v5134_v53 = vrot.slane %v5101_v39, %v843_v28  ;;  %v5137_v54 = vrot.slane %v5103_v40, %v843_v28  ;;  %vm2445_vm9 = vcmask 23552   ;;  %vm4115_vm10 = vcmask 1044480  }
  0x43   : > { %7321 = vst [vmem:[#allocation24_spill] sm:$0xff] %v5115_v46  ;;  %7322 = vst [vmem:[#allocation25_spill] sm:$0xff] %v5117_v47  ;;  %v5140_v55 = vrot.slane %v5105_v41, %v843_v28  ;;  %v5145_v57 = vrot.slane %v5111_v44, %v893_v34  ;;  %v5148_v58 = vrot.slane %v5113_v45, %v893_v34  ;;  %vm2447_vm11 = vcmask 31744  }
  0x44   : > { %7323 = vst [vmem:[#allocation26_spill] sm:$0xff] %v5119_v48  ;;  %7324 = vst [vmem:[#allocation27_spill] sm:$0xff] %v5121_v49  ;;  %v5151_v59 = vrot.slane %v5115_v46, %v893_v34  ;;  %v5154_v60 = vrot.slane %v5117_v47, %v893_v34  ;;  %v5160_v62 = vrot.slane %v5119_v48, %v5096_v36  ;;  %vm2449_vm12 = vcmask 39936  }
  0x45   : > { %7325 = vst [vmem:[#allocation28_spill] sm:$0xff] %v5124_v50  ;;  %7326 = vst [vmem:[#allocation29_spill] sm:$0xff] %v5127_v51  ;;  %v5164_v63 = vrot.slane %v5121_v49, %v5096_v36  ;;  %vm2451_vm13 = vcmask 48128   ;;  %vm2455_vm14 = vcmask 64512   ;;  %vm2453_vm15 = vcmask 56320  }
  0x46   : > { %4671 = vset.pattern.permute.xlu1 %v7089_v2  ;;  %534 = vperm.xlu0 %4676, %v5025_v7  }
  0x47   : > { %471 = vperm.xlu1 %4671, %v5022_v6  }
  0x4a   : > { %4680 = vset.pattern.permute.xlu0 %v7089_v2 }
  0x4b   : > { %4672 = vset.pattern.permute.xlu1 %v7087_v1  ;;  %481 = vperm.xlu0 %4680, %v5017_v4  }
  0x4c   : > { %506 = vperm.xlu1 %4672, %v5022_v6  }
  0x4f   : > { %486 = vperm.xlu0 %4680, %v5015_v3  }
  0x50   : > { %510 = vperm.xlu1 %4672, %v5036_v8  }
  0x53   : > { %476 = vperm.xlu0 %4680, %v5036_v8  }
  0x54   : > { %4673 = vset.pattern.permute.xlu1 %v4869_v5 }
  0x55   : > { %542 = vperm.xlu1 %4673, %v5036_v8  }
  0x57   : > { %451 = vperm.xlu0 %4680, %v5041_v9  }
  0x59   : > { %4674 = vset.pattern.permute.xlu1 %v4866_v0 }
  0x5a   : > { %578 = vperm.xlu1 %4674, %v5017_v4  }
  0x5b   : > { %4682 = vset.pattern.permute.xlu0 %v7087_v1 }
  0x5c   : > { %498 = vperm.xlu0 %4682, %v5046_v10  }
  0x5e   : > { %4677 = vset.pattern.permute.xlu1 %v7089_v2 }
  0x5f   : > { %461 = vperm.xlu1 %4677, %v5046_v10  }
  0x60   : > { %494 = vperm.xlu0 %4682, %v5051_v11  }
  0x63   : > { %466 = vperm.xlu1 %4677, %v5025_v7  }
  0x64   : > { %4686 = vset.pattern.permute.xlu0 %v4866_v0 }
  0x65   : > { %562 = vperm.xlu0 %4686, %v5046_v10  }
  0x67   : > { %4678 = vset.pattern.permute.xlu1 %v7087_v1 }
  0x68   : > { %502 = vperm.xlu1 %4678, %v5025_v7  }
  0x69   : > { %558 = vperm.xlu0 %4686, %v5051_v11  }
  0x6c   : > { %4679 = vset.pattern.permute.xlu1 %v4869_v5 }
  0x6d   : > { %530 = vperm.xlu1 %4679, %v5046_v10   ;;  %4689 = vset.pattern.permute.xlu0 %v4870_v12 }
  0x71   : > { %4681 = vset.pattern.permute.xlu1 %v4866_v0 }
  0x72   : > { %570 = vperm.xlu1 %4681, %v5022_v6  }
  0x76   : > { %574 = vperm.xlu1 %4681, %v5036_v8  }
  0x7a   : > { %4683 = vset.pattern.permute.xlu1 %v7089_v2 }
  0x7b   : > { %456 = vperm.xlu1 %4683, %v5051_v11  }
  0x7f   : > { %4684 = vset.pattern.permute.xlu1 %v7087_v1 }
  0x80   : > { %490 = vperm.xlu1 %4684, %v5041_v9  }
  0x84   : > { %4685 = vset.pattern.permute.xlu1 %v4869_v5 }
  0x85   : > { %522 = vperm.xlu1 %4685, %v5041_v9  }
  0x89   : > { %526 = vperm.xlu1 %4685, %v5051_v11  }
  0x8d   : > { %4687 = vset.pattern.permute.xlu1 %v4866_v0  ;;  %v5168_v0 = vrot.slane %v5124_v50, %v5096_v36 }
  0x8e   : > { %566 = vperm.xlu1 %4687, %v5025_v7  }
  0x92   : > { %554 = vperm.xlu1 %4687, %v5041_v9  }
  0x96   : > { %4688 = vset.pattern.permute.xlu1 %v4870_v12 }
  0x97   : > { %734 = vperm.xlu1 %4688, %v448_v13  }
  0x9b   : > { %729 = vperm.xlu1 %4688, %v447_v14  }
  0x9f   : > { %649 = vperm.xlu1 %4688, %v431_v15  }
  0xa3   : > { %644 = vperm.xlu1 %4688, %v430_v16   ;;  %v432_v16 = vld [vmem:[#allocation2 + $0x78] sm:$0xff] }
  0xa4   : > { %654 = vperm.xlu0 %4689, %v432_v16  }
  0xa7   : > { %639 = vperm.xlu1 %4688, %v429_v17  }
  0xab   : > { %634 = vperm.xlu1 %4688, %v428_v18  }
  0xaf   : > { %629 = vperm.xlu1 %4688, %v427_v19  }
  0xb3   : > { %624 = vperm.xlu1 %4688, %v426_v20  }
  0xb4   : > { %v5079_v21 = vpop.permute.xlu1 %514  ;;  %v5081_v22 = vpop.permute.xlu0 %582 }
  0xb5   : > { %7306 = vst [vmem:[#allocation9_spill] sm:$0xff] %v5079_v21  ;;  %7307 = vst [vmem:[#allocation10_spill] sm:$0xff] %v5081_v22  ;;  %v1531_v5 = vmul.f32 %v5134_v53, %v5079_v21  ;;  %v1530_v12 = vmul.f32 %v5140_v55, %v5079_v21 }
  0xb7   : > { %619 = vperm.xlu1 %4688, %v425_v24  }
  0xb8   : > { %v5084_v25 = vpop.permute.xlu1 %518 }
  0xb9   : > { %7308 = vst [vmem:[#allocation11_spill] sm:$0xff] %v5084_v25  ;;  %v5086_v27 = vpop.permute.xlu0 %546  ;;  %v874_v13 = vmul.f32 %v5131_v52, %v5084_v25  ;;  %v1533_v14 = vmul.f32 %v5134_v53, %v5084_v25  ;;  %v1532_v15 = vmul.f32 %v5140_v55, %v5084_v25 }
  0xba   : > { %7309 = vst [vmem:[#allocation12_spill] sm:$0xff] %v5086_v27  ;;  %v922_v18 = vmul.f32 %v5145_v57, %v5086_v27  ;;  %v1581_v19 = vmul.f32 %v5148_v58, %v5086_v27  ;;  %v921_v20 = vmul.f32 %v5151_v59, %v5086_v27  ;;  %v1580_v23 = vmul.f32 %v5154_v60, %v5086_v27 }
  0xbb   : > { %614 = vperm.xlu1 %4688, %v5015_v3   ;;  %v5172_v3 = vrot.slane %v5127_v51, %v5096_v36 }
  0xbd   : > { %v5092_v30 = vpop.permute.xlu1 %550  ;;  %v5094_v31 = vpop.permute.xlu0 %538 }
  0xbe   : > { %7310 = vst [vmem:[#allocation13_spill] sm:$0xff] %v5092_v30  ;;  %7311 = vst [vmem:[#allocation14_spill] sm:$0xff] %v5094_v31  ;;  %v924_v1 = vmul.f32 %v5145_v57, %v5092_v30  ;;  %v1582_v45 = vmul.f32 %v5154_v60, %v5092_v30 }
  0xbf   : > { %610 = vperm.xlu1 %4688, %v5017_v4   ;;  %v872_v4 = vmul.f32 %v5131_v52, %v5079_v21 }
  0xc1   : > { %v5107_v42 = vpop.permute.xlu0 %534 }
  0xc2   : > { %7317 = vst [vmem:[#allocation20_spill] sm:$0xff] %v5107_v42  ;;  %v5109_v43 = vpop.permute.xlu1 %471 }
  0xc3   : > { %7318 = vst [vmem:[#allocation21_spill] sm:$0xff] %v5109_v43  ;;  %606 = vperm.xlu1 %4688, %v5036_v8   ;;  %v871_v8 = vmul.f32 %v5137_v54, %v5079_v21 }
  0xc6   : > { %v5142_v56 = vpop.permute.xlu0 %481 }
  0xc7   : > { %7327 = vst [vmem:[#allocation30_spill] sm:$0xff] %v5142_v56  ;;  %v5156_v61 = vpop.permute.xlu1 %506  ;;  %602 = vperm.xlu1 %4688, %v5022_v6   ;;  %v873_v6 = vmul.f32 %v5137_v54, %v5084_v25  ;;  %v838_v26 = vmul.f32 %v5160_v62, %v5142_v56  ;;  %v1497_v29 = vmul.f32 %v5164_v63, %v5142_v56 }
  0xc8   : > { %7328 = vst [vmem:[#allocation31_spill] sm:$0xff] %v5156_v61  ;;  %v837_v33 = vmul.f32 %v5168_v0, %v5142_v56  ;;  %v1496_v35 = vmul.f32 %v5172_v3, %v5142_v56  ;;  %v923_v25 = vmul.f32 %v5151_v59, %v5092_v30 }
  0xc9   : > { %v888_v56 = vadd.f32 %v872_v4, %v838_v26  ;;  %v1547_v49 = vadd.f32 %v1531_v5, %v1497_v29 }
  0xca   : > { %v5191_v17 = vpop.permute.xlu0 %486 }
  0xcb   : > { %7329 = vst [vmem:[#allocation32_spill] sm:$0xff] %v5191_v17  ;;  %v5201_v24 = vpop.permute.xlu1 %510  ;;  %v840_v28 = vmul.f32 %v5160_v62, %v5191_v17  ;;  %v1499_v32 = vmul.f32 %v5164_v63, %v5191_v17  ;;  %598 = vperm.xlu1 %4688, %v5025_v7   ;;  %v839_v34 = vmul.f32 %v5168_v0, %v5191_v17 }
  0xcc   : > { %7330 = vst [vmem:[#allocation33_spill] sm:$0xff] %v5201_v24  ;;  %v1498_v37 = vmul.f32 %v5172_v3, %v5191_v17  ;;  %v1583_v7 = vmul.f32 %v5148_v58, %v5092_v30  ;;  %v1597_v4 = vadd.f32 %v1581_v19, %v1547_v49 }
  0xcd   : > { %v890_v16 = vadd.f32 %v874_v13, %v840_v28  ;;  %v1549_v2 = vadd.f32 %v1533_v14, %v1499_v32  ;;  %v889_v27 = vadd.f32 %v873_v6, %v839_v34  ;;  %v887_v14 = vadd.f32 %v871_v8, %v837_v33  ;;  %v446_v6 = vld [vmem:[#allocation2 + $0xe8] sm:$0xff] }
  0xce   : > { %v1548_v21 = vadd.f32 %v1532_v15, %v1498_v37  ;;  %v1546_v32 = vadd.f32 %v1530_v12, %v1496_v35  ;;  %724 = vperm.xlu0 %4689, %v446_v6   ;;  %v441_v6 = vld [vmem:[#allocation2 + $0xc0] sm:$0xff] }
  0xcf   : > { %v940_v47 = vadd.f32 %v924_v1, %v890_v16  ;;  %v1599_v17 = vadd.f32 %v1583_v7, %v1549_v2  ;;  %594 = vperm.xlu1 %4688, %v5046_v10   ;;  %v939_v28 = vadd.f32 %v923_v25, %v889_v27  ;;  %v445_v2 = vld [vmem:[#allocation2 + $0xe0] sm:$0xff]  ;;  %v938_v10 = vadd.f32 %v922_v18, %v888_v56  ;;  %v443_v16 = vld [vmem:[#allocation2 + $0xd0] sm:$0xff] }
  0xd0   : > { %v5229_v13 = vpop.permute.xlu1 %542  ;;  %v1598_v51 = vadd.f32 %v1582_v45, %v1548_v21  ;;  %v937_v5 = vadd.f32 %v921_v20, %v887_v14  ;;  %v1596_v8 = vadd.f32 %v1580_v23, %v1546_v32  ;;  %v444_v20 = vld [vmem:[#allocation2 + $0xd8] sm:$0xff]  ;;  %v5247_v14 = vpop.permute.xlu0 %476  ;;  %v868_v32 = vmul.f32 %v5131_v52, %v5156_v61 }
  0xd1   : > { %7331 = vst [vmem:[#allocation34_spill] sm:$0xff] %v5229_v13  ;;  %v956_v34 = vadd.f32 %v940_v47, %v5081_v22  ;;  %v1615_v15 = vadd.f32 %v1599_v17, %v5081_v22  ;;  %v955_v37 = vadd.f32 %v939_v28, %v5081_v22  ;;  %7335 = vst [vmem:[#allocation38_spill] sm:$0xff] %v5247_v14 }
  0xd2   : > { %v1614_v1 = vadd.f32 %v1598_v51, %v5081_v22  ;;  %719 = vperm.xlu0 %4689, %v445_v2   ;;  %v836_v2 = vmul.f32 %v5160_v62, %v5247_v14 }
  0xd3   : > { %590 = vperm.xlu1 %4688, %v5051_v11   ;;  %v972_v12 = vmax.f32 %v956_v34, 0.0  ;;  %v1631_v51 = vmax.f32 %v1615_v15, 0.0  ;;  %v971_v17 = vmax.f32 %v955_v37, 0.0  ;;  %v918_v34 = vmul.f32 %v5145_v57, %v5094_v31 }
  0xd4   : > { %v1630_v11 = vmax.f32 %v1614_v1, 0.0  ;;  %v1527_v15 = vmul.f32 %v5134_v53, %v5156_v61  ;;  %v1577_v37 = vmul.f32 %v5148_v58, %v5094_v31  ;;  %v834_v1 = vmul.f32 %v5160_v62, %v5109_v43 }
  0xd5   : > { %v5236_v25 = vpop.permute.xlu1 %578 }
  0xd6   : > { %7332 = vst [vmem:[#allocation35_spill] sm:$0xff] %v5236_v25  ;;  %v954_v21 = vadd.f32 %v938_v10, %v5236_v25  ;;  %v1613_v27 = vadd.f32 %v1597_v4, %v5236_v25  ;;  %v953_v45 = vadd.f32 %v937_v5, %v5236_v25  ;;  %v1612_v47 = vadd.f32 %v1596_v8, %v5236_v25 }
  0xd7   : > { %586 = vperm.xlu1 %4688, %v5041_v9   ;;  %714 = vperm.xlu0 %4689, %v444_v20   ;;  %v442_v9 = vld [vmem:[#allocation2 + $0xc8] sm:$0xff]  ;;  %v867_v10 = vmul.f32 %v5137_v54, %v5156_v61  ;;  %v1526_v4 = vmul.f32 %v5140_v55, %v5156_v61  ;;  %v1493_v5 = vmul.f32 %v5164_v63, %v5109_v43 }
  0xd8   : > { %v970_v49 = vmax.f32 %v954_v21, 0.0  ;;  %v1629_v56 = vmax.f32 %v1613_v27, 0.0  ;;  %v969_v18 = vmax.f32 %v953_v45, 0.0  ;;  %v1628_v19 = vmax.f32 %v1612_v47, 0.0  ;;  %v5275_v45 = vpop.permute.xlu0 %451 }
  0xd9   : > { %v1495_v8 = vmul.f32 %v5164_v63, %v5247_v14  ;;  %v917_v21 = vmul.f32 %v5151_v59, %v5094_v31  ;;  %v1576_v27 = vmul.f32 %v5154_v60, %v5094_v31  ;;  %7337 = vst [vmem:[#allocation40_spill] sm:$0xff] %v5275_v45  ;;  %v870_v47 = vmul.f32 %v5131_v52, %v5201_v24 }
  0xda   : > { %v5243_v23 = vpop.permute.xlu1 %461  ;;  %v980_v26 = vpack.c.bf16 %v972_v12, %v970_v49  ;;  %v1639_v29 = vpack.c.bf16 %v1631_v51, %v1629_v56  ;;  %v979_v33 = vpack.c.bf16 %v971_v17, %v969_v18  ;;  %v1638_v35 = vpack.c.bf16 %v1630_v11, %v1628_v19 }
  0xdb   : > { %7333 = vst [vmem:[#allocation36_spill] sm:$0xff] %v5243_v23  ;;  %709 = vperm.xlu0 %4689, %v443_v16   ;;  %v884_v12 = vadd.f32 %v868_v32, %v834_v1  ;;  %v833_v51 = vmul.f32 %v5168_v0, %v5109_v43  ;;  %v1492_v17 = vmul.f32 %v5172_v3, %v5109_v43 }
  0xdc   : > { %1118 = vmatprep.subr.bf16.mxu0 %v980_v26  ;;  %1648 = vmatprep.subr.bf16.mxu1 %v1639_v29  ;;  %v1529_v49 = vmul.f32 %v5134_v53, %v5201_v24  ;;  %v1543_v56 = vadd.f32 %v1527_v15, %v1493_v5  ;;  %v835_v18 = vmul.f32 %v5168_v0, %v5247_v14  ;;  %v439_v15 = vld [vmem:[#allocation2 + $0xb0] sm:$0xff] }
  0xdd   : > { %1119 = vmatpush1.bf16.msra.mxu0 %v979_v33  ;;  %1649 = vmatpush1.bf16.msra.mxu1 %v1638_v35  ;;  %v1494_v19 = vmul.f32 %v5172_v3, %v5247_v14  ;;  %v886_v20 = vadd.f32 %v870_v47, %v836_v2  ;;  %v869_v26 = vmul.f32 %v5137_v54, %v5201_v24  ;;  %v440_v35 = vld [vmem:[#allocation2 + $0xb8] sm:$0xff] }
  0xde   : > { %v5245_v7 = vpop.permute.xlu1 %466  ;;  %v883_v29 = vadd.f32 %v867_v10, %v833_v51  ;;  %v1542_v33 = vadd.f32 %v1526_v4, %v1492_v17  ;;  %v920_v16 = vmul.f32 %v5145_v57, %v5229_v13  ;;  %v1579_v32 = vmul.f32 %v5148_v58, %v5229_v13  ;;  %v5303_v4 = vpop.permute.xlu0 %498 }
  0xdf   : > { %7334 = vst [vmem:[#allocation37_spill] sm:$0xff] %v5245_v7  ;;  %704 = vperm.xlu0 %4689, %v442_v9   ;;  %v1545_v9 = vadd.f32 %v1529_v49, %v1495_v8  ;;  %v885_v1 = vadd.f32 %v869_v26, %v835_v18  ;;  %v919_v2 = vmul.f32 %v5151_v59, %v5229_v13  ;;  %7339 = vst [vmem:[#allocation42_spill] sm:$0xff] %v5303_v4 }
  0xe0   : > { %v1578_v10 = vmul.f32 %v5154_v60, %v5229_v13  ;;  %v934_v8 = vadd.f32 %v918_v34, %v884_v12  ;;  %v1593_v51 = vadd.f32 %v1577_v37, %v1543_v56  ;;  %v933_v17 = vadd.f32 %v917_v21, %v883_v29 }
  0xe1   : > { %v1592_v49 = vadd.f32 %v1576_v27, %v1542_v33  ;;  %v936_v22 = vadd.f32 %v920_v16, %v886_v20  ;;  %v1595_v25 = vadd.f32 %v1579_v32, %v1545_v9  ;;  %v864_v31 = vmul.f32 %v5131_v52, %v5303_v4  ;;  %v438_v20 = vld [vmem:[#allocation2 + $0xa8] sm:$0xff] }
  0xe2   : > { %v1523_v34 = vmul.f32 %v5134_v53, %v5303_v4  ;;  %v830_v21 = vmul.f32 %v5160_v62, %v5243_v23  ;;  %v1489_v27 = vmul.f32 %v5164_v63, %v5243_v23  ;;  %v829_v12 = vmul.f32 %v5168_v0, %v5243_v23 }
  0xe3   : > { %v5249_v28 = vpop.permute.xlu1 %502  ;;  %699 = vperm.xlu0 %4689, %v441_v6   ;;  %v1528_v6 = vmul.f32 %v5140_v55, %v5201_v24  ;;  %v863_v56 = vmul.f32 %v5137_v54, %v5303_v4 }
  0xe4   : > { %7336 = vst [vmem:[#allocation39_spill] sm:$0xff] %v5249_v28 }
  0xe5   : > { %v1544_v5 = vadd.f32 %v1528_v6, %v1494_v19  ;;  %v935_v6 = vadd.f32 %v919_v2, %v885_v1 }
  0xe7   : > { %694 = vperm.xlu0 %4689, %v440_v35   ;;  %v1594_v13 = vadd.f32 %v1578_v10, %v1544_v5  ;;  %v437_v5 = vld [vmem:[#allocation2 + $0xa0] sm:$0xff] }
  0xe8   : > { %v5283_v11 = vpop.permute.xlu1 %530 }
  0xe9   : > { %7338 = vst [vmem:[#allocation41_spill] sm:$0xff] %v5283_v11 }
  0xeb   : > { %689 = vperm.xlu0 %4689, %v439_v15  }
  0xed   : > { %v5305_v47 = vpop.permute.xlu1 %570 }
  0xee   : > { %7340 = vst [vmem:[#allocation43_spill] sm:$0xff] %v5305_v47  ;;  %v950_v18 = vadd.f32 %v934_v8, %v5305_v47  ;;  %v1609_v26 = vadd.f32 %v1593_v51, %v5305_v47  ;;  %v949_v19 = vadd.f32 %v933_v17, %v5305_v47  ;;  %v1608_v35 = vadd.f32 %v1592_v49, %v5305_v47 }
  0xef   : > { %684 = vperm.xlu0 %4689, %v438_v20   ;;  %v916_v49 = vmul.f32 %v5145_v57, %v5107_v42 }
  0xf0   : > { %v966_v32 = vmax.f32 %v950_v18, 0.0  ;;  %v1625_v15 = vmax.f32 %v1609_v26, 0.0  ;;  %v965_v1 = vmax.f32 %v949_v19, 0.0  ;;  %v1624_v2 = vmax.f32 %v1608_v35, 0.0  ;;  %v5337_v18 = vpop.permute.xlu0 %494 }
  0xf1   : > { %v5315_v37 = vpop.permute.xlu1 %574  ;;  %7342 = vst [vmem:[#allocation45_spill] sm:$0xff] %v5337_v18 }
  0xf2   : > { %7341 = vst [vmem:[#allocation44_spill] sm:$0xff] %v5315_v37  ;;  %v952_v29 = vadd.f32 %v936_v22, %v5315_v37  ;;  %v1611_v33 = vadd.f32 %v1595_v25, %v5315_v37  ;;  %v951_v16 = vadd.f32 %v935_v6, %v5315_v37  ;;  %v1610_v9 = vadd.f32 %v1594_v13, %v5315_v37 }
  0xf3   : > { %v1575_v22 = vmul.f32 %v5148_v58, %v5107_v42  ;;  %v915_v25 = vmul.f32 %v5151_v59, %v5107_v42  ;;  %v1574_v13 = vmul.f32 %v5154_v60, %v5107_v42  ;;  %679 = vperm.xlu0 %4689, %v437_v5   ;;  %v866_v42 = vmul.f32 %v5131_v52, %v5249_v28 }
  0xf4   : > { %v968_v10 = vmax.f32 %v952_v29, 0.0  ;;  %v1627_v8 = vmax.f32 %v1611_v33, 0.0  ;;  %v967_v51 = vmax.f32 %v951_v16, 0.0  ;;  %v1626_v17 = vmax.f32 %v1610_v9, 0.0 }
  0xf5   : > { %v880_v29 = vadd.f32 %v864_v31, %v830_v21  ;;  %v1488_v33 = vmul.f32 %v5172_v3, %v5243_v23  ;;  %v1522_v16 = vmul.f32 %v5140_v55, %v5303_v4  ;;  %v862_v9 = vmul.f32 %v5131_v52, %v5337_v18 }
  0xf6   : > { %v5339_v26 = vpop.permute.xlu1 %456  ;;  %v978_v19 = vpack.c.bf16 %v968_v10, %v966_v32  ;;  %v1637_v35 = vpack.c.bf16 %v1627_v8, %v1625_v15  ;;  %v977_v6 = vpack.c.bf16 %v967_v51, %v965_v1  ;;  %v1636_v20 = vpack.c.bf16 %v1626_v17, %v1624_v2  ;;  %v436_v2 = vld [vmem:[#allocation2 + $0x98] sm:$0xff] }
  0xf7   : > { %7343 = vst [vmem:[#allocation46_spill] sm:$0xff] %v5339_v26  ;;  %v1539_v32 = vadd.f32 %v1523_v34, %v1489_v27  ;;  %v879_v15 = vadd.f32 %v863_v56, %v829_v12  ;;  %v1525_v31 = vmul.f32 %v5134_v53, %v5249_v28  ;;  %v865_v21 = vmul.f32 %v5137_v54, %v5249_v28 }
  0xf8   : > { %1120 = vmatprep.subr.bf16.mxu0 %v978_v19  ;;  %1650 = vmatprep.subr.bf16.mxu1 %v1637_v35  ;;  %v1524_v1 = vmul.f32 %v5140_v55, %v5249_v28  ;;  %v914_v5 = vmul.f32 %v5145_v57, %v5283_v11  ;;  %v1573_v10 = vmul.f32 %v5148_v58, %v5283_v11  ;;  %v435_v19 = vld [vmem:[#allocation2 + $0x90] sm:$0xff] }
  0xf9   : > { %1121 = vmatpush1.bf16.msra.mxu0 %v977_v6  ;;  %1651 = vmatpush1.bf16.msra.mxu1 %v1636_v20  ;;  %v913_v34 = vmul.f32 %v5151_v59, %v5283_v11  ;;  %v1572_v27 = vmul.f32 %v5154_v60, %v5283_v11  ;;  %v832_v56 = vmul.f32 %v5160_v62, %v5245_v7 }
  0xfa   : > { %674 = vperm.xlu0 %4689, %v436_v2   ;;  %v1491_v8 = vmul.f32 %v5164_v63, %v5245_v7  ;;  %v831_v51 = vmul.f32 %v5168_v0, %v5245_v7  ;;  %v1490_v17 = vmul.f32 %v5172_v3, %v5245_v7  ;;  %v1538_v35 = vadd.f32 %v1522_v16, %v1488_v33  ;;  %v5379_v7 = vpop.permute.xlu0 %562 }
  0xfb   : > { %v5363_v12 = vpop.permute.xlu1 %490  ;;  %v1521_v6 = vmul.f32 %v5134_v53, %v5337_v18  ;;  %v861_v20 = vmul.f32 %v5137_v54, %v5337_v18  ;;  %v1520_v2 = vmul.f32 %v5140_v55, %v5337_v18  ;;  %v882_v11 = vadd.f32 %v866_v42, %v832_v56  ;;  %7345 = vst [vmem:[#allocation48_spill] sm:$0xff] %v5379_v7 }
  0xfc   : > { %7344 = vst [vmem:[#allocation47_spill] sm:$0xff] %v5363_v12  ;;  %v1541_v37 = vadd.f32 %v1525_v31, %v1491_v8  ;;  %v881_v47 = vadd.f32 %v865_v21, %v831_v51  ;;  %v1540_v30 = vadd.f32 %v1524_v1, %v1490_v17  ;;  %v930_v28 = vadd.f32 %v914_v5, %v880_v29 }
  0xfd   : > { %v1589_v4 = vadd.f32 %v1573_v10, %v1539_v32  ;;  %v929_v23 = vadd.f32 %v913_v34, %v879_v15  ;;  %v1588_v14 = vadd.f32 %v1572_v27, %v1538_v35  ;;  %v828_v33 = vmul.f32 %v5160_v62, %v5339_v26  ;;  %v434_v27 = vld [vmem:[#allocation2 + $0x88] sm:$0xff]  ;;  %v433_v35 = vld [vmem:[#allocation2 + $0x80] sm:$0xff] }
  0xfe   : > { %669 = vperm.xlu0 %4689, %v435_v19   ;;  %v1487_v16 = vmul.f32 %v5164_v63, %v5339_v26  ;;  %v827_v18 = vmul.f32 %v5168_v0, %v5339_v26  ;;  %v1486_v42 = vmul.f32 %v5172_v3, %v5339_v26  ;;  %v826_v29 = vmul.f32 %v5160_v62, %v5275_v45 }
  0xff   : > { %v1485_v32 = vmul.f32 %v5164_v63, %v5275_v45  ;;  %v825_v15 = vmul.f32 %v5168_v0, %v5275_v45  ;;  %v1484_v21 = vmul.f32 %v5172_v3, %v5275_v45  ;;  %v932_v1 = vadd.f32 %v916_v49, %v882_v11 }
 0x100   : > { %v5389_v31 = vpop.permute.xlu1 %522  ;;  %v1591_v5 = vadd.f32 %v1575_v22, %v1541_v37  ;;  %v931_v10 = vadd.f32 %v915_v25, %v881_v47  ;;  %v1590_v34 = vadd.f32 %v1574_v13, %v1540_v30  ;;  %v946_v56 = vadd.f32 %v930_v28, %v5379_v7 }
 0x101   : > { %7346 = vst [vmem:[#allocation49_spill] sm:$0xff] %v5389_v31  ;;  %v1605_v8 = vadd.f32 %v1589_v4, %v5379_v7  ;;  %v945_v62 = vadd.f32 %v929_v23, %v5379_v7  ;;  %v1604_v51 = vadd.f32 %v1588_v14, %v5379_v7  ;;  %v878_v63 = vadd.f32 %v862_v9, %v828_v33 }
 0x102   : > { %664 = vperm.xlu0 %4689, %v434_v27   ;;  %v1537_v17 = vadd.f32 %v1521_v6, %v1487_v16  ;;  %v877_v0 = vadd.f32 %v861_v20, %v827_v18  ;;  %v1536_v19 = vadd.f32 %v1520_v2, %v1486_v42  ;;  %v860_v30 = vmul.f32 %v5131_v52, %v5363_v12  ;;  %v5421_v18 = vpop.permute.xlu0 %558 }
 0x103   : > { %v1519_v28 = vmul.f32 %v5134_v53, %v5363_v12  ;;  %v859_v11 = vmul.f32 %v5137_v54, %v5363_v12  ;;  %v1518_v23 = vmul.f32 %v5140_v55, %v5363_v12  ;;  %v962_v37 = vmax.f32 %v946_v56, 0.0  ;;  %7348 = vst [vmem:[#allocation51_spill] sm:$0xff] %v5421_v18 }
 0x104   : > { %v5403_v3 = vpop.permute.xlu1 %526  ;;  %v1621_v53 = vmax.f32 %v1605_v8, 0.0  ;;  %v961_v49 = vmax.f32 %v945_v62, 0.0  ;;  %v1620_v22 = vmax.f32 %v1604_v51, 0.0  ;;  %v876_v9 = vadd.f32 %v860_v30, %v826_v29 }
 0x105   : > { %7347 = vst [vmem:[#allocation50_spill] sm:$0xff] %v5403_v3  ;;  %v912_v14 = vmul.f32 %v5145_v57, %v5403_v3  ;;  %v1571_v4 = vmul.f32 %v5148_v58, %v5403_v3  ;;  %v911_v47 = vmul.f32 %v5151_v59, %v5403_v3  ;;  %v1570_v52 = vmul.f32 %v5154_v60, %v5403_v3 }
 0x106   : > { %659 = vperm.xlu0 %4689, %v433_v35   ;;  %v1535_v6 = vadd.f32 %v1519_v28, %v1485_v32  ;;  %v875_v20 = vadd.f32 %v859_v11, %v825_v15  ;;  %v1534_v2 = vadd.f32 %v1518_v23, %v1484_v21  ;;  %v910_v16 = vmul.f32 %v5145_v57, %v5389_v31 }
 0x107   : > { %v928_v54 = vadd.f32 %v912_v14, %v878_v63  ;;  %v1587_v25 = vadd.f32 %v1571_v4, %v1537_v17  ;;  %v927_v55 = vadd.f32 %v911_v47, %v877_v0  ;;  %v1586_v13 = vadd.f32 %v1570_v52, %v1536_v19 }
 0x108   : > { %v1569_v42 = vmul.f32 %v5148_v58, %v5389_v31  ;;  %v909_v27 = vmul.f32 %v5151_v59, %v5389_v31  ;;  %v1568_v56 = vmul.f32 %v5154_v60, %v5389_v31 }
 0x109   : > { %v5423_v33 = vpop.permute.xlu1 %566  ;;  %v944_v21 = vadd.f32 %v928_v54, %v5421_v18  ;;  %v1603_v57 = vadd.f32 %v1587_v25, %v5421_v18  ;;  %v943_v58 = vadd.f32 %v927_v55, %v5421_v18  ;;  %v1602_v62 = vadd.f32 %v1586_v13, %v5421_v18 }
 0x10a   : > { %7349 = vst [vmem:[#allocation52_spill] sm:$0xff] %v5423_v33  ;;  %v948_v8 = vadd.f32 %v932_v1, %v5423_v33  ;;  %v1607_v29 = vadd.f32 %v1591_v5, %v5423_v33  ;;  %v947_v32 = vadd.f32 %v931_v10, %v5423_v33  ;;  %v1606_v15 = vadd.f32 %v1590_v34, %v5423_v33 }
 0x10b   : > { %v926_v1 = vadd.f32 %v910_v16, %v876_v9  ;;  %v1585_v5 = vadd.f32 %v1569_v42, %v1535_v6  ;;  %v925_v0 = vadd.f32 %v909_v27, %v875_v20  ;;  %v1584_v10 = vadd.f32 %v1568_v56, %v1534_v2  ;;  %v4717_v6 = vld [vmem:[%s7080_s3] sm:$0xff]   ;;  %v4718_v2 = vld [vmem:[%s7080_s3 + $0x8] sm:$0xff]   ;;  %v4719_v16 = vld [vmem:[%s7080_s3 + $0x10] sm:$0xff]  }
 0x10c   : > { %v964_v59 = vmax.f32 %v948_v8, 0.0  ;;  %v1623_v51 = vmax.f32 %v1607_v29, 0.0  ;;  %v963_v63 = vmax.f32 %v947_v32, 0.0  ;;  %v1622_v60 = vmax.f32 %v1606_v15, 0.0  ;;  %v4720_v42 = vld [vmem:[%s7080_s3 + $0x18] sm:$0xff]   ;;  %v4721_v27 = vld [vmem:[%s7080_s3 + $0x20] sm:$0xff]  }
 0x10d   : > { %v5441_v17 = vpop.permute.xlu1 %554  ;;  %v960_v4 = vmax.f32 %v944_v21, 0.0  ;;  %v1619_v47 = vmax.f32 %v1603_v57, 0.0  ;;  %v959_v52 = vmax.f32 %v943_v58, 0.0  ;;  %v1618_v54 = vmax.f32 %v1602_v62, 0.0  ;;  %v4722_v56 = vld [vmem:[%s7080_s3 + $0x28] sm:$0xff]   ;;  %v4723_v8 = vld [vmem:[%s7080_s3 + $0x30] sm:$0xff]  }
 0x10e   : > { %7350 = vst [vmem:[#allocation53_spill] sm:$0xff] %v5441_v17  ;;  %v976_v19 = vpack.c.bf16 %v964_v59, %v962_v37  ;;  %v1635_v34 = vpack.c.bf16 %v1623_v51, %v1621_v53  ;;  %v975_v35 = vpack.c.bf16 %v963_v63, %v961_v49  ;;  %v1634_v30 = vpack.c.bf16 %v1622_v60, %v1620_v22  ;;  %v4724_v29 = vld [vmem:[%s7080_s3 + $0x38] sm:$0xff]   ;;  %v4725_v32 = vld [vmem:[%s7080_s3 + $0x40] sm:$0xff]   ;;  %v4726_v15 = vld [vmem:[%s7080_s3 + $0x48] sm:$0xff]  }
 0x10f   : > { %v942_v28 = vadd.f32 %v926_v1, %v5441_v17  ;;  %v1601_v11 = vadd.f32 %v1585_v5, %v5441_v17  ;;  %v941_v23 = vadd.f32 %v925_v0, %v5441_v17  ;;  %v1600_v14 = vadd.f32 %v1584_v10, %v5441_v17  ;;  %v4727_v21 = vld [vmem:[%s7080_s3 + $0x50] sm:$0xff]   ;;  %v4728_v57 = vld [vmem:[%s7080_s3 + $0x58] sm:$0xff]   ;;  %v4729_v58 = vld [vmem:[%s7080_s3 + $0x60] sm:$0xff]  }
 0x110   : > { %1122 = vmatprep.subr.bf16.mxu0 %v976_v19  ;;  %1652 = vmatprep.subr.bf16.mxu1 %v1635_v34  ;;  %v7351_v20 = vmov 0   ;;  %v4730_v59 = vld [vmem:[%s7080_s3 + $0x68] sm:$0xff]   ;;  %v4731_v60 = vld [vmem:[%s7080_s3 + $0x70] sm:$0xff]   ;;  %v4732_v5 = vld [vmem:[%s7080_s3 + $0x78] sm:$0xff]  }
 0x111   : > { %1123 = vmatpush1.bf16.msra.mxu0 %v975_v35  ;;  %1653 = vmatpush1.bf16.msra.mxu1 %v1634_v30  ;;  %v958_v37 = vmax.f32 %v942_v28, 0.0  ;;  %v1617_v53 = vmax.f32 %v1601_v11, 0.0  ;;  %v957_v49 = vmax.f32 %v941_v23, 0.0  ;;  %v1616_v22 = vmax.f32 %v1600_v14, 0.0 }
 0x112   : > { %v5534_v62 = vpop.permute.xlu1 %734 }
 0x113   : > { %v974_v25 = vpack.c.bf16 %v960_v4, %v958_v37  ;;  %v1633_v55 = vpack.c.bf16 %v1619_v47, %v1617_v53  ;;  %v973_v13 = vpack.c.bf16 %v959_v52, %v957_v49  ;;  %v1632_v9 = vpack.c.bf16 %v1618_v54, %v1616_v22  ;;  %7352 = vst [vmem:[#allocation54_spill] sm:$0xff] %v5534_v62 }
 0x115   : > { %1124 = vmatprep.subr.bf16.mxu0 %v974_v25  ;;  %1654 = vmatprep.subr.bf16.mxu1 %v1633_v55 }
 0x116   : > { %1125 = vmatpush1.bf16.msra.mxu0 %v973_v13  ;;  %1655 = vmatpush1.bf16.msra.mxu1 %v1632_v9  ;;  %v5543_v51 = vpop.permute.xlu1 %729 }
 0x117   : > { %7353 = vst [vmem:[#allocation55_spill] sm:$0xff] %v5543_v51 }
 0x119   : > { %4346 = vmatmul.mubr.msk.bf16.vlgmr.msra.gmra.mxu0 %vm1061_vm0, %v4717_v6  ;;  %4363 = vmatmul.mubr.msk.bf16.vlgmr.msra.gmra.mxu1 %vm1061_vm0, %v4717_v6 }
 0x11a   : > { %1152 = vmatprep.mubr.bf16.mxu0 %v7351_v20  ;;  %1682 = vmatprep.mubr.bf16.mxu1 %v7351_v20  ;;  %v5549_v63 = vpop.permute.xlu1 %649 }
 0x11b   : > { %7354 = vst [vmem:[#allocation56_spill] sm:$0xff] %v5549_v63 }
 0x11e   : > { %v5558_v1 = vpop.permute.xlu1 %644 }
 0x11f   : > { %7355 = vst [vmem:[#allocation57_spill] sm:$0xff] %v5558_v1  ;;  %v5587_v47 = vpop.permute.xlu0 %654 }
 0x120   : > { %7367 = vst [vmem:[#allocation69_spill] sm:$0xff] %v5587_v47 }
 0x121   : > { %4347 = vmatmul.mubr.msk.bf16.gmra.mxu0 %vm1061_vm0, %v4718_v2  ;;  %4364 = vmatmul.mubr.msk.bf16.gmra.mxu1 %vm1061_vm0, %v4718_v2 }
 0x122   : > { %1162 = vmatprep.mubr.bf16.mxu0 %v7351_v20  ;;  %1692 = vmatprep.mubr.bf16.mxu1 %v7351_v20  ;;  %v5563_v0 = vpop.permute.xlu1 %639 }
 0x123   : > { %7356 = vst [vmem:[#allocation58_spill] sm:$0xff] %v5563_v0 }
 0x126   : > { %v5567_v10 = vpop.permute.xlu1 %634 }
 0x127   : > { %7357 = vst [vmem:[#allocation59_spill] sm:$0xff] %v5567_v10 }
 0x129   : > { %4348 = vmatmul.mubr.msk.bf16.gmra.mxu0 %vm1061_vm0, %v4719_v16  ;;  %4365 = vmatmul.mubr.msk.bf16.gmra.mxu1 %vm1061_vm0, %v4719_v16 }
 0x12a   : > { %1172 = vmatprep.mubr.bf16.mxu0 %v7351_v20  ;;  %1702 = vmatprep.mubr.bf16.mxu1 %v7351_v20  ;;  %v5569_v19 = vpop.permute.xlu1 %629 }
 0x12b   : > { %7358 = vst [vmem:[#allocation60_spill] sm:$0xff] %v5569_v19 }
 0x12e   : > { %v5571_v34 = vpop.permute.xlu1 %624 }
 0x12f   : > { %7359 = vst [vmem:[#allocation61_spill] sm:$0xff] %v5571_v34 }
 0x131   : > { %4349 = vmatmul.mubr.msk.bf16.gmra.mxu0 %vm1061_vm0, %v4720_v42  ;;  %4366 = vmatmul.mubr.msk.bf16.gmra.mxu1 %vm1061_vm0, %v4720_v42 }
 0x132   : > { %1182 = vmatprep.mubr.bf16.mxu0 %v7351_v20  ;;  %1712 = vmatprep.mubr.bf16.mxu1 %v7351_v20  ;;  %v5573_v35 = vpop.permute.xlu1 %619 }
 0x133   : > { %7360 = vst [vmem:[#allocation62_spill] sm:$0xff] %v5573_v35 }
 0x136   : > { %v5575_v30 = vpop.permute.xlu1 %614 }
 0x137   : > { %7361 = vst [vmem:[#allocation63_spill] sm:$0xff] %v5575_v30 }
 0x139   : > { %4350 = vmatmul.mubr.msk.bf16.gmra.mxu0 %vm1061_vm0, %v4721_v27  ;;  %4367 = vmatmul.mubr.msk.bf16.gmra.mxu1 %vm1061_vm0, %v4721_v27 }
 0x13a   : > { %1192 = vmatprep.mubr.bf16.mxu0 %v7351_v20  ;;  %1722 = vmatprep.mubr.bf16.mxu1 %v7351_v20  ;;  %v5577_v28 = vpop.permute.xlu1 %610 }
 0x13b   : > { %7362 = vst [vmem:[#allocation64_spill] sm:$0xff] %v5577_v28 }
 0x13e   : > { %v5579_v11 = vpop.permute.xlu1 %606 }
 0x13f   : > { %7363 = vst [vmem:[#allocation65_spill] sm:$0xff] %v5579_v11 }
 0x141   : > { %4351 = vmatmul.mubr.msk.bf16.gmra.mxu0 %vm1061_vm0, %v4722_v56  ;;  %4368 = vmatmul.mubr.msk.bf16.gmra.mxu1 %vm1061_vm0, %v4722_v56 }
 0x142   : > { %1202 = vmatprep.mubr.bf16.mxu0 %v7351_v20  ;;  %1732 = vmatprep.mubr.bf16.mxu1 %v7351_v20  ;;  %v5581_v23 = vpop.permute.xlu1 %602 }
 0x143   : > { %7364 = vst [vmem:[#allocation66_spill] sm:$0xff] %v5581_v23 }
 0x146   : > { %v5583_v14 = vpop.permute.xlu1 %598 }
 0x147   : > { %7365 = vst [vmem:[#allocation67_spill] sm:$0xff] %v5583_v14 }
 0x149   : > { %4352 = vmatmul.mubr.msk.bf16.gmra.mxu0 %vm1061_vm0, %v4723_v8  ;;  %4369 = vmatmul.mubr.msk.bf16.gmra.mxu1 %vm1061_vm0, %v4723_v8  ;;  %v5591_v54 = vpop.permute.xlu0 %724 }
 0x14a   : > { %1212 = vmatprep.mubr.bf16.mxu0 %v7351_v20  ;;  %1742 = vmatprep.mubr.bf16.mxu1 %v7351_v20  ;;  %v5585_v4 = vpop.permute.xlu1 %594  ;;  %7369 = vst [vmem:[#allocation71_spill] sm:$0xff] %v5591_v54 }
 0x14b   : > { %7366 = vst [vmem:[#allocation68_spill] sm:$0xff] %v5585_v4 }
 0x14d   : > { %v5597_v22 = vpop.permute.xlu0 %719 }
 0x14e   : > { %v5589_v52 = vpop.permute.xlu1 %590  ;;  %7371 = vst [vmem:[#allocation73_spill] sm:$0xff] %v5597_v22 }
 0x14f   : > { %7368 = vst [vmem:[#allocation70_spill] sm:$0xff] %v5589_v52 }
 0x151   : > { %4353 = vmatmul.mubr.msk.bf16.gmra.mxu0 %vm1061_vm0, %v4724_v29  ;;  %4370 = vmatmul.mubr.msk.bf16.gmra.mxu1 %vm1061_vm0, %v4724_v29 }
 0x152   : > { %1222 = vmatprep.mubr.bf16.mxu0 %v7351_v20  ;;  %1752 = vmatprep.mubr.bf16.mxu1 %v7351_v20  ;;  %v5593_v37 = vpop.permute.xlu1 %586  ;;  %v5608_v29 = vpop.permute.xlu0 %714 }
 0x153   : > { %7370 = vst [vmem:[#allocation72_spill] sm:$0xff] %v5593_v37  ;;  %7372 = vst [vmem:[#allocation74_spill] sm:$0xff] %v5608_v29 }
 0x159   : > { %4354 = vmatmul.mubr.msk.bf16.gmra.mxu0 %vm1061_vm0, %v4725_v32  ;;  %4371 = vmatmul.mubr.msk.bf16.gmra.mxu1 %vm1061_vm0, %v4725_v32 }
 0x15a   : > { %1232 = vmatprep.mubr.bf16.mxu0 %v7351_v20  ;;  %1762 = vmatprep.mubr.bf16.mxu1 %v7351_v20 }
 0x161   : > { %4355 = vmatmul.mubr.msk.bf16.gmra.mxu0 %vm1061_vm0, %v4726_v15  ;;  %4372 = vmatmul.mubr.msk.bf16.gmra.mxu1 %vm1061_vm0, %v4726_v15 }
 0x162   : > { %1242 = vmatprep.mubr.bf16.mxu0 %v7351_v20  ;;  %1772 = vmatprep.mubr.bf16.mxu1 %v7351_v20 }
 0x169   : > { %4356 = vmatmul.mubr.msk.bf16.gmra.mxu0 %vm1061_vm0, %v4727_v21  ;;  %4373 = vmatmul.mubr.msk.bf16.gmra.mxu1 %vm1061_vm0, %v4727_v21 }
 0x16a   : > { %1252 = vmatprep.mubr.bf16.mxu0 %v7351_v20  ;;  %1782 = vmatprep.mubr.bf16.mxu1 %v7351_v20 }
 0x171   : > { %4357 = vmatmul.mubr.msk.bf16.gmra.mxu0 %vm1061_vm0, %v4728_v57  ;;  %4374 = vmatmul.mubr.msk.bf16.gmra.mxu1 %vm1061_vm0, %v4728_v57 }
 0x172   : > { %1262 = vmatprep.mubr.bf16.mxu0 %v7351_v20  ;;  %1792 = vmatprep.mubr.bf16.mxu1 %v7351_v20 }
 0x179   : > { %4358 = vmatmul.mubr.msk.bf16.gmra.mxu0 %vm1061_vm0, %v4729_v58  ;;  %4375 = vmatmul.mubr.msk.bf16.gmra.mxu1 %vm1061_vm0, %v4729_v58 }
 0x17a   : > { %1272 = vmatprep.mubr.bf16.mxu0 %v7351_v20  ;;  %1802 = vmatprep.mubr.bf16.mxu1 %v7351_v20 }
 0x181   : > { %4359 = vmatmul.mubr.msk.bf16.gmra.mxu0 %vm1061_vm0, %v4730_v59  ;;  %4376 = vmatmul.mubr.msk.bf16.gmra.mxu1 %vm1061_vm0, %v4730_v59 }
 0x182   : > { %1282 = vmatprep.mubr.bf16.mxu0 %v7351_v20  ;;  %1812 = vmatprep.mubr.bf16.mxu1 %v7351_v20 }
 0x189   : > { %4360 = vmatmul.mubr.msk.bf16.gmra.mxu0 %vm1061_vm0, %v4731_v60  ;;  %4377 = vmatmul.mubr.msk.bf16.gmra.mxu1 %vm1061_vm0, %v4731_v60 }
 0x18a   : > { %1292 = vmatprep.mubr.bf16.mxu0 %v7351_v20  ;;  %1822 = vmatprep.mubr.bf16.mxu1 %v7351_v20 }
 0x191   : > { %4361 = vmatmul.mubr.msk.bf16.gmra.mxu0 %vm1061_vm0, %v4732_v5  ;;  %4378 = vmatmul.mubr.msk.bf16.gmra.mxu1 %vm1061_vm0, %v4732_v5 }
 0x1d9   : > { %v1144_v53 = vpop.f32.mrf.mxu0  ;;  %v5595_v49 = vpop.f32.mrf.mxu1 }
 0x1da   : > { %v1145_v25 = vadd.f32 %v1144_v53, %v5593_v37 }
 0x1db   : > { %v1146_v55 = vpop.f32.mrf.mxu0  ;;  %v5600_v13 = vpop.f32.mrf.mxu1 }
 0x1dc   : > { %v1147_v9 = vadd.f32 %v1146_v55, %v5593_v37  ;;  %v1303_v16 = vmax.f32 %v1145_v25, 0.0 }
 0x1dd   : > { %v5603_v6 = vpop.f32.mrf.mxu0  ;;  %v1678_v2 = vpop.f32.mrf.mxu1 }
 0x1de   : > { %v1304_v42 = vmax.f32 %v1147_v9, 0.0  ;;  %v1679_v27 = vadd.f32 %v1678_v2, %v5589_v52 }
 0x1df   : > { %v5606_v56 = vpop.f32.mrf.mxu0  ;;  %v1680_v8 = vpop.f32.mrf.mxu1 }
 0x1e0   : > { %v5610_v32 = vmax.f32 %v1303_v16, %v1304_v42  ;;  %v1681_v15 = vadd.f32 %v1680_v8, %v5589_v52  ;;  %v1835_v59 = vmax.f32 %v1679_v27, 0.0  ;;  %v5623_v16 = vpop.permute.xlu0 %709 }
 0x1e1   : > { %v1154_v21 = vpop.f32.mrf.mxu0  ;;  %v5613_v57 = vpop.f32.mrf.mxu1  ;;  %7373 = vst [vmem:[#allocation75_spill] sm:$0xff] %v5623_v16 }
 0x1e2   : > { %v1155_v58 = vadd.f32 %v1154_v21, %v5585_v4  ;;  %v1836_v60 = vmax.f32 %v1681_v15, 0.0 }
 0x1e3   : > { %v1156_v5 = vpop.f32.mrf.mxu0  ;;  %v5616_v53 = vpop.f32.mrf.mxu1 }
 0x1e4   : > { %v1157_v25 = vadd.f32 %v1156_v5, %v5585_v4  ;;  %v5619_v55 = vmax.f32 %v1835_v59, %v1836_v60  ;;  %v1307_v42 = vmax.f32 %v1155_v58, 0.0 }
 0x1e5   : > { %v5621_v9 = vpop.f32.mrf.mxu0  ;;  %v1688_v2 = vpop.f32.mrf.mxu1 }
 0x1e6   : > { %v1308_v8 = vmax.f32 %v1157_v25, 0.0  ;;  %v1689_v18 = vadd.f32 %v1688_v2, %v5583_v14  ;;  %v5633_v25 = vpop.permute.xlu0 %704 }
 0x1e7   : > { %v5626_v17 = vpop.f32.mrf.mxu0  ;;  %v1690_v27 = vpop.f32.mrf.mxu1  ;;  %7374 = vst [vmem:[#allocation76_spill] sm:$0xff] %v5633_v25 }
 0x1e8   : > { %v5628_v15 = vmax.f32 %v1307_v42, %v1308_v8  ;;  %v1691_v21 = vadd.f32 %v1690_v27, %v5583_v14  ;;  %v1839_v59 = vmax.f32 %v1689_v18, 0.0 }
 0x1e9   : > { %v1164_v3 = vpop.f32.mrf.mxu0  ;;  %v1694_v5 = vpop.f32.mrf.mxu1 }
 0x1ea   : > { %v1840_v60 = vmax.f32 %v1691_v21, 0.0  ;;  %v1165_v31 = vadd.f32 %v1164_v3, %v5581_v23  ;;  %v1695_v12 = vadd.f32 %v1694_v5, %v5581_v23 }
 0x1eb   : > { %v1166_v33 = vpop.f32.mrf.mxu0  ;;  %v1696_v58 = vpop.f32.mrf.mxu1 }
 0x1ec   : > { %v1167_v2 = vadd.f32 %v1166_v33, %v5581_v23  ;;  %v1697_v7 = vadd.f32 %v1696_v58, %v5581_v23  ;;  %v5637_v42 = vmax.f32 %v1839_v59, %v1840_v60  ;;  %v1311_v18 = vmax.f32 %v1165_v31, 0.0  ;;  %v5643_v23 = vpop.permute.xlu0 %699 }
 0x1ed   : > { %v1168_v8 = vpop.f32.mrf.mxu0  ;;  %v1698_v27 = vpop.f32.mrf.mxu1  ;;  %v1841_v21 = vmax.f32 %v1695_v12, 0.0  ;;  %7375 = vst [vmem:[#allocation77_spill] sm:$0xff] %v5643_v23 }
 0x1ee   : > { %v1312_v26 = vmax.f32 %v1167_v2, 0.0  ;;  %v1842_v45 = vmax.f32 %v1697_v7, 0.0  ;;  %v1169_v3 = vadd.f32 %v1168_v8, %v5579_v11  ;;  %v1699_v5 = vadd.f32 %v1698_v27, %v5579_v11 }
 0x1ef   : > { %v1170_v43 = vpop.f32.mrf.mxu0  ;;  %v1700_v24 = vpop.f32.mrf.mxu1 }
 0x1f0   : > { %v1171_v61 = vadd.f32 %v1170_v43, %v5579_v11  ;;  %v1701_v33 = vadd.f32 %v1700_v24, %v5579_v11  ;;  %v1909_v59 = vmax.f32 %v1841_v21, %v1842_v45  ;;  %v1379_v60 = vmax.f32 %v1311_v18, %v1312_v26  ;;  %v5651_v44 = vpop.permute.xlu0 %694 }
 0x1f1   : > { %v1174_v39 = vpop.f32.mrf.mxu0  ;;  %v1704_v58 = vpop.f32.mrf.mxu1  ;;  %v1313_v31 = vmax.f32 %v1169_v3, 0.0  ;;  %v1843_v12 = vmax.f32 %v1699_v5, 0.0  ;;  %7376 = vst [vmem:[#allocation78_spill] sm:$0xff] %v5651_v44 }
 0x1f2   : > { %v1314_v2 = vmax.f32 %v1171_v61, 0.0  ;;  %v1844_v7 = vmax.f32 %v1701_v33, 0.0  ;;  %v1175_v8 = vadd.f32 %v1174_v39, %v5577_v28  ;;  %v1705_v27 = vadd.f32 %v1704_v58, %v5577_v28  ;;  %1910 = vmax.xlane.f32.xlu0 %v1909_v59  ;;  %1380 = vmax.xlane.f32.xlu1 %v1379_v60 }
 0x1f3   : > { %v1176_v41 = vpop.f32.mrf.mxu0  ;;  %v1706_v43 = vpop.f32.mrf.mxu1 }
 0x1f4   : > { %v1177_v24 = vadd.f32 %v1176_v41, %v5577_v28  ;;  %v1707_v11 = vadd.f32 %v1706_v43, %v5577_v28  ;;  %v1912_v18 = vmax.f32 %v1843_v12, %v1844_v7  ;;  %v1382_v21 = vmax.f32 %v1313_v31, %v1314_v2 }
 0x1f5   : > { %v1178_v45 = vpop.f32.mrf.mxu0  ;;  %v1708_v26 = vpop.f32.mrf.mxu1  ;;  %v1315_v3 = vmax.f32 %v1175_v8, 0.0  ;;  %v1845_v5 = vmax.f32 %v1705_v27, 0.0 }
 0x1f6   : > { %v1316_v61 = vmax.f32 %v1177_v24, 0.0  ;;  %v1846_v33 = vmax.f32 %v1707_v11, 0.0  ;;  %v1179_v39 = vadd.f32 %v1178_v45, %v5575_v30  ;;  %v1709_v58 = vadd.f32 %v1708_v26, %v5575_v30  ;;  %1913 = vmax.xlane.f32.xlu0 %v1912_v18  ;;  %1383 = vmax.xlane.f32.xlu1 %v1382_v21 }
 0x1f7   : > { %v1180_v59 = vpop.f32.mrf.mxu0  ;;  %v1710_v60 = vpop.f32.mrf.mxu1 }
 0x1f8   : > { %v1181_v41 = vadd.f32 %v1180_v59, %v5575_v30  ;;  %v1711_v43 = vadd.f32 %v1710_v60, %v5575_v30  ;;  %v1915_v31 = vmax.f32 %v1845_v5, %v1846_v33  ;;  %v1385_v11 = vmax.f32 %v1315_v3, %v1316_v61  ;;  %v5659_v3 = vpop.permute.xlu0 %689 }
 0x1f9   : > { %v1184_v7 = vpop.f32.mrf.mxu0  ;;  %v1714_v2 = vpop.f32.mrf.mxu1  ;;  %v1317_v27 = vmax.f32 %v1179_v39, 0.0  ;;  %v1847_v24 = vmax.f32 %v1709_v58, 0.0  ;;  %7377 = vst [vmem:[#allocation79_spill] sm:$0xff] %v5659_v3 }
 0x1fa   : > { %v1318_v12 = vmax.f32 %v1181_v41, 0.0  ;;  %v1848_v8 = vmax.f32 %v1711_v43, 0.0  ;;  %v1185_v45 = vadd.f32 %v1184_v7, %v5573_v35  ;;  %v1715_v26 = vadd.f32 %v1714_v2, %v5573_v35  ;;  %1916 = vmax.xlane.f32.xlu0 %v1915_v31  ;;  %1386 = vmax.xlane.f32.xlu1 %v1385_v11 }
 0x1fb   : > { %v1186_v18 = vpop.f32.mrf.mxu0  ;;  %v1716_v21 = vpop.f32.mrf.mxu1 }
 0x1fc   : > { %v1187_v59 = vadd.f32 %v1186_v18, %v5573_v35  ;;  %v1717_v60 = vadd.f32 %v1716_v21, %v5573_v35  ;;  %v1918_v33 = vmax.f32 %v1847_v24, %v1848_v8  ;;  %v1388_v61 = vmax.f32 %v1317_v27, %v1318_v12 }
 0x1fd   : > { %v1188_v30 = vpop.f32.mrf.mxu0  ;;  %v1718_v28 = vpop.f32.mrf.mxu1  ;;  %v1319_v58 = vmax.f32 %v1185_v45, 0.0  ;;  %v1849_v41 = vmax.f32 %v1715_v26, 0.0 }
 0x1fe   : > { %v1320_v5 = vmax.f32 %v1187_v59, 0.0  ;;  %v1850_v39 = vmax.f32 %v1717_v60, 0.0  ;;  %v1189_v43 = vadd.f32 %v1188_v30, %v5571_v34  ;;  %v1719_v7 = vadd.f32 %v1718_v28, %v5571_v34  ;;  %1919 = vmax.xlane.f32.xlu0 %v1918_v33  ;;  %1389 = vmax.xlane.f32.xlu1 %v1388_v61  ;;  %v5667_v61 = vpop.permute.xlu0 %684 }
 0x1ff   : > { %v1190_v2 = vpop.f32.mrf.mxu0  ;;  %v1720_v31 = vpop.f32.mrf.mxu1  ;;  %7378 = vst [vmem:[#allocation80_spill] sm:$0xff] %v5667_v61 }
 0x200   : > { %v1191_v11 = vadd.f32 %v1190_v2, %v5571_v34  ;;  %v1721_v18 = vadd.f32 %v1720_v31, %v5571_v34  ;;  %v1921_v27 = vmax.f32 %v1849_v41, %v1850_v39  ;;  %v1391_v24 = vmax.f32 %v1319_v58, %v1320_v5 }
 0x201   : > { %v1194_v8 = vpop.f32.mrf.mxu0  ;;  %v1724_v12 = vpop.f32.mrf.mxu1  ;;  %v1321_v45 = vmax.f32 %v1189_v43, 0.0  ;;  %v1851_v26 = vmax.f32 %v1719_v7, 0.0 }
 0x202   : > { %v1322_v21 = vmax.f32 %v1191_v11, 0.0  ;;  %v1852_v59 = vmax.f32 %v1721_v18, 0.0  ;;  %v1195_v30 = vadd.f32 %v1194_v8, %v5569_v19  ;;  %v1725_v28 = vadd.f32 %v1724_v12, %v5569_v19  ;;  %1922 = vmax.xlane.f32.xlu0 %v1921_v27  ;;  %1392 = vmax.xlane.f32.xlu1 %v1391_v24 }
 0x203   : > { %v1196_v60 = vpop.f32.mrf.mxu0  ;;  %v1726_v33 = vpop.f32.mrf.mxu1 }
 0x204   : > { %v1197_v2 = vadd.f32 %v1196_v60, %v5569_v19  ;;  %v1727_v31 = vadd.f32 %v1726_v33, %v5569_v19  ;;  %v1924_v58 = vmax.f32 %v1851_v26, %v1852_v59  ;;  %v1394_v41 = vmax.f32 %v1321_v45, %v1322_v21  ;;  %v5675_v45 = vpop.permute.xlu0 %679 }
 0x205   : > { %v1198_v39 = vpop.f32.mrf.mxu0  ;;  %v1728_v5 = vpop.f32.mrf.mxu1  ;;  %v1323_v11 = vmax.f32 %v1195_v30, 0.0  ;;  %v1853_v18 = vmax.f32 %v1725_v28, 0.0  ;;  %7379 = vst [vmem:[#allocation81_spill] sm:$0xff] %v5675_v45 }
 0x206   : > { %v1324_v43 = vmax.f32 %v1197_v2, 0.0  ;;  %v1854_v7 = vmax.f32 %v1727_v31, 0.0  ;;  %v1199_v8 = vadd.f32 %v1198_v39, %v5567_v10  ;;  %v1729_v12 = vadd.f32 %v1728_v5, %v5567_v10  ;;  %1925 = vmax.xlane.f32.xlu0 %v1924_v58  ;;  %1395 = vmax.xlane.f32.xlu1 %v1394_v41 }
 0x207   : > { %v1200_v27 = vpop.f32.mrf.mxu0  ;;  %v1730_v24 = vpop.f32.mrf.mxu1 }
 0x208   : > { %v1201_v60 = vadd.f32 %v1200_v27, %v5567_v10  ;;  %v1731_v33 = vadd.f32 %v1730_v24, %v5567_v10  ;;  %v1927_v59 = vmax.f32 %v1853_v18, %v1854_v7  ;;  %v1397_v21 = vmax.f32 %v1323_v11, %v1324_v43 }
 0x209   : > { %v1204_v19 = vpop.f32.mrf.mxu0  ;;  %v1734_v34 = vpop.f32.mrf.mxu1  ;;  %v1325_v28 = vmax.f32 %v1199_v8, 0.0  ;;  %v1855_v2 = vmax.f32 %v1729_v12, 0.0 }
 0x20a   : > { %v1326_v26 = vmax.f32 %v1201_v60, 0.0  ;;  %v1856_v30 = vmax.f32 %v1731_v33, 0.0  ;;  %v1205_v31 = vadd.f32 %v1204_v19, %v5563_v0  ;;  %v1735_v39 = vadd.f32 %v1734_v34, %v5563_v0  ;;  %1928 = vmax.xlane.f32.xlu0 %v1927_v59  ;;  %1398 = vmax.xlane.f32.xlu1 %v1397_v21  ;;  %v5683_v21 = vpop.permute.xlu0 %674 }
 0x20b   : > { %v1206_v5 = vpop.f32.mrf.mxu0  ;;  %v1736_v58 = vpop.f32.mrf.mxu1  ;;  %7380 = vst [vmem:[#allocation82_spill] sm:$0xff] %v5683_v21 }
 0x20c   : > { %v1207_v41 = vadd.f32 %v1206_v5, %v5563_v0  ;;  %v1737_v27 = vadd.f32 %v1736_v58, %v5563_v0  ;;  %v1930_v11 = vmax.f32 %v1855_v2, %v1856_v30  ;;  %v1400_v18 = vmax.f32 %v1325_v28, %v1326_v26 }
 0x20d   : > { %v1208_v7 = vpop.f32.mrf.mxu0  ;;  %v1738_v43 = vpop.f32.mrf.mxu1  ;;  %v1327_v8 = vmax.f32 %v1205_v31, 0.0  ;;  %v1857_v12 = vmax.f32 %v1735_v39, 0.0 }
 0x20e   : > { %v1328_v24 = vmax.f32 %v1207_v41, 0.0  ;;  %v1858_v60 = vmax.f32 %v1737_v27, 0.0  ;;  %v1209_v19 = vadd.f32 %v1208_v7, %v5558_v1  ;;  %v1739_v34 = vadd.f32 %v1738_v43, %v5558_v1  ;;  %1931 = vmax.xlane.f32.xlu0 %v1930_v11  ;;  %1401 = vmax.xlane.f32.xlu1 %v1400_v18 }
 0x20f   : > { %v1210_v33 = vpop.f32.mrf.mxu0  ;;  %v1740_v59 = vpop.f32.mrf.mxu1 }
 0x210   : > { %v1211_v5 = vadd.f32 %v1210_v33, %v5558_v1  ;;  %v1741_v58 = vadd.f32 %v1740_v59, %v5558_v1  ;;  %v1933_v28 = vmax.f32 %v1857_v12, %v1858_v60  ;;  %v1403_v2 = vmax.f32 %v1327_v8, %v1328_v24  ;;  %v5691_v8 = vpop.permute.xlu0 %669 }
 0x211   : > { %v1214_v30 = vpop.f32.mrf.mxu0  ;;  %v1744_v26 = vpop.f32.mrf.mxu1  ;;  %v1329_v41 = vmax.f32 %v1209_v19, 0.0  ;;  %v1859_v27 = vmax.f32 %v1739_v34, 0.0  ;;  %7381 = vst [vmem:[#allocation83_spill] sm:$0xff] %v5691_v8 }
 0x212   : > { %v1330_v31 = vmax.f32 %v1211_v5, 0.0  ;;  %v1860_v39 = vmax.f32 %v1741_v58, 0.0  ;;  %v1215_v7 = vadd.f32 %v1214_v30, %v5549_v63  ;;  %v1745_v43 = vadd.f32 %v1744_v26, %v5549_v63  ;;  %1934 = vmax.xlane.f32.xlu0 %v1933_v28  ;;  %1404 = vmax.xlane.f32.xlu1 %v1403_v2 }
 0x213   : > { %v1216_v11 = vpop.f32.mrf.mxu0  ;;  %v1746_v18 = vpop.f32.mrf.mxu1 }
 0x214   : > { %v1217_v33 = vadd.f32 %v1216_v11, %v5549_v63  ;;  %v1747_v59 = vadd.f32 %v1746_v18, %v5549_v63  ;;  %v1936_v60 = vmax.f32 %v1859_v27, %v1860_v39  ;;  %v1406_v24 = vmax.f32 %v1329_v41, %v1330_v31 }
 0x215   : > { %v1218_v1 = vpop.f32.mrf.mxu0  ;;  %v1748_v0 = vpop.f32.mrf.mxu1  ;;  %v1331_v34 = vmax.f32 %v1215_v7, 0.0  ;;  %v1861_v5 = vmax.f32 %v1745_v43, 0.0 }
 0x216   : > { %v1332_v12 = vmax.f32 %v1217_v33, 0.0  ;;  %v1862_v19 = vmax.f32 %v1747_v59, 0.0  ;;  %v1219_v58 = vadd.f32 %v1218_v1, %v5587_v47  ;;  %1937 = vmax.xlane.f32.xlu0 %v1936_v60  ;;  %1407 = vmax.xlane.f32.xlu1 %v1406_v24  ;;  %v1749_v7 = vadd.f32 %v1748_v0, %v5587_v47  ;;  %v5705_v33 = vpop.permute.xlu0 %664 }
 0x217   : > { %v1220_v30 = vpop.f32.mrf.mxu0  ;;  %v1750_v26 = vpop.f32.mrf.mxu1  ;;  %7382 = vst [vmem:[#allocation84_spill] sm:$0xff] %v5705_v33 }
 0x218   : > { %v1221_v28 = vadd.f32 %v1220_v30, %v5587_v47  ;;  %v1751_v2 = vadd.f32 %v1750_v26, %v5587_v47  ;;  %v1939_v31 = vmax.f32 %v1861_v5, %v1862_v19  ;;  %v1409_v41 = vmax.f32 %v1331_v34, %v1332_v12 }
 0x219   : > { %v5696_v11 = vpop.f32.mrf.mxu0  ;;  %v5698_v39 = vpop.f32.mrf.mxu1  ;;  %v1333_v18 = vmax.f32 %v1219_v58, 0.0  ;;  %v1863_v19 = vmax.f32 %v1749_v7, 0.0 }
 0x21a   : > { %v1334_v27 = vmax.f32 %v1221_v28, 0.0  ;;  %1940 = vmax.xlane.f32.xlu0 %v1939_v31  ;;  %1410 = vmax.xlane.f32.xlu1 %v1409_v41  ;;  %v1864_v59 = vmax.f32 %v1751_v2, 0.0 }
 0x21b   : > { %v5701_v1 = vpop.f32.mrf.mxu0  ;;  %v5703_v43 = vpop.f32.mrf.mxu1 }
 0x21c   : > { %v1412_v30 = vmax.f32 %v1333_v18, %v1334_v27  ;;  %v1942_v41 = vmax.f32 %v1863_v19, %v1864_v59 }
 0x21d   : > { %v1228_v60 = vpop.f32.mrf.mxu0  ;;  %v1758_v24 = vpop.f32.mrf.mxu1 }
 0x21e   : > { %v1229_v26 = vadd.f32 %v1228_v60, %v5705_v33  ;;  %v1759_v12 = vadd.f32 %v1758_v24, %v5705_v33  ;;  %1413 = vmax.xlane.f32.xlu0 %v1412_v30 }
 0x21f   : > { %v1230_v34 = vpop.f32.mrf.mxu0  ;;  %v1760_v0 = vpop.f32.mrf.mxu1 }
 0x220   : > { %v1231_v5 = vadd.f32 %v1230_v34, %v5705_v33  ;;  %v1761_v58 = vadd.f32 %v1760_v0, %v5705_v33  ;;  %v1337_v47 = vmax.f32 %v1229_v26, 0.0  ;;  %v1867_v2 = vmax.f32 %v1759_v12, 0.0 }
 0x221   : > { %v1234_v28 = vpop.f32.mrf.mxu0  ;;  %v1764_v31 = vpop.f32.mrf.mxu1 }
 0x222   : > { %v1338_v63 = vmax.f32 %v1231_v5, 0.0  ;;  %v1868_v10 = vmax.f32 %v1761_v58, 0.0  ;;  %v1235_v27 = vadd.f32 %v1234_v28, %v5691_v8  ;;  %v1765_v18 = vadd.f32 %v1764_v31, %v5691_v8  ;;  %1943 = vmax.xlane.f32.xlu0 %v1942_v41 }
 0x223   : > { %v1236_v7 = vpop.f32.mrf.mxu0  ;;  %v1766_v60 = vpop.f32.mrf.mxu1 }
 0x224   : > { %v5713_v24 = vmax.f32 %v1337_v47, %v1338_v63  ;;  %v5715_v30 = vmax.f32 %v1867_v2, %v1868_v10  ;;  %v1237_v34 = vadd.f32 %v1236_v7, %v5691_v8  ;;  %v1767_v0 = vadd.f32 %v1766_v60, %v5691_v8 }
 0x225   : > { %v5719_v59 = vpop.f32.mrf.mxu0  ;;  %v5721_v26 = vpop.f32.mrf.mxu1  ;;  %v1339_v12 = vmax.f32 %v1235_v27, 0.0  ;;  %v1869_v19 = vmax.f32 %v1765_v18, 0.0 }
 0x226   : > { %v1340_v5 = vmax.f32 %v1237_v34, 0.0  ;;  %v1870_v58 = vmax.f32 %v1767_v0, 0.0 }
 0x227   : > { %v5723_v28 = vpop.f32.mrf.mxu0  ;;  %v5725_v31 = vpop.f32.mrf.mxu1 }
 0x228   : > { %v5727_v63 = vmax.f32 %v1339_v12, %v1340_v5  ;;  %v5729_v10 = vmax.f32 %v1869_v19, %v1870_v58 }
 0x229   : > { %v1244_v47 = vpop.f32.mrf.mxu0  ;;  %v1774_v41 = vpop.f32.mrf.mxu1 }
 0x22a   : > { %v1245_v2 = vadd.f32 %v1244_v47, %v5675_v45  ;;  %v1775_v7 = vadd.f32 %v1774_v41, %v5675_v45 }
 0x22b   : > { %v1246_v60 = vpop.f32.mrf.mxu0  ;;  %v1776_v8 = vpop.f32.mrf.mxu1 }
 0x22c   : > { %v1247_v27 = vadd.f32 %v1246_v60, %v5675_v45  ;;  %v1777_v18 = vadd.f32 %v1776_v8, %v5675_v45  ;;  %v1343_v33 = vmax.f32 %v1245_v2, 0.0  ;;  %v1873_v5 = vmax.f32 %v1775_v7, 0.0 }
 0x22d   : > { %v1248_v34 = vpop.f32.mrf.mxu0  ;;  %v1778_v0 = vpop.f32.mrf.mxu1 }
 0x22e   : > { %v1249_v12 = vadd.f32 %v1248_v34, %v5667_v61  ;;  %v1344_v19 = vmax.f32 %v1247_v27, 0.0  ;;  %v1874_v58 = vmax.f32 %v1777_v18, 0.0  ;;  %v1779_v35 = vadd.f32 %v1778_v0, %v5667_v61 }
 0x22f   : > { %v1250_v46 = vpop.f32.mrf.mxu0  ;;  %v1780_v47 = vpop.f32.mrf.mxu1 }
 0x230   : > { %v1251_v41 = vadd.f32 %v1250_v46, %v5667_v61  ;;  %v1781_v48 = vadd.f32 %v1780_v47, %v5667_v61  ;;  %v1957_v38 = vmax.f32 %v1873_v5, %v1874_v58  ;;  %v1427_v8 = vmax.f32 %v1343_v33, %v1344_v19 }
 0x231   : > { %v1254_v50 = vpop.f32.mrf.mxu0  ;;  %v1784_v60 = vpop.f32.mrf.mxu1  ;;  %v1345_v45 = vmax.f32 %v1249_v12, 0.0  ;;  %v1875_v7 = vmax.f32 %v1779_v35, 0.0 }
 0x232   : > { %v1346_v40 = vmax.f32 %v1251_v41, 0.0  ;;  %v1876_v2 = vmax.f32 %v1781_v48, 0.0  ;;  %v1255_v34 = vadd.f32 %v1254_v50, %v5659_v3  ;;  %v1785_v27 = vadd.f32 %v1784_v60, %v5659_v3  ;;  %1958 = vmax.xlane.f32.xlu0 %v1957_v38  ;;  %1428 = vmax.xlane.f32.xlu1 %v1427_v8 }
 0x233   : > { %v1256_v18 = vpop.f32.mrf.mxu0  ;;  %v1786_v0 = vpop.f32.mrf.mxu1 }
 0x234   : > { %v1430_v36 = vmax.f32 %v1345_v45, %v1346_v40  ;;  %v1257_v46 = vadd.f32 %v1256_v18, %v5659_v3  ;;  %v1787_v47 = vadd.f32 %v1786_v0, %v5659_v3  ;;  %v1960_v33 = vmax.f32 %v1875_v7, %v1876_v2 }
 0x235   : > { %v1258_v61 = vpop.f32.mrf.mxu0  ;;  %v1788_v5 = vpop.f32.mrf.mxu1  ;;  %v1347_v12 = vmax.f32 %v1255_v34, 0.0  ;;  %v1877_v50 = vmax.f32 %v1785_v27, 0.0 }
 0x236   : > { %v1348_v19 = vmax.f32 %v1257_v46, 0.0  ;;  %v1259_v48 = vadd.f32 %v1258_v61, %v5651_v44  ;;  %v1878_v35 = vmax.f32 %v1787_v47, 0.0  ;;  %v1789_v58 = vadd.f32 %v1788_v5, %v5651_v44  ;;  %1961 = vmax.xlane.f32.xlu0 %v1960_v33  ;;  %1431 = vmax.xlane.f32.xlu1 %v1430_v36 }
 0x237   : > { %v1260_v38 = vpop.f32.mrf.mxu0  ;;  %v1790_v41 = vpop.f32.mrf.mxu1 }
 0x238   : > { %v1433_v40 = vmax.f32 %v1347_v12, %v1348_v19  ;;  %v1261_v45 = vadd.f32 %v1260_v38, %v5651_v44  ;;  %v1791_v60 = vadd.f32 %v1790_v41, %v5651_v44  ;;  %v1963_v2 = vmax.f32 %v1877_v50, %v1878_v35 }
 0x239   : > { %v1264_v8 = vpop.f32.mrf.mxu0  ;;  %v1794_v18 = vpop.f32.mrf.mxu1  ;;  %v1349_v34 = vmax.f32 %v1259_v48, 0.0  ;;  %v1879_v27 = vmax.f32 %v1789_v58, 0.0 }
 0x23a   : > { %v1350_v7 = vmax.f32 %v1261_v45, 0.0  ;;  %v1265_v61 = vadd.f32 %v1264_v8, %v5643_v23  ;;  %v1880_v0 = vmax.f32 %v1791_v60, 0.0  ;;  %v1795_v46 = vadd.f32 %v1794_v18, %v5643_v23  ;;  %1964 = vmax.xlane.f32.xlu0 %v1963_v2  ;;  %1434 = vmax.xlane.f32.xlu1 %v1433_v40 }
 0x23b   : > { %v1266_v36 = vpop.f32.mrf.mxu0  ;;  %v1796_v47 = vpop.f32.mrf.mxu1 }
 0x23c   : > { %v1436_v5 = vmax.f32 %v1349_v34, %v1350_v7  ;;  %v1267_v33 = vadd.f32 %v1266_v36, %v5643_v23  ;;  %v1797_v12 = vadd.f32 %v1796_v47, %v5643_v23  ;;  %v1966_v50 = vmax.f32 %v1879_v27, %v1880_v0 }
 0x23d   : > { %v1268_v19 = vpop.f32.mrf.mxu0  ;;  %v1798_v38 = vpop.f32.mrf.mxu1  ;;  %v1351_v48 = vmax.f32 %v1265_v61, 0.0  ;;  %v1881_v58 = vmax.f32 %v1795_v46, 0.0 }
 0x23e   : > { %v1352_v35 = vmax.f32 %v1267_v33, 0.0  ;;  %v1269_v41 = vadd.f32 %v1268_v19, %v5633_v25  ;;  %v1882_v45 = vmax.f32 %v1797_v12, 0.0  ;;  %v1799_v60 = vadd.f32 %v1798_v38, %v5633_v25  ;;  %1967 = vmax.xlane.f32.xlu0 %v1966_v50  ;;  %1437 = vmax.xlane.f32.xlu1 %v1436_v5 }
 0x23f   : > { %v1270_v40 = vpop.f32.mrf.mxu0  ;;  %v1800_v8 = vpop.f32.mrf.mxu1 }
 0x240   : > { %v1439_v18 = vmax.f32 %v1351_v48, %v1352_v35  ;;  %v1271_v2 = vadd.f32 %v1270_v40, %v5633_v25  ;;  %v1801_v34 = vadd.f32 %v1800_v8, %v5633_v25  ;;  %v1969_v27 = vmax.f32 %v1881_v58, %v1882_v45 }
 0x241   : > { %v1274_v7 = vpop.f32.mrf.mxu0  ;;  %v1804_v36 = vpop.f32.mrf.mxu1  ;;  %v1353_v61 = vmax.f32 %v1269_v41, 0.0  ;;  %v1883_v46 = vmax.f32 %v1799_v60, 0.0 }
 0x242   : > { %v1354_v0 = vmax.f32 %v1271_v2, 0.0  ;;  %v1275_v47 = vadd.f32 %v1274_v7, %v5623_v16  ;;  %v1884_v33 = vmax.f32 %v1801_v34, 0.0  ;;  %v1805_v12 = vadd.f32 %v1804_v36, %v5623_v16  ;;  %1970 = vmax.xlane.f32.xlu0 %v1969_v27  ;;  %1440 = vmax.xlane.f32.xlu1 %v1439_v18 }
 0x243   : > { %v1276_v5 = vpop.f32.mrf.mxu0  ;;  %v1806_v19 = vpop.f32.mrf.mxu1 }
 0x244   : > { %v1442_v38 = vmax.f32 %v1353_v61, %v1354_v0  ;;  %v1277_v50 = vadd.f32 %v1276_v5, %v5623_v16  ;;  %v1807_v48 = vadd.f32 %v1806_v19, %v5623_v16  ;;  %v1972_v58 = vmax.f32 %v1883_v46, %v1884_v33 }
 0x245   : > { %v1278_v35 = vpop.f32.mrf.mxu0  ;;  %v1808_v40 = vpop.f32.mrf.mxu1  ;;  %v1355_v41 = vmax.f32 %v1275_v47, 0.0  ;;  %v1885_v60 = vmax.f32 %v1805_v12, 0.0 }
 0x246   : > { %v1356_v45 = vmax.f32 %v1277_v50, 0.0  ;;  %v1279_v8 = vadd.f32 %v1278_v35, %v5608_v29  ;;  %v1886_v2 = vmax.f32 %v1807_v48, 0.0  ;;  %v1809_v34 = vadd.f32 %v1808_v40, %v5608_v29  ;;  %1973 = vmax.xlane.f32.xlu0 %v1972_v58  ;;  %1443 = vmax.xlane.f32.xlu1 %v1442_v38 }
 0x247   : > { %v1280_v18 = vpop.f32.mrf.mxu0  ;;  %v1810_v7 = vpop.f32.mrf.mxu1 }
 0x248   : > { %v1445_v36 = vmax.f32 %v1355_v41, %v1356_v45  ;;  %v1281_v27 = vadd.f32 %v1280_v18, %v5608_v29  ;;  %v1811_v61 = vadd.f32 %v1810_v7, %v5608_v29  ;;  %v1975_v46 = vmax.f32 %v1885_v60, %v1886_v2 }
 0x249   : > { %v1284_v0 = vpop.f32.mrf.mxu0  ;;  %v1814_v5 = vpop.f32.mrf.mxu1  ;;  %v1357_v47 = vmax.f32 %v1279_v8, 0.0  ;;  %v1887_v12 = vmax.f32 %v1809_v34, 0.0 }
 0x24a   : > { %v1358_v33 = vmax.f32 %v1281_v27, 0.0  ;;  %v1285_v19 = vadd.f32 %v1284_v0, %v5597_v22  ;;  %v1888_v50 = vmax.f32 %v1811_v61, 0.0  ;;  %v1815_v48 = vadd.f32 %v1814_v5, %v5597_v22  ;;  %1976 = vmax.xlane.f32.xlu0 %v1975_v46  ;;  %1446 = vmax.xlane.f32.xlu1 %v1445_v36 }
 0x24b   : > { %v1286_v38 = vpop.f32.mrf.mxu0  ;;  %v1816_v35 = vpop.f32.mrf.mxu1 }
 0x24c   : > { %v1448_v40 = vmax.f32 %v1357_v47, %v1358_v33  ;;  %v1287_v58 = vadd.f32 %v1286_v38, %v5597_v22  ;;  %v1817_v41 = vadd.f32 %v1816_v35, %v5597_v22  ;;  %v1978_v60 = vmax.f32 %v1887_v12, %v1888_v50 }
 0x24d   : > { %v1288_v45 = vpop.f32.mrf.mxu0  ;;  %v1818_v18 = vpop.f32.mrf.mxu1  ;;  %v1359_v8 = vmax.f32 %v1285_v19, 0.0  ;;  %v1889_v34 = vmax.f32 %v1815_v48, 0.0 }
 0x24e   : > { %v1360_v2 = vmax.f32 %v1287_v58, 0.0  ;;  %v1289_v7 = vadd.f32 %v1288_v45, %v5591_v54  ;;  %v1890_v27 = vmax.f32 %v1817_v41, 0.0  ;;  %v1819_v61 = vadd.f32 %v1818_v18, %v5591_v54  ;;  %1979 = vmax.xlane.f32.xlu0 %v1978_v60  ;;  %1449 = vmax.xlane.f32.xlu1 %v1448_v40 }
 0x24f   : > { %v1290_v36 = vpop.f32.mrf.mxu0  ;;  %v1820_v0 = vpop.f32.mrf.mxu1 }
 0x250   : > { %v1451_v5 = vmax.f32 %v1359_v8, %v1360_v2  ;;  %v1291_v46 = vadd.f32 %v1290_v36, %v5591_v54  ;;  %v1821_v47 = vadd.f32 %v1820_v0, %v5591_v54  ;;  %v1981_v12 = vmax.f32 %v1889_v34, %v1890_v27 }
 0x251   : > { %v1294_v33 = vpop.f32.mrf.mxu0  ;;  %v1824_v38 = vpop.f32.mrf.mxu1  ;;  %v1361_v19 = vmax.f32 %v1289_v7, 0.0  ;;  %v1891_v48 = vmax.f32 %v1819_v61, 0.0 }
 0x252   : > { %v1362_v50 = vmax.f32 %v1291_v46, 0.0  ;;  %v1295_v35 = vadd.f32 %v1294_v33, %v5543_v51  ;;  %v1892_v58 = vmax.f32 %v1821_v47, 0.0  ;;  %v1825_v41 = vadd.f32 %v1824_v38, %v5543_v51  ;;  %1982 = vmax.xlane.f32.xlu0 %v1981_v12  ;;  %1452 = vmax.xlane.f32.xlu1 %v1451_v5 }
 0x253   : > { %v1296_v40 = vpop.f32.mrf.mxu0  ;;  %v1826_v45 = vpop.f32.mrf.mxu1 }
 0x254   : > { %v1454_v18 = vmax.f32 %v1361_v19, %v1362_v50  ;;  %v1297_v60 = vadd.f32 %v1296_v40, %v5543_v51  ;;  %v1984_v8 = vmax.f32 %v1891_v48, %v1892_v58  ;;  %v1827_v2 = vadd.f32 %v1826_v45, %v5543_v51 }
 0x255   : > { %v1298_v36 = vpop.f32.mrf.mxu0  ;;  %v1828_v34 = vpop.f32.mrf.mxu1  ;;  %v1363_v7 = vmax.f32 %v1295_v35, 0.0  ;;  %v1893_v61 = vmax.f32 %v1825_v41, 0.0  ;;  %v1241_v19 = vadd.f32 %v5723_v28, %v5683_v21  ;;  %v1771_v50 = vadd.f32 %v5725_v31, %v5683_v21 }
 0x256   : > { %v1364_v27 = vmax.f32 %v1297_v60, 0.0  ;;  %v1299_v0 = vadd.f32 %v1298_v36, %v5534_v62  ;;  %v1894_v46 = vmax.f32 %v1827_v2, 0.0  ;;  %v1829_v47 = vadd.f32 %v1828_v34, %v5534_v62  ;;  %1985 = vmax.xlane.f32.xlu0 %v1984_v8  ;;  %1455 = vmax.xlane.f32.xlu1 %v1454_v18 }
 0x257   : > { %v1300_v5 = vpop.f32.mrf.mxu0  ;;  %v1830_v33 = vpop.f32.mrf.mxu1  ;;  %v1239_v40 = vadd.f32 %v5719_v59, %v5683_v21  ;;  %v1769_v45 = vadd.f32 %v5721_v26, %v5683_v21  ;;  %v1161_v28 = vadd.f32 %v5626_v17, %v5583_v14  ;;  %v1342_v31 = vmax.f32 %v1241_v19, 0.0 }
 0x258   : > { %v1457_v38 = vmax.f32 %v1363_v7, %v1364_v27  ;;  %v1301_v12 = vadd.f32 %v1300_v5, %v5534_v62  ;;  %v1987_v35 = vmax.f32 %v1893_v61, %v1894_v46  ;;  %v1831_v48 = vadd.f32 %v1830_v33, %v5534_v62 }
 0x259   : > { %v1365_v58 = vmax.f32 %v1299_v0, 0.0  ;;  %v1895_v18 = vmax.f32 %v1829_v47, 0.0  ;;  %v1872_v2 = vmax.f32 %v1771_v50, 0.0  ;;  %v1159_v34 = vadd.f32 %v5621_v9, %v5583_v14 }
 0x25a   : > { %v1366_v41 = vmax.f32 %v1301_v12, 0.0  ;;  %v1896_v60 = vmax.f32 %v1831_v48, 0.0  ;;  %1988 = vmax.xlane.f32.xlu0 %v1987_v35  ;;  %1458 = vmax.xlane.f32.xlu1 %v1457_v38  ;;  %v1341_v7 = vmax.f32 %v1239_v40, 0.0  ;;  %v1871_v27 = vmax.f32 %v1769_v45, 0.0 }
 0x25b   : > { %v1310_v59 = vmax.f32 %v1161_v28, 0.0  ;;  %v1309_v61 = vmax.f32 %v1159_v34, 0.0  ;;  %v1687_v46 = vadd.f32 %v5616_v53, %v5585_v4  ;;  %v1685_v47 = vadd.f32 %v5613_v57, %v5585_v4  ;;  %v5803_v57 = vpop.permute.xlu0 %659 }
 0x25c   : > { %v1460_v8 = vmax.f32 %v1365_v58, %v1366_v41  ;;  %v1990_v36 = vmax.f32 %v1895_v18, %v1896_v60  ;;  %v1424_v26 = vmax.f32 %v1341_v7, %v1342_v31  ;;  %v1954_v0 = vmax.f32 %v1871_v27, %v1872_v2  ;;  %7383 = vst [vmem:[#allocation85_spill] sm:$0xff] %v5803_v57  ;;  %v770_v60 = vld [vmem:[#allocation4 + $0x8] sm:$0xff] }
 0x25d   : > { %v1376_v17 = vmax.f32 %v1309_v61, %v1310_v59  ;;  %v1838_v9 = vmax.f32 %v1687_v46, 0.0  ;;  %v1837_v5 = vmax.f32 %v1685_v47, 0.0  ;;  %v1151_v33 = vadd.f32 %v5606_v56, %v5589_v52  ;;  %2122 = vmatprep.mubr.f32.mxu0 %v770_v60  ;;  %v4733_v61 = vld [vmem:[#allocation2 + $0x38] sm:$0xff]  ;;  %v4734_v46 = vld [vmem:[#allocation2 + $0x30] sm:$0xff] }
 0x25e   : > { %1461 = vmax.xlane.f32.xlu0 %v1460_v8  ;;  %1991 = vmax.xlane.f32.xlu1 %v1990_v36  ;;  %v1149_v53 = vadd.f32 %v5603_v6, %v5589_v52  ;;  %v1227_v12 = vadd.f32 %v5701_v1, %v5803_v57  ;;  %v1225_v56 = vadd.f32 %v5696_v11, %v5803_v57 }
 0x25f   : > { %v1903_v38 = vmax.f32 %v1837_v5, %v1838_v9  ;;  %v1755_v19 = vadd.f32 %v5698_v39, %v5803_v57  ;;  %v1677_v6 = vadd.f32 %v5600_v13, %v5593_v37  ;;  %v4735_v9 = vld [vmem:[#allocation2 + $0x28] sm:$0xff]  ;;  %v4736_v5 = vld [vmem:[#allocation2 + $0x20] sm:$0xff] }
 0x260   : > { %v1335_v35 = vmax.f32 %v1225_v56, 0.0 }
 0x261   : > { %v1865_v48 = vmax.f32 %v1755_v19, 0.0  ;;  %v1834_v11 = vmax.f32 %v1677_v6, 0.0  ;;  %v5861_v19 = vld [vmem:[#allocation2 + $0x8] sm:$0xff] }
 0x262   : > { %1955 = vmax.xlane.f32.xlu0 %v1954_v0  ;;  %1425 = vmax.xlane.f32.xlu1 %v1424_v26  ;;  %v4871_v0 = vmov 5  }
 0x263   : > { %4690 = vset.pattern.permute.xlu1 %v4871_v0  ;;  %4691 = vset.pattern.permute.xlu0 %v4871_v0 }
 0x266   : > { %1907 = vmax.xlane.f32.xlu0 %v5637_v42  ;;  %1377 = vmax.xlane.f32.xlu1 %v1376_v17  ;;  %v1306_v42 = vmax.f32 %v1151_v33, 0.0 }
 0x26a   : > { %1952 = vmax.xlane.f32.xlu0 %v5729_v10  ;;  %1422 = vmax.xlane.f32.xlu1 %v5727_v63  ;;  %v1757_v10 = vadd.f32 %v5703_v43, %v5803_v57  ;;  %v1305_v63 = vmax.f32 %v1149_v53, 0.0  ;;  %v1675_v43 = vadd.f32 %v5595_v49, %v5593_v37  ;;  %v4737_v53 = vld [vmem:[#allocation2 + $0x18] sm:$0xff]  ;;  %v7447_v37 = vld [vmem:[#allocation13_spill] sm:$0xff] }
 0x26c   : > { %v1866_v50 = vmax.f32 %v1757_v10, 0.0  ;;  %v1370_v1 = vmax.f32 %v1305_v63, %v1306_v42  ;;  %v4738_v10 = vld [vmem:[#allocation2 + $0x10] sm:$0xff] }
 0x26e   : > { %1904 = vmax.xlane.f32.xlu0 %v1903_v38  ;;  %1374 = vmax.xlane.f32.xlu1 %v5628_v15  ;;  %v1336_v15 = vmax.f32 %v1227_v12, 0.0  ;;  %v1945_v39 = vmax.f32 %v1865_v48, %v1866_v50  ;;  %v5868_v50 = vld [vmem:[#allocation2] sm:$0xff] }
 0x270   : > { %v1415_v58 = vmax.f32 %v1335_v35, %v1336_v15 }
 0x272   : > { %1949 = vmax.xlane.f32.xlu0 %v5715_v30  ;;  %1419 = vmax.xlane.f32.xlu1 %v5713_v24  ;;  %v1833_v30 = vmax.f32 %v1675_v43, 0.0 }
 0x274   : > { %v1897_v41 = vmax.f32 %v1833_v30, %v1834_v11 }
 0x276   : > { %1901 = vmax.xlane.f32.xlu0 %v5619_v55  ;;  %1371 = vmax.xlane.f32.xlu1 %v1370_v1 }
 0x27a   : > { %1946 = vmax.xlane.f32.xlu0 %v1945_v39  ;;  %1416 = vmax.xlane.f32.xlu1 %v1415_v58 }
 0x27b   : > { %v5820_v24 = vpop.xlane.xlu1 %1380  ;;  %v5822_v13 = vpop.xlane.xlu0 %1910 }
 0x27e   : > { %1898 = vmax.xlane.f32.xlu0 %v1897_v41  ;;  %1368 = vmax.xlane.f32.xlu1 %v5610_v32 }
 0x27f   : > { %v5825_v49 = vpop.xlane.xlu0 %1913  ;;  %v5827_v40 = vpop.xlane.xlu1 %1383 }
 0x283   : > { %v5829_v55 = vpop.xlane.xlu0 %1916  ;;  %v5831_v45 = vpop.xlane.xlu1 %1386 }
 0x287   : > { %v5833_v18 = vpop.xlane.xlu0 %1919  ;;  %v5837_v28 = vpop.xlane.xlu1 %1389 }
 0x28b   : > { %v5835_v8 = vpop.xlane.xlu0 %1922  ;;  %v5841_v2 = vpop.xlane.xlu1 %1392 }
 0x28f   : > { %v5839_v31 = vpop.xlane.xlu0 %1925  ;;  %v5845_v36 = vpop.xlane.xlu1 %1395  ;;  %2055 = vperm.xlu1 %4690, %v4733_v61  }
 0x293   : > { %v5843_v32 = vpop.xlane.xlu0 %1928  ;;  %v5849_v7 = vpop.xlane.xlu1 %1398  ;;  %2047 = vperm.xlu1 %4690, %v4735_v9  }
 0x294   : > { %2051 = vperm.xlu0 %4691, %v4734_v46  }
 0x297   : > { %v5847_v34 = vpop.xlane.xlu0 %1931  ;;  %v5853_v59 = vpop.xlane.xlu1 %1401  ;;  %2043 = vperm.xlu1 %4690, %v4736_v5  }
 0x29b   : > { %v5851_v27 = vpop.xlane.xlu0 %1934  ;;  %v1405_v17 = vpop.xlane.xlu1 %1404  ;;  %2039 = vperm.xlu1 %4690, %v4737_v53  }
 0x29f   : > { %v5855_v26 = vpop.xlane.xlu0 %1937  ;;  %v1408_v33 = vpop.xlane.xlu1 %1407  ;;  %2035 = vperm.xlu1 %4690, %v4738_v10  }
 0x2a0   : > { %v2007_v3 = vsel %vm1993_vm1, %v1408_v33, %v5855_v26  ;;  %v2001_v33 = vsel %vm1993_vm1, %v5837_v28, %v5833_v18  ;;  %v1999_v18 = vsel %vm1993_vm1, %v5827_v40, %v5825_v49 }
 0x2a3   : > { %v1941_v47 = vpop.xlane.xlu0 %1940  ;;  %v1411_v42 = vpop.xlane.xlu1 %1410  ;;  %2031 = vperm.xlu1 %4690, %v5861_v19  }
 0x2a4   : > { %v2008_v16 = vsel %vm1993_vm1, %v1411_v42, %v1941_v47 }
 0x2a7   : > { %v1414_v38 = vpop.xlane.xlu0 %1413  ;;  %2027 = vperm.xlu1 %4690, %v5868_v50  }
 0x2ab   : > { %v1944_v12 = vpop.xlane.xlu0 %1943 }
 0x2ac   : > { %v2009_v22 = vsel %vm1993_vm1, %v1414_v38, %v1944_v12 }
 0x2bb   : > { %v5857_v63 = vpop.xlane.xlu1 %1428  ;;  %v5859_v56 = vpop.xlane.xlu0 %1958 }
 0x2bc   : > { %v2014_v28 = vsel %vm1993_vm1, %v5857_v63, %v5859_v56 }
 0x2bf   : > { %v5864_v6 = vpop.xlane.xlu1 %1431  ;;  %v5866_v15 = vpop.xlane.xlu0 %1961 }
 0x2c0   : > { %v2015_v38 = vsel %vm1993_vm1, %v5864_v6, %v5866_v15 }
 0x2c3   : > { %v5871_v1 = vpop.xlane.xlu1 %1434  ;;  %v5873_v43 = vpop.xlane.xlu0 %1964 }
 0x2c7   : > { %v1438_v35 = vpop.xlane.xlu1 %1437  ;;  %v1968_v48 = vpop.xlane.xlu0 %1967 }
 0x2cb   : > { %v1441_v11 = vpop.xlane.xlu1 %1440  ;;  %v1971_v39 = vpop.xlane.xlu0 %1970 }
 0x2cf   : > { %v1444_v58 = vpop.xlane.xlu1 %1443  ;;  %v1974_v30 = vpop.xlane.xlu0 %1973 }
 0x2d0   : > { %v2019_v26 = vsel %vm1993_vm1, %v1444_v58, %v1974_v30  ;;  %v776_v58 = vld [vmem:[#allocation4 + $0x38] sm:$0xff]  ;;  %v775_v30 = vld [vmem:[#allocation4 + $0x30] sm:$0xff] }
 0x2d3   : > { %v1447_v41 = vpop.xlane.xlu1 %1446  ;;  %v1977_v60 = vpop.xlane.xlu0 %1976 }
 0x2d7   : > { %v1450_v0 = vpop.xlane.xlu1 %1449  ;;  %v1980_v61 = vpop.xlane.xlu0 %1979 }
 0x2db   : > { %v1453_v46 = vpop.xlane.xlu1 %1452  ;;  %v1983_v9 = vpop.xlane.xlu0 %1982 }
 0x2df   : > { %v1456_v5 = vpop.xlane.xlu1 %1455  ;;  %v1986_v53 = vpop.xlane.xlu0 %1985 }
 0x2e0   : > { %v2023_v44 = vsel %vm1993_vm1, %v1456_v5, %v1986_v53  ;;  %v784_v5 = vld [vmem:[#allocation4 + $0x78] sm:$0xff]  ;;  %v783_v53 = vld [vmem:[#allocation4 + $0x70] sm:$0xff] }
 0x2e3   : > { %v1459_v10 = vpop.xlane.xlu1 %1458  ;;  %v1989_v21 = vpop.xlane.xlu0 %1988 }
 0x2e4   : > { %v2024_v29 = vsel %vm1993_vm1, %v1459_v10, %v1989_v21  ;;  %v4872_v10 = vmov 6  }
 0x2e5   : > { %4692 = vset.pattern.permute.xlu1 %v4872_v10 }
 0x2e6   : > { %2172 = vperm.xlu1 %4692, %v5868_v50  }
 0x2e7   : > { %v1992_v62 = vpop.xlane.xlu1 %1991  ;;  %v1462_v51 = vpop.xlane.xlu0 %1461 }
 0x2e8   : > { %v2025_v54 = vsel %vm1993_vm1, %v1462_v51, %v1992_v62  ;;  %v2022_v62 = vsel %vm1993_vm1, %v1453_v46, %v1983_v9  ;;  %v2006_v51 = vsel %vm1993_vm1, %v1405_v17, %v5851_v27  ;;  %v2003_v17 = vsel %vm1993_vm1, %v5845_v36, %v5839_v31  ;;  %v782_v46 = vld [vmem:[#allocation4 + $0x68] sm:$0xff]  ;;  %v781_v9 = vld [vmem:[#allocation4 + $0x60] sm:$0xff] }
 0x2e9   : > { %4425 = vmatprep.subr.mxu0 %v2025_v54  ;;  %v2016_v31 = vsel %vm1993_vm1, %v5871_v1, %v5873_v43  ;;  %v769_v1 = vld [vmem:[#allocation4] sm:$0xff] }
 0x2ea   : > { %4426 = vmatpush3.msra.mxu0 %v2009_v22  ;;  %2176 = vperm.xlu1 %4692, %v5861_v19  }
 0x2eb   : > { %v1426_v25 = vpop.xlane.xlu1 %1425  ;;  %4427 = vmatprep.subr.mxu0 %v2024_v29  ;;  %v1956_v23 = vpop.xlane.xlu0 %1955  ;;  %v2021_v29 = vsel %vm1993_vm1, %v1450_v0, %v1980_v61  ;;  %v780_v0 = vld [vmem:[#allocation4 + $0x58] sm:$0xff]  ;;  %v779_v61 = vld [vmem:[#allocation4 + $0x50] sm:$0xff] }
 0x2ec   : > { %4428 = vmatpush3.msra.mxu0 %v2008_v16  ;;  %v2005_v16 = vsel %vm1993_vm1, %v5853_v59, %v5847_v34  ;;  %v2018_v34 = vsel %vm1993_vm1, %v1441_v11, %v1971_v39  ;;  %v2002_v59 = vsel %vm1993_vm1, %v5841_v2, %v5835_v8  ;;  %v2000_v8 = vsel %vm1993_vm1, %v5831_v45, %v5829_v55  ;;  %v774_v11 = vld [vmem:[#allocation4 + $0x28] sm:$0xff]  ;;  %v773_v39 = vld [vmem:[#allocation4 + $0x20] sm:$0xff] }
 0x2ed   : > { %4429 = vmatprep.subr.mxu0 %v2023_v44  ;;  %v2020_v44 = vsel %vm1993_vm1, %v1447_v41, %v1977_v60  ;;  %v1998_v55 = vsel %vm1993_vm1, %v5820_v24, %v5822_v13  ;;  %v2013_v12 = vsel %vm1993_vm1, %v1426_v25, %v1956_v23  ;;  %v778_v41 = vld [vmem:[#allocation4 + $0x48] sm:$0xff]  ;;  %v777_v60 = vld [vmem:[#allocation4 + $0x40] sm:$0xff] }
 0x2ee   : > { %4430 = vmatpush3.msra.mxu0 %v2007_v3  ;;  %v2004_v3 = vsel %vm1993_vm1, %v5849_v7, %v5843_v32  ;;  %v2017_v7 = vsel %vm1993_vm1, %v1438_v35, %v1968_v48  ;;  %v772_v35 = vld [vmem:[#allocation4 + $0x18] sm:$0xff]  ;;  %v771_v48 = vld [vmem:[#allocation4 + $0x10] sm:$0xff] }
 0x2ef   : > { %v1378_v54 = vpop.xlane.xlu1 %1377  ;;  %4431 = vmatprep.subr.mxu0 %v2022_v62  ;;  %v1908_v22 = vpop.xlane.xlu0 %1907  ;;  %v4873_v62 = vmov 11  }
 0x2f0   : > { %4432 = vmatpush3.msra.mxu0 %v2006_v51  ;;  %v1997_v6 = vsel %vm1993_vm1, %v1378_v54, %v1908_v22  ;;  %4694 = vset.pattern.permute.xlu1 %v4873_v62  ;;  %v785_v51 = vld [vmem:[%s7082_s5] sm:$0xff] }
 0x2f1   : > { %4433 = vmatprep.subr.mxu0 %v2021_v29  ;;  %4693 = vset.pattern.permute.xlu0 %v4873_v62  ;;  %v5945_v54 = vld [vmem:[%s402_s16] sm:$0x1]  ;;  %v5947_v22 = vld [vmem:[%s402_s16 + $0x1] sm:$0x1]  ;;  %v4874_v29 = vmov 7  }
 0x2f2   : > { %4434 = vmatpush3.msra.mxu0 %v2005_v16  ;;  %2267 = vperm.xlu1 %4694, %v5861_v19   ;;  %v5951_v19 = vmul.f32 %v5945_v54, %v5945_v54  ;;  %v5959_v16 = vmul.f32 %v5947_v22, %v5947_v22 }
 0x2f3   : > { %v1423_v21 = vpop.xlane.xlu1 %1422  ;;  %4435 = vmatprep.subr.mxu0 %v2020_v44  ;;  %v1953_v27 = vpop.xlane.xlu0 %1952  ;;  %2263 = vperm.xlu0 %4693, %v5868_v50   ;;  %v7384_v44 = vld [vmem:[#allocation15_spill] sm:$0xff] }
 0x2f4   : > { %4436 = vmatpush3.msra.mxu0 %v2004_v3  ;;  %v2012_v49 = vsel %vm1993_vm1, %v1423_v21, %v1953_v27  ;;  %4573 = vmatprep.mubr.msk.f32.mxu1 %vm1061_vm0, %v785_v51  ;;  %v5974_v3 = vrot.slane %v5945_v54, %v7384_v44 }
 0x2f5   : > { %4437 = vmatprep.subr.mxu0 %v2019_v26 }
 0x2f6   : > { %4438 = vmatpush3.msra.mxu0 %v2003_v17  ;;  %4696 = vset.pattern.permute.xlu1 %v7351_v20 }
 0x2f7   : > { %v1375_v47 = vpop.xlane.xlu1 %1374  ;;  %4439 = vmatprep.subr.mxu0 %v2018_v34  ;;  %v1905_v32 = vpop.xlane.xlu0 %1904  ;;  %4695 = vset.pattern.permute.xlu0 %v4874_v29 }
 0x2f8   : > { %4440 = vmatpush3.msra.mxu0 %v2002_v59  ;;  %v1996_v40 = vsel %vm1993_vm1, %v1375_v47, %v1905_v32  ;;  %2344 = vrot.lane.b32.xlu1 %v5951_v19, %s4875_s17 }
 0x2f9   : > { %4441 = vmatprep.subr.mxu0 %v2017_v7  ;;  %2377 = vrot.lane.b32.xlu0 %v5951_v19, %s4876_s18 }
 0x2fa   : > { %4442 = vmatpush3.msra.mxu0 %v2001_v33 }
 0x2fb   : > { %v1420_v2 = vpop.xlane.xlu1 %1419  ;;  %4443 = vmatprep.subr.mxu0 %v2016_v31  ;;  %v1950_v36 = vpop.xlane.xlu0 %1949 }
 0x2fc   : > { %4444 = vmatpush3.msra.mxu0 %v2000_v8  ;;  %v2011_v24 = vsel %vm1993_vm1, %v1420_v2, %v1950_v36  ;;  %3026 = vrot.lane.b32.xlu1 %v5947_v22, %s4877_s19 }
 0x2fd   : > { %4445 = vmatprep.subr.mxu0 %v2015_v38  ;;  %3036 = vrot.lane.b32.xlu0 %v5959_v16, %s4875_s17 }
 0x2fe   : > { %4446 = vmatpush3.msra.mxu0 %v1999_v18 }
 0x2ff   : > { %v1372_v45 = vpop.xlane.xlu1 %1371  ;;  %4447 = vmatprep.subr.mxu0 %v2014_v28  ;;  %v1902_v42 = vpop.xlane.xlu0 %1901 }
 0x300   : > { %4448 = vmatpush3.msra.mxu0 %v1998_v55  ;;  %v1995_v13 = vsel %vm1993_vm1, %v1372_v45, %v1902_v42  ;;  %3081 = vrot.lane.b32.xlu1 %v5959_v16, %s4876_s18 }
 0x301   : > { %4449 = vmatprep.subr.mxu0 %v2013_v12  ;;  %2334 = vrot.lane.b32.xlu0 %v5945_v54, %s4877_s19 }
 0x302   : > { %4450 = vmatpush3.msra.mxu0 %v1997_v6 }
 0x303   : > { %v1417_v15 = vpop.xlane.xlu1 %1416  ;;  %4451 = vmatprep.subr.mxu0 %v2012_v49  ;;  %v1947_v63 = vpop.xlane.xlu0 %1946 }
 0x304   : > { %4452 = vmatpush3.msra.mxu0 %v1996_v40  ;;  %v2010_v23 = vsel %vm1993_vm1, %v1417_v15, %v1947_v63  ;;  %3030 = vrot.lane.b32.xlu1 %v5947_v22, %s4878_s20 }
 0x305   : > { %4453 = vmatprep.subr.mxu0 %v2011_v24  ;;  %2283 = vperm.xlu0 %4695, %v5868_v50  }
 0x306   : > { %4454 = vmatpush3.msra.mxu0 %v1995_v13 }
 0x307   : > { %v1369_v25 = vpop.xlane.xlu1 %1368  ;;  %4455 = vmatprep.subr.mxu0 %v2010_v23  ;;  %v1899_v56 = vpop.xlane.xlu0 %1898 }
 0x308   : > { %v1994_v43 = vsel %vm1993_vm1, %v1369_v25, %v1899_v56  ;;  %2338 = vrot.lane.b32.xlu1 %v5945_v54, %s4878_s20 }
 0x309   : > { %4456 = vmatpush3.msra.mxu0 %v1994_v43  ;;  %2363 = vrot.lane.b32.xlu0 %v5974_v3, %s4878_s20 }
 0x30a   : > { %2123 = vmatmul.mubr.f32.vlgmr.msra.gmra.mxu0 %v769_v1  ;;  %4697 = vset.pattern.permute.xlu0 %v7351_v20 }
 0x30b   : > { %2127 = vmatprep.mubr.f32.mxu0 %v772_v35  ;;  %v2056_v21 = vpop.permute.xlu1 %2055 }
 0x30e   : > { %2128 = vmatmul.mubr.f32.gmra.mxu0 %v771_v48 }
 0x30f   : > { %2132 = vmatprep.mubr.f32.mxu0 %v774_v11  ;;  %v2048_v27 = vpop.permute.xlu1 %2047  ;;  %v2052_v49 = vpop.permute.xlu0 %2051 }
 0x312   : > { %2133 = vmatmul.mubr.f32.gmra.mxu0 %v773_v39 }
 0x313   : > { %2137 = vmatprep.mubr.f32.mxu0 %v776_v58  ;;  %v2044_v34 = vpop.permute.xlu1 %2043 }
 0x316   : > { %2138 = vmatmul.mubr.f32.gmra.mxu0 %v775_v30 }
 0x317   : > { %2142 = vmatprep.mubr.f32.mxu0 %v778_v41  ;;  %v2040_v32 = vpop.permute.xlu1 %2039 }
 0x31a   : > { %2143 = vmatmul.mubr.f32.gmra.mxu0 %v777_v60 }
 0x31b   : > { %2147 = vmatprep.mubr.f32.mxu0 %v780_v0  ;;  %v2036_v8 = vpop.permute.xlu1 %2035 }
 0x31e   : > { %2148 = vmatmul.mubr.f32.gmra.mxu0 %v779_v61 }
 0x31f   : > { %2152 = vmatprep.mubr.f32.mxu0 %v782_v46  ;;  %v2032_v18 = vpop.permute.xlu1 %2031 }
 0x322   : > { %2153 = vmatmul.mubr.f32.gmra.mxu0 %v781_v9 }
 0x323   : > { %2157 = vmatprep.mubr.f32.mxu0 %v784_v5  ;;  %v2028_v42 = vpop.permute.xlu1 %2027 }
 0x326   : > { %2158 = vmatmul.mubr.f32.gmra.mxu0 %v783_v53 }
 0x327   : > { %3392 = vmatprep.mubr.bf16.mxu0 %v7351_v20 }
 0x361   : > { %v5981_v24 = vpop.permute.xlu1 %2172 }
 0x365   : > { %v5983_v35 = vpop.permute.xlu1 %2176 }
 0x36d   : > { %v2268_v46 = vpop.permute.xlu1 %2267 }
 0x36e   : > { %v2264_v9 = vpop.permute.xlu0 %2263 }
 0x371   : > { %v2345_v51 = vpop.permute.xlu1 %2344 }
 0x372   : > { %v2378_v29 = vpop.permute.xlu0 %2377 }
 0x3ca   : > { %v4457_v26 = vpop.f32.mrf.mxu0 }
 0x3cc   : > { %v4458_v17 = vpop.f32.mrf.mxu0 }
 0x3cd   : > { %v4459_v60 = vadd.f32 %v4458_v17, %v4457_v26  ;;  %v2380_v26 = vadd.f32 %v2378_v29, %v5951_v19 }
 0x3ce   : > { %v4460_v59 = vpop.f32.mrf.mxu0 }
 0x3cf   : > { %v2125_v10 = vadd.f32 %v4459_v60, %v2028_v42 }
 0x3d0   : > { %v4461_v47 = vpop.f32.mrf.mxu0 }
 0x3d1   : > { %v4462_v58 = vadd.f32 %v4461_v47, %v4460_v59  ;;  %v2163_v17 = vmax.f32 %v2125_v10, 0.0  ;;  %v786_v59 = vld [vmem:[%s7082_s5 + $0x8] sm:$0xff]  ;;  %v3027_v47 = vpop.permute.xlu1 %3026 }
 0x3d2   : > { %v4463_v50 = vpop.f32.mrf.mxu0 }
 0x3d3   : > { %v2130_v5 = vadd.f32 %v4462_v58, %v2032_v18 }
 0x3d4   : > { %v4464_v7 = vpop.f32.mrf.mxu0 }
 0x3d5   : > { %v4465_v48 = vadd.f32 %v4464_v7, %v4463_v50  ;;  %v3037_v50 = vpop.permute.xlu0 %3036  ;;  %v5994_v7 = vmul.f32 %v5947_v22, %v3027_v47 }
 0x3d6   : > { %v4466_v33 = vpop.f32.mrf.mxu0 }
 0x3d7   : > { %v2135_v0 = vadd.f32 %v4465_v48, %v2036_v8  ;;  %v3062_v8 = vrot.slane %v5994_v7, %v7384_v44 }
 0x3d8   : > { %v4467_v31 = vpop.f32.mrf.mxu0 }
 0x3d9   : > { %v4468_v56 = vadd.f32 %v4467_v31, %v4466_v33  ;;  %v2165_v62 = vmax.f32 %v2135_v0, 0.0  ;;  %v3082_v31 = vpop.permute.xlu1 %3081 }
 0x3da   : > { %v4469_v2 = vpop.f32.mrf.mxu0 }
 0x3db   : > { %v2140_v30 = vadd.f32 %v4468_v56, %v2040_v32  ;;  %v2385_v32 = vrot.slane %v2380_v26, %v7384_v44 }
 0x3dc   : > { %v4470_v36 = vpop.f32.mrf.mxu0 }
 0x3dd   : > { %v4471_v13 = vadd.f32 %v4470_v36, %v4469_v2  ;;  %v2166_v53 = vmax.f32 %v2140_v30, 0.0  ;;  %v3084_v2 = vadd.f32 %v3082_v31, %v5959_v16  ;;  %v3053_v36 = vrot.slane %v5947_v22, %v7384_v44  ;;  %v3031_v18 = vpop.permute.xlu1 %3030 }
 0x3de   : > { %v4472_v38 = vpop.f32.mrf.mxu0 }
 0x3df   : > { %v2145_v11 = vadd.f32 %v4471_v13, %v2044_v34 }
 0x3e0   : > { %v4473_v28 = vpop.f32.mrf.mxu0 }
 0x3e1   : > { %v4474_v15 = vadd.f32 %v4473_v28, %v4472_v38  ;;  %v2167_v61 = vmax.f32 %v2145_v11, 0.0  ;;  %v2335_v38 = vpop.permute.xlu0 %2334  ;;  %v3089_v28 = vrot.slane %v3084_v2, %v7384_v44 }
 0x3e2   : > { %v4475_v55 = vpop.f32.mrf.mxu0 }
 0x3e3   : > { %v2150_v1 = vadd.f32 %v4474_v15, %v2048_v27  ;;  %v2347_v27 = vadd.f32 %v2345_v51, %v5951_v19  ;;  %v5997_v19 = vadd.f32 %v3037_v50, %v5959_v16 }
 0x3e4   : > { %v4476_v45 = vpop.f32.mrf.mxu0 }
 0x3e5   : > { %v4477_v6 = vadd.f32 %v4476_v45, %v4475_v55  ;;  %v2168_v41 = vmax.f32 %v2150_v1, 0.0  ;;  %v2352_v34 = vrot.slane %v2347_v27, %v7384_v44  ;;  %v3044_v33 = vrot.slane %v5997_v19, %v7384_v44  ;;  %v2284_v58 = vpop.permute.xlu0 %2283 }
 0x3e6   : > { %v4478_v12 = vpop.f32.mrf.mxu0  ;;  %v6013_v55 = vmul.f32 %v2335_v38, %v5945_v54  ;;  %v3033_v45 = vmul.f32 %v5947_v22, %v3031_v18 }
 0x3e7   : > { %v2155_v23 = vadd.f32 %v4477_v6, %v2052_v49  ;;  %2353 = vrot.lane.b32.xlu1 %v2352_v34, %s4878_s20  ;;  %3045 = vrot.lane.b32.xlu0 %v3044_v33, %s4877_s19 }
 0x3e8   : > { %v4479_v40 = vpop.f32.mrf.mxu0  ;;  %v2396_v16 = vrot.slane %v6013_v55, %v7384_v44  ;;  %v3073_v42 = vrot.slane %v3033_v45, %v7384_v44 }
 0x3e9   : > { %v4480_v63 = vadd.f32 %v4479_v40, %v4478_v12  ;;  %v2169_v39 = vmax.f32 %v2155_v23, 0.0 }
 0x3eb   : > { %v2160_v25 = vadd.f32 %v4480_v63, %v2056_v21  ;;  %v2164_v21 = vmax.f32 %v2130_v5, 0.0  ;;  %2386 = vrot.lane.b32.xlu1 %v2385_v32, %s4878_s20  ;;  %3063 = vrot.lane.b32.xlu0 %v3062_v8, %s4875_s17  ;;  %s414_s20 = scalar_lea.vmem %s7086_s9, %s7540_s13 }
 0x3ed   : > { %v2170_v43 = vmax.f32 %v2160_v25, 0.0 }
 0x3ef   : > { %4557 = vmatprep.subr.mxu1 %v2170_v43  ;;  %3054 = vrot.lane.b32.xlu1 %v3053_v36, %s4877_s19 }
 0x3f0   : > { %4558 = vmatpush3.msra.mxu1 %v2170_v43  ;;  %2369 = vrot.lane.b32.xlu0 %v5974_v3, %s4877_s19 }
 0x3f1   : > { %4559 = vmatprep.subr.mxu1 %v2169_v39 }
 0x3f2   : > { %4560 = vmatpush3.msra.mxu1 %v2169_v39 }
 0x3f3   : > { %4561 = vmatprep.subr.mxu1 %v2168_v41  ;;  %3090 = vrot.lane.b32.xlu1 %v3089_v28, %s4877_s19  ;;  %v2339_v28 = vpop.permute.xlu1 %2338 }
 0x3f4   : > { %4562 = vmatpush3.msra.mxu1 %v2168_v41  ;;  %3074 = vrot.lane.b32.xlu0 %v3073_v42, %s4875_s17 }
 0x3f5   : > { %4563 = vmatprep.subr.mxu1 %v2167_v61 }
 0x3f6   : > { %4564 = vmatpush3.msra.mxu1 %v2167_v61 }
 0x3f7   : > { %4565 = vmatprep.subr.mxu1 %v2166_v53  ;;  %2397 = vrot.lane.b32.xlu1 %v2396_v16, %s4877_s19 }
 0x3f8   : > { %4566 = vmatpush3.msra.mxu1 %v2166_v53  ;;  %2406 = vrot.lane.b32.xlu0 %v2352_v34, %s4877_s19 }
 0x3f9   : > { %4567 = vmatprep.subr.mxu1 %v2165_v62 }
 0x3fa   : > { %4568 = vmatpush3.msra.mxu1 %v2165_v62 }
 0x3fb   : > { %4569 = vmatprep.subr.mxu1 %v2164_v21  ;;  %3095 = vrot.lane.b32.xlu1 %v3053_v36, %s4875_s17 }
 0x3fc   : > { %4570 = vmatpush3.msra.mxu1 %v2164_v21 }
 0x3fd   : > { %4571 = vmatprep.subr.mxu1 %v2163_v17 }
 0x3fe   : > { %4572 = vmatpush3.msra.mxu1 %v2163_v17 }
 0x3ff   : > { %4574 = vmatmul.mubr.msk.f32.vlgmr.msra.gmra.mxu1 %vm1061_vm0, %v786_v59 }
 0x400   : > { %2702 = vmatprep.mubr.bf16.mxu1 %v7351_v20 }
 0x4bf   : > { %v4575_v12 = vpop.f32.mrf.mxu1 }
 0x4c0   : > { %v2257_v6 = vadd.f32 %v4575_v12, %v5983_v35 }
 0x4c1   : > { %v2251_v49 = vpop.f32.mrf.mxu1 }
 0x4c2   : > { %v2261_v40 = vmax.f32 %v2257_v6, 0.0  ;;  %v2252_v15 = vadd.f32 %v2251_v49, %v5981_v24 }
 0x4c4   : > { %v2271_v63 = vmul.f32 %v2268_v46, %v2261_v40  ;;  %v2260_v13 = vmax.f32 %v2252_v15, 0.0 }
 0x4c6   : > { %v2270_v23 = vmul.f32 %v2264_v9, %v2260_v13  ;;  %v2274_v3 = vsel %vm2272_vm2, %v2271_v63, 0.0  ;;  %v2354_v63 = vpop.permute.xlu1 %2353 }
 0x4c8   : > { %v2273_v25 = vsel %vm2272_vm2, %v2270_v23, 0.0 }
 0x4c9   : > { %v2275_v56 = vadd.f32 %v2274_v3, %v2273_v25 }
 0x4cb   : > { %v2276_v1 = vrot.slane %v2275_v56, 4 }
 0x4cd   : > { %v2277_v43 = vadd.f32 %v2276_v1, %v2275_v56  ;;  %v2364_v1 = vpop.permute.xlu0 %2363 }
 0x4cf   : > { %v2278_v48 = vrot.slane %v2277_v43, 2 }
 0x4d1   : > { %v2279_v11 = vadd.f32 %v2278_v48, %v2277_v43 }
 0x4d3   : > { %v2280_v39 = vrot.slane %v2279_v11, 1 }
 0x4d5   : > { %v2281_v35 = vadd.f32 %v2280_v39, %v2279_v11  ;;  %v2387_v11 = vpop.permute.xlu1 %2386 }
 0x4d7   : > { %v2286_v30 = vadd.f32 %v2284_v58, %v2281_v35 }
 0x4d9   : > { %v2287_v41 = vmul.f32 0.31830987, %v2286_v30 }
 0x4db   : > { %vm2288_vm3 = vcmp.ge.f32.partialorder %v2287_v41, 0.0  ;;  %v2289_v24 = vadd.f32 0.5, %v2287_v41  ;;  %v4381_v60 = vadd.f32 -0.5, %v2287_v41 }
 0x4dd   : > { %v2291_v0 = vsel %vm2288_vm3, %v2289_v24, %v4381_v60 }
 0x4de   : > { %v4595_v61 = vtrunc.f32 %v2291_v0  ;;  %v3055_v0 = vpop.permute.xlu1 %3054 }
 0x4e0   : > { %v4596_v46 = vcvt.f32.s32 %v4595_v61 }
 0x4e2   : > { %v2293_v9 = vcvt.s32.f32 %v4596_v46 }
 0x4e4   : > { %v2294_v5 = vmul.f32 3.140625, %v2293_v9  ;;  %v2298_v53 = vmul.f32 0.5, %v2293_v9  ;;  %v2296_v62 = vmul.f32 0.0009676536, %v2293_v9 }
 0x4e6   : > { %v2295_v10 = vsub.f32 %v2286_v30, %v2294_v5  ;;  %v4597_v29 = vtrunc.f32 %v2298_v53  ;;  %v3046_v30 = vpop.permute.xlu0 %3045 }
 0x4e8   : > { %v2297_v51 = vsub.f32 %v2295_v10, %v2296_v62  ;;  %v4598_v27 = vcvt.f32.s32 %v4597_v29  ;;  %v3091_v62 = vpop.permute.xlu1 %3090 }
 0x4ea   : > { %v2305_v21 = vmul.f32 %v2297_v51, %v2297_v51  ;;  %v2300_v47 = vcvt.s32.f32 %v4598_v27 }
 0x4ec   : > { %v2306_v26 = vmul.f32 -2.5052108e-08, %v2305_v21  ;;  %v2317_v17 = vmul.f32 2.0876756e-09, %v2305_v21  ;;  %v2301_v8 = vsub.f32 %v2298_v53, %v2300_v47  ;;  %v3064_v53 = vpop.permute.xlu0 %3063 }
 0x4ee   : > { %v2307_v34 = vadd.f32 2.7557319e-06, %v2306_v26  ;;  %v2318_v59 = vadd.f32 -2.755732e-07, %v2317_v17  ;;  %v2302_v45 = vand.u32 2147483647, %v2301_v8 }
 0x4f0   : > { %v2308_v50 = vmul.f32 %v2307_v34, %v2305_v21  ;;  %v2319_v32 = vmul.f32 %v2318_v59, %v2305_v21  ;;  %v2303_v49 = vmul.f32 4.0, %v2302_v45  ;;  %v2370_v17 = vpop.permute.xlu0 %2369  ;;  %v2398_v59 = vpop.permute.xlu1 %2397 }
 0x4f2   : > { %v2309_v33 = vadd.f32 -0.0001984127, %v2308_v50  ;;  %v2320_v31 = vadd.f32 2.4801588e-05, %v2319_v32  ;;  %v2304_v3 = vsub.f32 1.0, %v2303_v49 }
 0x4f4   : > { %v2310_v2 = vmul.f32 %v2309_v33, %v2305_v21  ;;  %v2321_v36 = vmul.f32 %v2320_v31, %v2305_v21 }
 0x4f6   : > { %v2311_v38 = vadd.f32 0.008333334, %v2310_v2  ;;  %v2322_v18 = vadd.f32 -0.0013888889, %v2321_v36  ;;  %v3075_v2 = vpop.permute.xlu0 %3074  ;;  %v2341_v36 = vmul.f32 %v2339_v28, %v5945_v54 }
 0x4f8   : > { %v2312_v16 = vmul.f32 %v2311_v38, %v2305_v21  ;;  %v2323_v42 = vmul.f32 %v2322_v18, %v2305_v21 }
 0x4fa   : > { %v2313_v12 = vadd.f32 -0.16666667, %v2312_v16  ;;  %v2324_v6 = vadd.f32 0.041666668, %v2323_v42  ;;  %v3096_v42 = vpop.permute.xlu1 %3095 }
 0x4fc   : > { %v2314_v40 = vmul.f32 %v2313_v12, %v2305_v21  ;;  %v2325_v15 = vmul.f32 %v2324_v6, %v2305_v21 }
 0x4fe   : > { %v2315_v13 = vadd.f32 1.0, %v2314_v40  ;;  %v2326_v23 = vadd.f32 -0.5, %v2325_v15 }
 0x500   : > { %v2316_v25 = vmul.f32 %v2315_v13, %v2297_v51  ;;  %v2327_v56 = vmul.f32 %v2326_v23, %v2305_v21  ;;  %v7391_v21 = vmov 1  }
 0x502   : > { %v2328_v43 = vadd.f32 1.0, %v2327_v56  ;;  %v6031_v48 = vmul.f32 %v2316_v25, %v2304_v3 }
 0x504   : > { %v2330_v39 = vmul.f32 %v2328_v43, %v2304_v3  ;;  %v6034_v58 = vsub.f32 0.0, %v6031_v48  ;;  %v2375_v9 = vmul.f32 %v2364_v1, %v6031_v48  ;;  %v3079_v31 = vmul.f32 %v3055_v0, %v6031_v48 }
 0x505   : > { %v3068_v16 = vmul.f32 %v5947_v22, %v6031_v48  ;;  %v2372_v12 = vmul.f32 %v2370_v17, %v6031_v48  ;;  %v3103_v40 = vmul.f32 %v3096_v42, %v6031_v48  ;;  %v2404_v23 = vmul.f32 %v5945_v54, %v6031_v48 }
 0x506   : > { %v6036_v35 = vsub.f32 1.0, %v2330_v39  ;;  %v2366_v60 = vmul.f32 %v2364_v1, %v6034_v58  ;;  %v3057_v47 = vmul.f32 %v3055_v0, %v6034_v58  ;;  %v2391_v33 = vmul.f32 %v6034_v58, %v5945_v54  ;;  %v2407_v1 = vpop.permute.xlu0 %2406  ;;  %v7404_v0 = vld [vmem:[#allocation18_spill] sm:$0xff] }
 0x507   : > { %v2402_v15 = vmul.f32 %v2370_v17, %v6034_v58  ;;  %v3101_v54 = vmul.f32 %v5947_v22, %v6034_v58 }
 0x508   : > { %v6039_v41 = vmul.f32 %v2354_v63, %v6036_v35  ;;  %v2367_v24 = vmul.f32 %v6013_v55, %v6036_v35  ;;  %v6049_v5 = vmul.f32 %v3046_v30, %v6036_v35  ;;  %v6055_v55 = vmul.f32 %v2387_v11, %v6036_v35 }
 0x509   : > { %v6061_v29 = vmul.f32 %v3091_v62, %v6036_v35  ;;  %v3066_v26 = vmul.f32 %v3064_v53, %v6036_v35  ;;  %v2400_v50 = vmul.f32 %v2398_v59, %v6036_v35  ;;  %v3077_v38 = vmul.f32 %v3075_v2, %v6036_v35  ;;  %v7405_v53 = vld [vmem:[#allocation16_spill] sm:$0xff]  ;;  %v7407_v59 = vld [vmem:[#allocation26_spill] sm:$0xff] }
 0x50a   : > { %7385 = vst [vmem:[#allocation15_spill] sm:$0xff] %v6039_v41  ;;  %v7235_v61 = vsub.f32 1.0, %v6039_v41  ;;  %v6045_v46 = vadd.f32 %v2367_v24, %v2366_v60  ;;  %7387 = vst [vmem:[#allocation87_spill] sm:$0xff] %v6049_v5  ;;  %v6057_v10 = vadd.f32 %v2375_v9, %v2367_v24  ;;  %v7240_v51 = vsub.f32 1.0, %v6049_v5  ;;  %v7409_v2 = vld [vmem:[#allocation22_spill] sm:$0xff] }
 0x50b   : > { %7388 = vst [vmem:[#allocation88_spill] sm:$0xff] %v6055_v55  ;;  %7390 = vst [vmem:[#allocation90_spill] sm:$0xff] %v6061_v29  ;;  %v7238_v27 = vsub.f32 1.0, %v6055_v55  ;;  %v7239_v34 = vsub.f32 1.0, %v6061_v29  ;;  %v6076_v32 = vadd.f32 %v3066_v26, %v3057_v47  ;;  %v6082_v8 = vadd.f32 %v2400_v50, %v2391_v33  ;;  %v7408_v33 = vld [vmem:[#allocation24_spill] sm:$0xff] }
 0x50c   : > { %7386 = vst [vmem:[#allocation86_spill] sm:$0xff] %v6045_v46  ;;  %2461 = vperm.xlu1 %4696, %v7235_v61   ;;  %2467 = vperm.xlu0 %4697, %v6045_v46   ;;  %7389 = vst [vmem:[#allocation89_spill] sm:$0xff] %v6057_v10  ;;  %v6088_v18 = vadd.f32 %v3079_v31, %v3066_v26  ;;  %v2373_v45 = vmul.f32 %v2341_v36, %v6036_v35  ;;  %v7406_v26 = vld [vmem:[#allocation28_spill] sm:$0xff]  ;;  %v7415_v61 = vld [vmem:[#allocation27_spill] sm:$0xff] }
 0x50d   : > { %7392 = vst [vmem:[#allocation91_spill] sm:$0xff] %v6076_v32  ;;  %7393 = vst [vmem:[#allocation92_spill] sm:$0xff] %v6082_v8  ;;  %v3099_v28 = vmul.f32 %v5994_v7, %v6036_v35  ;;  %v6098_v6 = vadd.f32 %v3077_v38, %v3068_v16  ;;  %v6112_v7 = vmul.f32 %v5997_v19, %v6036_v35 }
 0x50e   : > { %7394 = vst [vmem:[#allocation93_spill] sm:$0xff] %v6088_v18  ;;  %v6101_v49 = vadd.f32 %v2373_v45, %v2372_v12  ;;  %v6114_v13 = vadd.f32 %v2402_v15, %v2373_v45  ;;  %v6121_v25 = vadd.f32 %v2404_v23, %v2400_v50  ;;  %v3098_v19 = vmul.f32 %v3096_v42, %v6034_v58  ;;  %v7411_v15 = vld [vmem:[#allocation17_spill] sm:$0xff] }
 0x50f   : > { %7395 = vst [vmem:[#allocation94_spill] sm:$0xff] %v6098_v6  ;;  %v6107_v63 = vadd.f32 %v3103_v40, %v3099_v28  ;;  %7398 = vst [vmem:[#allocation97_spill] sm:$0xff] %v6112_v7  ;;  %v7236_v3 = vsub.f32 1.0, %v6112_v7  ;;  %v6133_v43 = vadd.f32 %v3101_v54, %v3077_v38  ;;  %v6136_v48 = vmul.f32 %v2407_v1, %v6036_v35 }
 0x510   : > { %2483 = vperm.xlu1 %4696, %v6057_v10   ;;  %4698 = vset.pattern.permute.xlu0 %v7391_v21  ;;  %7396 = vst [vmem:[#allocation95_spill] sm:$0xff] %v6101_v49  ;;  %7399 = vst [vmem:[#allocation98_spill] sm:$0xff] %v6114_v13  ;;  %v6127_v56 = vadd.f32 %v3099_v28, %v3098_v19  ;;  %v7410_v28 = vld [vmem:[#allocation19_spill] sm:$0xff] }
 0x511   : > { %3150 = vperm.xlu0 %4698, %v7240_v51   ;;  %7397 = vst [vmem:[#allocation96_spill] sm:$0xff] %v6107_v63  ;;  %7400 = vst [vmem:[#allocation99_spill] sm:$0xff] %v6121_v25  ;;  %v7237_v11 = vsub.f32 1.0, %v6136_v48 }
 0x512   : > { %7401 = vst [vmem:[#allocation100_spill] sm:$0xff] %v6127_v56  ;;  %7402 = vst [vmem:[#allocation101_spill] sm:$0xff] %v6133_v43 }
 0x513   : > { %7403 = vst [vmem:[#allocation102_spill] sm:$0xff] %v6136_v48 }
 0x514   : > { %2489 = vperm.xlu1 %4696, %v7238_v27  }
 0x515   : > { %3179 = vperm.xlu0 %4698, %v7239_v34  }
 0x518   : > { %4699 = vset.pattern.permute.xlu1 %v7391_v21 }
 0x519   : > { %3157 = vperm.xlu1 %4699, %v6076_v32   ;;  %4701 = vset.pattern.permute.xlu0 %v7351_v20 }
 0x51a   : > { %2497 = vperm.xlu0 %4701, %v6082_v8  }
 0x51d   : > { %3173 = vperm.xlu1 %4699, %v6088_v18  }
 0x51e   : > { %4702 = vset.pattern.permute.xlu0 %v7391_v21 }
 0x51f   : > { %3165 = vperm.xlu0 %4702, %v6098_v6  }
 0x521   : > { %4700 = vset.pattern.permute.xlu1 %v7351_v20 }
 0x522   : > { %2475 = vperm.xlu1 %4700, %v6101_v49  }
 0x523   : > { %3201 = vperm.xlu0 %4702, %v6107_v63   ;;  %v7431_v63 = vld [vmem:[#allocation32_spill] sm:$0xff] }
 0x526   : > { %2505 = vperm.xlu1 %4700, %v6114_v13  }
 0x527   : > { %3209 = vperm.xlu0 %4702, %v7236_v3  }
 0x52a   : > { %2511 = vperm.xlu1 %4700, %v6121_v25   ;;  %v7430_v25 = vld [vmem:[#allocation30_spill] sm:$0xff] }
 0x52e   : > { %4703 = vset.pattern.permute.xlu1 %v7391_v21 }
 0x52f   : > { %3187 = vperm.xlu1 %4703, %v6127_v56  }
 0x533   : > { %3195 = vperm.xlu1 %4703, %v6133_v43  }
 0x537   : > { %4704 = vset.pattern.permute.xlu1 %v7351_v20 }
 0x538   : > { %2519 = vperm.xlu1 %4704, %v7237_v11  }
 0x587   : > { %v2462_v39 = vpop.permute.xlu1 %2461  ;;  %v2468_v30 = vpop.permute.xlu0 %2467 }
 0x588   : > { %v2464_v38 = vmul.f32 %v2462_v39, %v7406_v26  ;;  %v2470_v45 = vmul.f32 %v2468_v30, %v7404_v0  ;;  %v2465_v1 = vmul.f32 %v2462_v39, %v7407_v59 }
 0x58b   : > { %v2484_v22 = vpop.permute.xlu1 %2483 }
 0x58c   : > { %v3151_v58 = vpop.permute.xlu0 %3150  ;;  %v2486_v17 = vmul.f32 %v2484_v22, %v7406_v26  ;;  %v2487_v47 = vmul.f32 %v2484_v22, %v7407_v59  ;;  %v2471_v22 = vmul.f32 %v2468_v30, %v7405_v53 }
 0x58d   : > { %v3154_v3 = vmul.f32 %v3151_v58, %v7415_v61 }
 0x58f   : > { %v2490_v24 = vpop.permute.xlu1 %2489 }
 0x590   : > { %v3180_v60 = vpop.permute.xlu0 %3179  ;;  %v2492_v9 = vmul.f32 %v2490_v24, %v7404_v0  ;;  %v2493_v35 = vmul.f32 %v2490_v24, %v7405_v53  ;;  %v7414_v24 = vld [vmem:[#allocation29_spill] sm:$0xff] }
 0x592   : > { %v2494_v16 = vadd.f32 %v2492_v9, %v2486_v17  ;;  %v2495_v42 = vadd.f32 %v2493_v35, %v2487_v47  ;;  %v2472_v9 = vadd.f32 %v2470_v45, %v2464_v38  ;;  %v7416_v35 = vld [vmem:[#allocation25_spill] sm:$0xff]  ;;  %v7417_v47 = vld [vmem:[#allocation23_spill] sm:$0xff]  ;;  %v3183_v45 = vmul.f32 %v3180_v60, %v7411_v15 }
 0x594   : > { %v3158_v62 = vpop.permute.xlu1 %3157 }
 0x595   : > { %v2498_v50 = vpop.permute.xlu0 %2497  ;;  %v3160_v40 = vmul.f32 %v3158_v62, %v7410_v28  ;;  %v3161_v23 = vmul.f32 %v3158_v62, %v7411_v15 }
 0x596   : > { %v2500_v31 = vmul.f32 %v2498_v50, %v7408_v33  ;;  %v2501_v36 = vmul.f32 %v2498_v50, %v7409_v2  ;;  %v3153_v50 = vmul.f32 %v3151_v58, %v7414_v24 }
 0x597   : > { %v3163_v62 = vadd.f32 %v3161_v23, %v3154_v3  ;;  %v3182_v3 = vmul.f32 %v3180_v60, %v7410_v28 }
 0x598   : > { %v3174_v12 = vpop.permute.xlu1 %3173  ;;  %v6153_v19 = vadd.f32 %v2500_v31, %v2494_v16  ;;  %v6155_v54 = vadd.f32 %v2501_v36, %v2495_v42  ;;  %v3162_v34 = vadd.f32 %v3160_v40, %v3153_v50 }
 0x599   : > { %v3176_v31 = vmul.f32 %v3174_v12, %v7414_v24  ;;  %v3177_v36 = vmul.f32 %v3174_v12, %v7415_v61 }
 0x59a   : > { %7412 = vst [vmem:[#allocation18_spill] sm:$0xff] %v6153_v19  ;;  %7413 = vst [vmem:[#allocation16_spill] sm:$0xff] %v6155_v54  ;;  %v3166_v11 = vpop.permute.xlu0 %3165  ;;  %v6167_v39 = vrot.slane %v6153_v19, %v7384_v44  ;;  %v6171_v30 = vrot.slane %v6155_v54, %v7384_v44  ;;  %v7423_v54 = vld [vmem:[#allocation9_spill] sm:$0xff] }
 0x59b   : > { %v3168_v17 = vmul.f32 %v3166_v11, %v7416_v35  ;;  %v3169_v27 = vmul.f32 %v3166_v11, %v7417_v47  ;;  %v2473_v11 = vadd.f32 %v2471_v22, %v2465_v1  ;;  %v3184_v23 = vadd.f32 %v3182_v3, %v3176_v31  ;;  %v7424_v1 = vld [vmem:[#allocation11_spill] sm:$0xff] }
 0x59c   : > { %7418 = vst [vmem:[#allocation28_spill] sm:$0xff] %v6171_v30  ;;  %v3185_v50 = vadd.f32 %v3183_v45, %v3177_v36  ;;  %v2573_v22 = vmul.f32 %v6171_v30, %v7424_v1 }
 0x59d   : > { %v2476_v16 = vpop.permute.xlu1 %2475  ;;  %v6177_v42 = vadd.f32 %v3169_v27, %v3163_v62  ;;  %v6179_v40 = vadd.f32 %v3168_v17, %v3162_v34  ;;  %v2570_v27 = vmul.f32 %v6167_v39, %v7423_v54  ;;  %v2572_v34 = vmul.f32 %v6167_v39, %v7424_v1  ;;  %v7427_v62 = vld [vmem:[#allocation31_spill] sm:$0xff] }
 0x59e   : > { %v2478_v58 = vmul.f32 %v2476_v16, %v7408_v33  ;;  %v2479_v38 = vmul.f32 %v2476_v16, %v7409_v2  ;;  %v3202_v12 = vpop.permute.xlu0 %3201  ;;  %v2571_v16 = vmul.f32 %v6171_v30, %v7423_v54  ;;  %v2567_v31 = vmul.f32 %v6171_v30, %v7427_v62 }
 0x59f   : > { %7419 = vst [vmem:[#allocation26_spill] sm:$0xff] %v6177_v42  ;;  %7420 = vst [vmem:[#allocation24_spill] sm:$0xff] %v6179_v40  ;;  %v6195_v60 = vrot.slane %v6177_v42, %v7384_v44  ;;  %v6209_v36 = vrot.slane %v6179_v40, %v7384_v44  ;;  %v3204_v45 = vmul.f32 %v3202_v12, %v7410_v28 }
 0x5a0   : > { %v6181_v51 = vadd.f32 %v2478_v58, %v2472_v9  ;;  %v6183_v32 = vadd.f32 %v2479_v38, %v2473_v11  ;;  %v7429_v58 = vld [vmem:[#allocation33_spill] sm:$0xff]  ;;  %v2566_v11 = vmul.f32 %v6167_v39, %v7427_v62  ;;  %v3205_v42 = vmul.f32 %v3202_v12, %v7411_v15 }
 0x5a1   : > { %v2506_v41 = vpop.permute.xlu1 %2505  ;;  %7428 = vst [vmem:[#allocation27_spill] sm:$0xff] %v6209_v36  ;;  %v2569_v38 = vmul.f32 %v6171_v30, %v7429_v58  ;;  %v2568_v3 = vmul.f32 %v6167_v39, %v7429_v58  ;;  %v6229_v28 = vmul.f32 %v6195_v60, %v7430_v25  ;;  %v7432_v15 = vld [vmem:[#allocation21_spill] sm:$0xff]  ;;  %v3236_v55 = vmul.f32 %v6209_v36, %v7430_v25 }
 0x5a2   : > { %7421 = vst [vmem:[#allocation22_spill] sm:$0xff] %v6181_v51  ;;  %7422 = vst [vmem:[#allocation19_spill] sm:$0xff] %v6183_v32  ;;  %v6199_v9 = vrot.slane %v6181_v51, %v7384_v44  ;;  %v6203_v17 = vrot.slane %v6183_v32, %v7384_v44  ;;  %v2508_v32 = vmul.f32 %v2506_v41, %v7406_v26  ;;  %v3210_v19 = vpop.permute.xlu0 %3209 }
 0x5a3   : > { %v2509_v51 = vmul.f32 %v2506_v41, %v7407_v59  ;;  %v6233_v26 = vmul.f32 %v6195_v60, %v7431_v63  ;;  %v3213_v59 = vmul.f32 %v3210_v19, %v7417_v47  ;;  %v3238_v56 = vmul.f32 %v6209_v36, %v7431_v63 }
 0x5a4   : > { %7425 = vst [vmem:[#allocation17_spill] sm:$0xff] %v6199_v9  ;;  %7426 = vst [vmem:[#allocation29_spill] sm:$0xff] %v6203_v17  ;;  %v2547_v13 = vmul.f32 %v6203_v17, %v7430_v25  ;;  %v2549_v8 = vmul.f32 %v6203_v17, %v7431_v63  ;;  %v2546_v41 = vmul.f32 %v6199_v9, %v7430_v25 }
 0x5a5   : > { %v2512_v40 = vpop.permute.xlu1 %2511  ;;  %v2543_v12 = vmul.f32 %v6203_v17, %v7432_v15  ;;  %v6251_v29 = vmul.f32 %v6195_v60, %v7432_v15 }
 0x5a6   : > { %v2514_v7 = vmul.f32 %v2512_v40, %v7404_v0  ;;  %v2515_v48 = vmul.f32 %v2512_v40, %v7405_v53  ;;  %v2548_v0 = vmul.f32 %v6199_v9, %v7431_v63  ;;  %v3212_v53 = vmul.f32 %v3210_v19, %v7416_v35  ;;  %v7433_v40 = vld [vmem:[#allocation38_spill] sm:$0xff] }
 0x5a7   : > { %v2545_v43 = vmul.f32 %v6203_v17, %v7433_v40  ;;  %v6255_v18 = vmul.f32 %v6195_v60, %v7433_v40  ;;  %v6257_v49 = vadd.f32 %v2571_v16, %v2547_v13  ;;  %v6259_v6 = vadd.f32 %v2573_v22, %v2549_v8  ;;  %v7436_v13 = vld [vmem:[#allocation36_spill] sm:$0xff] }
 0x5a8   : > { %v2516_v19 = vadd.f32 %v2514_v7, %v2508_v32  ;;  %v2517_v10 = vadd.f32 %v2515_v48, %v2509_v51  ;;  %v6263_v63 = vadd.f32 %v2570_v27, %v2546_v41  ;;  %v6265_v46 = vadd.f32 %v2572_v34, %v2548_v0  ;;  %v7437_v48 = vld [vmem:[#allocation37_spill] sm:$0xff]  ;;  %v7438_v27 = vld [vmem:[#allocation42_spill] sm:$0xff] }
 0x5a9   : > { %v6267_v57 = vadd.f32 %v2567_v31, %v2543_v12  ;;  %v6269_v14 = vadd.f32 %v2569_v38, %v2545_v43  ;;  %v2542_v51 = vmul.f32 %v6199_v9, %v7432_v15  ;;  %v2544_v32 = vmul.f32 %v6199_v9, %v7433_v40  ;;  %v7439_v31 = vld [vmem:[#allocation39_spill] sm:$0xff] }
 0x5aa   : > { %v3188_v21 = vpop.permute.xlu1 %3187  ;;  %v6285_v43 = vmul.f32 %v6209_v36, %v7432_v15  ;;  %v6289_v16 = vmul.f32 %v6209_v36, %v7433_v40  ;;  %v2563_v34 = vmul.f32 %v6171_v30, %v7438_v27  ;;  %v2565_v38 = vmul.f32 %v6171_v30, %v7439_v31 }
 0x5ab   : > { %v3190_v25 = vmul.f32 %v3188_v21, %v7416_v35  ;;  %v3191_v5 = vmul.f32 %v3188_v21, %v7417_v47  ;;  %v2539_v21 = vmul.f32 %v6203_v17, %v7436_v13  ;;  %v2541_v35 = vmul.f32 %v6203_v17, %v7437_v48 }
 0x5ac   : > { %v6313_v15 = vadd.f32 %v2566_v11, %v2542_v51  ;;  %v6315_v12 = vadd.f32 %v2568_v3, %v2544_v32 }
 0x5ad   : > { %v6275_v8 = vadd.f32 %v3190_v25, %v3184_v23  ;;  %v6277_v7 = vadd.f32 %v3191_v5, %v3185_v50  ;;  %v6293_v23 = vmul.f32 %v6195_v60, %v7436_v13  ;;  %v6297_v5 = vmul.f32 %v6195_v60, %v7437_v48 }
 0x5ae   : > { %v3196_v47 = vpop.permute.xlu1 %3195  ;;  %v6317_v40 = vadd.f32 %v2563_v34, %v2539_v21  ;;  %v6319_v25 = vadd.f32 %v2565_v38, %v2541_v35  ;;  %v7440_v21 = vld [vmem:[#allocation40_spill] sm:$0xff] }
 0x5af   : > { %7434 = vst [vmem:[#allocation25_spill] sm:$0xff] %v6275_v8  ;;  %7435 = vst [vmem:[#allocation23_spill] sm:$0xff] %v6277_v7  ;;  %v6301_v50 = vrot.slane %v6275_v8, %v7384_v44  ;;  %v6305_v22 = vrot.slane %v6277_v7, %v7384_v44  ;;  %v3198_v41 = vmul.f32 %v3196_v47, %v7414_v24 }
 0x5b0   : > { %v3199_v0 = vmul.f32 %v3196_v47, %v7415_v61  ;;  %v6323_v7 = vmul.f32 %v6209_v36, %v7436_v13  ;;  %v6327_v8 = vmul.f32 %v6209_v36, %v7437_v48  ;;  %v6339_v35 = vmul.f32 %v6195_v60, %v7440_v21  ;;  %v7441_v47 = vld [vmem:[#allocation46_spill] sm:$0xff]  ;;  %v7453_v36 = vld [vmem:[#allocation44_spill] sm:$0xff] }
 0x5b1   : > { %v3206_v4 = vadd.f32 %v3204_v45, %v3198_v41  ;;  %v3261_v61 = vmul.f32 %v6305_v22, %v7423_v54  ;;  %v3263_v11 = vmul.f32 %v6305_v22, %v7424_v1  ;;  %v3260_v51 = vmul.f32 %v6301_v50, %v7423_v54 }
 0x5b2   : > { %v3207_v24 = vadd.f32 %v3205_v42, %v3199_v0  ;;  %v3262_v32 = vmul.f32 %v6301_v50, %v7424_v1  ;;  %v6343_v42 = vmul.f32 %v6195_v60, %v7441_v47  ;;  %v3257_v54 = vmul.f32 %v6305_v22, %v7427_v62 }
 0x5b3   : > { %v2520_v3 = vpop.permute.xlu1 %2519  ;;  %v6345_v45 = vadd.f32 %v3212_v53, %v3206_v4  ;;  %v3259_v1 = vmul.f32 %v6305_v22, %v7429_v58  ;;  %v6357_v0 = vmul.f32 %v6199_v9, %v7436_v13  ;;  %v6361_v4 = vmul.f32 %v6199_v9, %v7437_v48  ;;  %v7446_v48 = vld [vmem:[#allocation12_spill] sm:$0xff] }
 0x5b4   : > { %v6347_v34 = vadd.f32 %v3213_v59, %v3207_v24  ;;  %v2522_v38 = vmul.f32 %v2520_v3, %v7408_v33  ;;  %v2523_v41 = vmul.f32 %v2520_v3, %v7409_v2  ;;  %v3277_v2 = vadd.f32 %v3261_v61, %v6229_v28 }
 0x5b5   : > { %7442 = vst [vmem:[#allocation9_spill] sm:$0xff] %v6345_v45  ;;  %v6365_v60 = vrot.slane %v6345_v45, %v7384_v44  ;;  %v3279_v53 = vadd.f32 %v3263_v11, %v6233_v26  ;;  %v3276_v24 = vadd.f32 %v3260_v51, %v3236_v55  ;;  %v3278_v3 = vadd.f32 %v3262_v32, %v3238_v56 }
 0x5b6   : > { %7443 = vst [vmem:[#allocation11_spill] sm:$0xff] %v6347_v34  ;;  %v6369_v33 = vrot.slane %v6347_v34, %v7384_v44  ;;  %v6373_v59 = vadd.f32 %v2522_v38, %v2516_v19  ;;  %v6375_v13 = vadd.f32 %v2523_v41, %v2517_v10  ;;  %v3273_v10 = vadd.f32 %v3257_v54, %v6251_v29  ;;  %v7448_v41 = vld [vmem:[#allocation14_spill] sm:$0xff]  ;;  %v7450_v54 = vld [vmem:[#allocation35_spill] sm:$0xff] }
 0x5b7   : > { %v3300_v34 = vmul.f32 %v6365_v60, %v7446_v48  ;;  %v3302_v28 = vmul.f32 %v6365_v60, %v7447_v37  ;;  %v3275_v55 = vadd.f32 %v3259_v1, %v6255_v18  ;;  %v3256_v56 = vmul.f32 %v6301_v50, %v7427_v62  ;;  %v7449_v29 = vld [vmem:[#allocation34_spill] sm:$0xff] }
 0x5b8   : > { %7444 = vst [vmem:[#allocation31_spill] sm:$0xff] %v6373_v59  ;;  %7445 = vst [vmem:[#allocation33_spill] sm:$0xff] %v6375_v13  ;;  %v3301_v52 = vmul.f32 %v6369_v33, %v7446_v48  ;;  %v3303_v45 = vmul.f32 %v6369_v33, %v7447_v37  ;;  %v6387_v26 = vrot.slane %v6375_v13, %v7384_v44  ;;  %v7451_v62 = vld [vmem:[#allocation10_spill] sm:$0xff] }
 0x5b9   : > { %v6395_v19 = vrot.slane %v6373_v59, %v7384_v44  ;;  %v3258_v51 = vmul.f32 %v6301_v50, %v7429_v58  ;;  %v3316_v32 = vadd.f32 %v3300_v34, %v3276_v24  ;;  %v3318_v38 = vadd.f32 %v3302_v28, %v3278_v3  ;;  %v7452_v59 = vld [vmem:[#allocation43_spill] sm:$0xff] }
 0x5ba   : > { %v3317_v61 = vadd.f32 %v3301_v52, %v3277_v2  ;;  %v3319_v11 = vadd.f32 %v3303_v45, %v3279_v53  ;;  %v3297_v13 = vmul.f32 %v6369_v33, %v7448_v41  ;;  %v3299_v18 = vmul.f32 %v6369_v33, %v7449_v29 }
 0x5bb   : > { %v2611_v44 = vmul.f32 %v6387_v26, %v7446_v48  ;;  %v2613_v52 = vmul.f32 %v6387_v26, %v7447_v37  ;;  %v3332_v58 = vadd.f32 %v3316_v32, %v7450_v54  ;;  %v3334_v45 = vadd.f32 %v3318_v38, %v7451_v62 }
 0x5bc   : > { %v3333_v1 = vadd.f32 %v3317_v61, %v7450_v54  ;;  %v3335_v20 = vadd.f32 %v3319_v11, %v7451_v62  ;;  %v3313_v34 = vadd.f32 %v3297_v13, %v3273_v10  ;;  %v3315_v2 = vadd.f32 %v3299_v18, %v3275_v55 }
 0x5bd   : > { %v2627_v3 = vadd.f32 %v2611_v44, %v6257_v49  ;;  %v2629_v28 = vadd.f32 %v2613_v52, %v6259_v6  ;;  %v3348_v61 = vmax.f32 %v3332_v58, 0.0  ;;  %v3350_v11 = vmax.f32 %v3334_v45, 0.0 }
 0x5be   : > { %v3349_v53 = vmax.f32 %v3333_v1, 0.0  ;;  %v3351_v24 = vmax.f32 %v3335_v20, 0.0  ;;  %v3329_v9 = vadd.f32 %v3313_v34, %v7452_v59  ;;  %v3331_v30 = vadd.f32 %v3315_v2, %v7453_v36 }
 0x5bf   : > { %v2643_v17 = vadd.f32 %v2627_v3, %v7450_v54  ;;  %v2645_v32 = vadd.f32 %v2629_v28, %v7451_v62  ;;  %v2610_v13 = vmul.f32 %v6395_v19, %v7446_v48  ;;  %v3358_v10 = vpack.c.bf16 %v3350_v11, %v3348_v61 }
 0x5c0   : > { %v3359_v47 = vpack.c.bf16 %v3351_v24, %v3349_v53  ;;  %v3345_v20 = vmax.f32 %v3329_v9, 0.0  ;;  %v3347_v55 = vmax.f32 %v3331_v30, 0.0  ;;  %v2612_v6 = vmul.f32 %v6395_v19, %v7447_v37  ;;  %v7454_v24 = vld [vmem:[#allocation41_spill] sm:$0xff] }
 0x5c1   : > { %v2659_v49 = vmax.f32 %v2643_v17, 0.0  ;;  %v2661_v38 = vmax.f32 %v2645_v32, 0.0  ;;  %v2626_v18 = vadd.f32 %v2610_v13, %v6263_v63  ;;  %v2607_v1 = vmul.f32 %v6387_v26, %v7448_v41  ;;  %v7455_v13 = vld [vmem:[#allocation20_spill] sm:$0xff] }
 0x5c2   : > { %3368 = vmatprep.subr.bf16.mxu0 %v3359_v47  ;;  %v3357_v44 = vpack.c.bf16 %v3347_v55, %v3345_v20  ;;  %v2628_v52 = vadd.f32 %v2612_v6, %v6265_v46  ;;  %v2609_v48 = vmul.f32 %v6387_v26, %v7449_v29  ;;  %v3272_v30 = vadd.f32 %v3256_v56, %v6285_v43 }
 0x5c3   : > { %3369 = vmatpush1.bf16.msra.mxu0 %v3358_v10  ;;  %v2669_v9 = vpack.c.bf16 %v2661_v38, %v2659_v49  ;;  %v2642_v37 = vadd.f32 %v2626_v18, %v7450_v54  ;;  %v2623_v17 = vadd.f32 %v2607_v1, %v6267_v57  ;;  %v3274_v47 = vadd.f32 %v3258_v51, %v6289_v16  ;;  %v7456_v1 = vld [vmem:[#allocation48_spill] sm:$0xff] }
 0x5c4   : > { %3370 = vmatprep.subr.bf16.mxu0 %v3357_v44  ;;  %v2644_v63 = vadd.f32 %v2628_v52, %v7451_v62  ;;  %v2625_v58 = vadd.f32 %v2609_v48, %v6269_v14  ;;  %v3296_v46 = vmul.f32 %v6365_v60, %v7448_v41  ;;  %v3298_v45 = vmul.f32 %v6365_v60, %v7449_v29 }
 0x5c5   : > { %2678 = vmatprep.subr.bf16.mxu1 %v2669_v9  ;;  %v2658_v43 = vmax.f32 %v2642_v37, 0.0  ;;  %v2639_v56 = vadd.f32 %v2623_v17, %v7452_v59  ;;  %v3253_v57 = vmul.f32 %v6305_v22, %v7438_v27  ;;  %v3255_v16 = vmul.f32 %v6305_v22, %v7439_v31  ;;  %v7457_v37 = vld [vmem:[#allocation52_spill] sm:$0xff] }
 0x5c6   : > { %v2660_v51 = vmax.f32 %v2644_v63, 0.0  ;;  %v2641_v54 = vadd.f32 %v2625_v58, %v7453_v36  ;;  %v3312_v14 = vadd.f32 %v3296_v46, %v3272_v30  ;;  %v3314_v62 = vadd.f32 %v3298_v45, %v3274_v47 }
 0x5c7   : > { %v2655_v34 = vmax.f32 %v2639_v56, 0.0  ;;  %v3269_v2 = vadd.f32 %v3253_v57, %v6293_v23  ;;  %v3271_v53 = vadd.f32 %v3255_v16, %v6297_v5  ;;  %v3293_v3 = vmul.f32 %v6369_v33, %v7454_v24 }
 0x5c8   : > { %v2668_v28 = vpack.c.bf16 %v2660_v51, %v2658_v43  ;;  %v2657_v61 = vmax.f32 %v2641_v54, 0.0  ;;  %v3328_v11 = vadd.f32 %v3312_v14, %v7452_v59  ;;  %v3330_v32 = vadd.f32 %v3314_v62, %v7453_v36  ;;  %v7458_v62 = vld [vmem:[#allocation47_spill] sm:$0xff] }
 0x5c9   : > { %v3295_v10 = vmul.f32 %v6369_v33, %v7455_v13  ;;  %v3309_v20 = vadd.f32 %v3293_v3, %v3269_v2  ;;  %v2606_v55 = vmul.f32 %v6395_v19, %v7448_v41  ;;  %v2608_v23 = vmul.f32 %v6395_v19, %v7449_v29 }
 0x5ca   : > { %2679 = vmatpush1.bf16.msra.mxu1 %v2668_v28  ;;  %v2667_v5 = vpack.c.bf16 %v2657_v61, %v2655_v34  ;;  %v3344_v6 = vmax.f32 %v3328_v11, 0.0  ;;  %v3346_v49 = vmax.f32 %v3330_v32, 0.0  ;;  %v2603_v38 = vmul.f32 %v6387_v26, %v7454_v24  ;;  %v7460_v28 = vld [vmem:[#allocation49_spill] sm:$0xff]  ;;  %v7461_v32 = vld [vmem:[#allocation50_spill] sm:$0xff] }
 0x5cb   : > { %v3311_v18 = vadd.f32 %v3295_v10, %v3271_v53  ;;  %v3325_v44 = vadd.f32 %v3309_v20, %v7456_v1  ;;  %v2622_v52 = vadd.f32 %v2606_v55, %v6313_v15  ;;  %v2624_v48 = vadd.f32 %v2608_v23, %v6315_v12  ;;  %v7459_v53 = vld [vmem:[#allocation45_spill] sm:$0xff] }
 0x5cc   : > { %2680 = vmatprep.subr.bf16.mxu1 %v2667_v5  ;;  %v3356_v30 = vpack.c.bf16 %v3346_v49, %v3344_v6  ;;  %v2605_v41 = vmul.f32 %v6387_v26, %v7455_v13  ;;  %v2619_v29 = vadd.f32 %v2603_v38, %v6317_v40  ;;  %v3252_v9 = vmul.f32 %v6301_v50, %v7438_v27 }
 0x5cd   : > { %v3327_v17 = vadd.f32 %v3311_v18, %v7457_v37  ;;  %v3341_v47 = vmax.f32 %v3325_v44, 0.0  ;;  %v2638_v63 = vadd.f32 %v2622_v52, %v7452_v59  ;;  %v2640_v58 = vadd.f32 %v2624_v48, %v7453_v36  ;;  %v7463_v48 = vld [vmem:[#allocation29_spill] sm:$0xff] }
 0x5ce   : > { %3371 = vmatpush1.bf16.msra.mxu0 %v3356_v30  ;;  %v2621_v15 = vadd.f32 %v2605_v41, %v6319_v25  ;;  %v2635_v12 = vadd.f32 %v2619_v29, %v7456_v1  ;;  %v3254_v46 = vmul.f32 %v6301_v50, %v7439_v31  ;;  %v3268_v40 = vadd.f32 %v3252_v9, %v6323_v7  ;;  %v7464_v41 = vld [vmem:[#allocation46_spill] sm:$0xff] }
 0x5cf   : > { %v3343_v45 = vmax.f32 %v3327_v17, 0.0  ;;  %v2654_v43 = vmax.f32 %v2638_v63, 0.0  ;;  %v2656_v56 = vmax.f32 %v2640_v58, 0.0  ;;  %v3292_v57 = vmul.f32 %v6365_v60, %v7454_v24 }
 0x5d0   : > { %v2637_v59 = vadd.f32 %v2621_v15, %v7457_v37  ;;  %v2651_v16 = vmax.f32 %v2635_v12, 0.0  ;;  %v3270_v36 = vadd.f32 %v3254_v46, %v6327_v8  ;;  %v3294_v25 = vmul.f32 %v6365_v60, %v7455_v13 }
 0x5d1   : > { %v3355_v51 = vpack.c.bf16 %v3343_v45, %v3341_v47  ;;  %v2666_v54 = vpack.c.bf16 %v2656_v56, %v2654_v43  ;;  %v3308_v14 = vadd.f32 %v3292_v57, %v3268_v40  ;;  %v3249_v7 = vmul.f32 %v6305_v22, %v7458_v62  ;;  %v7466_v47 = vld [vmem:[#allocation28_spill] sm:$0xff]  ;;  %v7467_v56 = vld [vmem:[#allocation27_spill] sm:$0xff] }
 0x5d2   : > { %v2653_v34 = vmax.f32 %v2637_v59, 0.0  ;;  %v3310_v2 = vadd.f32 %v3294_v25, %v3270_v36  ;;  %v3251_v3 = vmul.f32 %v6305_v22, %v7459_v53  ;;  %v3289_v61 = vmul.f32 %v6369_v33, %v7460_v28 }
 0x5d3   : > { %3372 = vmatprep.subr.bf16.mxu0 %v3355_v51  ;;  %2681 = vmatpush1.bf16.msra.mxu1 %v2666_v54  ;;  %v3324_v8 = vadd.f32 %v3308_v14, %v7456_v1  ;;  %v3265_v11 = vadd.f32 %v3249_v7, %v6339_v35  ;;  %v3291_v10 = vmul.f32 %v6369_v33, %v7461_v32 }
 0x5d4   : > { %v2665_v20 = vpack.c.bf16 %v2653_v34, %v2651_v16  ;;  %v3326_v55 = vadd.f32 %v3310_v2, %v7457_v37  ;;  %v3267_v23 = vadd.f32 %v3251_v3, %v6343_v42  ;;  %v2562_v22 = vmul.f32 %v6167_v39, %v7438_v27  ;;  %v7462_v42 = vld [vmem:[#allocation53_spill] sm:$0xff] }
 0x5d5   : > { %v3340_v5 = vmax.f32 %v3324_v8, 0.0  ;;  %v3305_v6 = vadd.f32 %v3289_v61, %v3265_v11  ;;  %v2564_v49 = vmul.f32 %v6167_v39, %v7439_v31  ;;  %v2602_v38 = vmul.f32 %v6395_v19, %v7454_v24  ;;  %v7465_v24 = vld [vmem:[#allocation51_spill] sm:$0xff]  ;;  %v7468_v2 = vld [vmem:[#allocation17_spill] sm:$0xff] }
 0x5d6   : > { %2682 = vmatprep.subr.bf16.mxu1 %v2665_v20  ;;  %v3342_v35 = vmax.f32 %v3326_v55, 0.0  ;;  %v3307_v18 = vadd.f32 %v3291_v10, %v3267_v23  ;;  %v2578_v33 = vadd.f32 %v2562_v22, %v6357_v0  ;;  %v2604_v44 = vmul.f32 %v6395_v19, %v7455_v13 }
 0x5d7   : > { %v3321_v52 = vadd.f32 %v3305_v6, %v7462_v42  ;;  %v2580_v27 = vadd.f32 %v2564_v49, %v6361_v4  ;;  %v2535_v30 = vmul.f32 %v7463_v48, %v7440_v21  ;;  %v2537_v31 = vmul.f32 %v7463_v48, %v7464_v41 }
 0x5d8   : > { %v3354_v29 = vpack.c.bf16 %v3342_v35, %v3340_v5  ;;  %v3323_v9 = vadd.f32 %v3307_v18, %v7465_v24  ;;  %v2618_v17 = vadd.f32 %v2602_v38, %v2578_v33  ;;  %v2559_v0 = vmul.f32 %v7466_v47, %v7458_v62 }
 0x5d9   : > { %v3337_v63 = vmax.f32 %v3321_v52, 0.0  ;;  %v2620_v58 = vadd.f32 %v2604_v44, %v2580_v27  ;;  %v2561_v13 = vmul.f32 %v7466_v47, %v7459_v53  ;;  %v2599_v4 = vmul.f32 %v6387_v26, %v7460_v28  ;;  %v4749_v47 = vld [vmem:[%s7080_s3 + $0x40] sm:$0xff]  }
 0x5da   : > { %3373 = vmatpush1.bf16.msra.mxu0 %v3354_v29  ;;  %v3339_v15 = vmax.f32 %v3323_v9, 0.0  ;;  %v2634_v12 = vadd.f32 %v2618_v17, %v7456_v1  ;;  %v2575_v46 = vadd.f32 %v2559_v0, %v2535_v30  ;;  %v2601_v40 = vmul.f32 %v6387_v26, %v7461_v32  ;;  %v4745_v29 = vld [vmem:[%s7080_s3 + $0x20] sm:$0xff]   ;;  %v4747_v9 = vld [vmem:[%s7080_s3 + $0x30] sm:$0xff]   ;;  %v4748_v17 = vld [vmem:[%s7080_s3 + $0x38] sm:$0xff]  }
 0x5db   : > { %v2636_v45 = vadd.f32 %v2620_v58, %v7457_v37  ;;  %v2577_v43 = vadd.f32 %v2561_v13, %v2537_v31  ;;  %v3224_v57 = vmul.f32 %v7467_v56, %v7440_v21  ;;  %v3226_v59 = vmul.f32 %v7467_v56, %v7464_v41  ;;  %v4744_v31 = vld [vmem:[%s7080_s3 + $0x18] sm:$0xff]   ;;  %v4750_v0 = vld [vmem:[%s7080_s3 + $0x48] sm:$0xff]   ;;  %v4753_v13 = vld [vmem:[%s7080_s3 + $0x60] sm:$0xff]  }
 0x5dc   : > { %v3353_v16 = vpack.c.bf16 %v3339_v15, %v3337_v63  ;;  %v2650_v36 = vmax.f32 %v2634_v12, 0.0  ;;  %v2615_v25 = vadd.f32 %v2599_v4, %v2575_v46  ;;  %v3248_v51 = vmul.f32 %v6301_v50, %v7458_v62  ;;  %v4751_v63 = vld [vmem:[%s7080_s3 + $0x50] sm:$0xff]   ;;  %v4752_v58 = vld [vmem:[%s7080_s3 + $0x58] sm:$0xff]   ;;  %v4754_v4 = vld [vmem:[%s7080_s3 + $0x68] sm:$0xff]  }
 0x5dd   : > { %v2652_v1 = vmax.f32 %v2636_v45, 0.0  ;;  %v2617_v54 = vadd.f32 %v2601_v40, %v2577_v43  ;;  %v3250_v26 = vmul.f32 %v6301_v50, %v7459_v53  ;;  %v3288_v37 = vmul.f32 %v6365_v60, %v7460_v28  ;;  %v4755_v15 = vld [vmem:[%s7080_s3 + $0x70] sm:$0xff]   ;;  %v4756_v12 = vld [vmem:[%s7080_s3 + $0x78] sm:$0xff]  }
 0x5de   : > { %3374 = vmatprep.subr.bf16.mxu0 %v3353_v16  ;;  %v2631_v14 = vadd.f32 %v2615_v25, %v7462_v42  ;;  %v3264_v7 = vadd.f32 %v3248_v51, %v3224_v57  ;;  %v3290_v34 = vmul.f32 %v6365_v60, %v7461_v32  ;;  %v2534_v3 = vmul.f32 %v7468_v2, %v7440_v21  ;;  %v7470_v40 = vld [vmem:[#allocation72_spill] sm:$0xff]  ;;  %v7471_v51 = vld [vmem:[#allocation70_spill] sm:$0xff] }
 0x5df   : > { %v2664_v61 = vpack.c.bf16 %v2652_v1, %v2650_v36  ;;  %v2633_v8 = vadd.f32 %v2617_v54, %v7465_v24  ;;  %v3266_v11 = vadd.f32 %v3250_v26, %v3226_v59  ;;  %v2536_v50 = vmul.f32 %v7468_v2, %v7464_v41  ;;  %v4743_v41 = vld [vmem:[%s7080_s3 + $0x10] sm:$0xff]  }
 0x5e0   : > { %v2647_v10 = vmax.f32 %v2631_v14, 0.0  ;;  %v3304_v20 = vadd.f32 %v3288_v37, %v3264_v7  ;;  %v2558_v55 = vmul.f32 %v6167_v39, %v7458_v62  ;;  %v2560_v23 = vmul.f32 %v6167_v39, %v7459_v53 }
 0x5e1   : > { %2683 = vmatpush1.bf16.msra.mxu1 %v2664_v61  ;;  %v2649_v60 = vmax.f32 %v2633_v8, 0.0  ;;  %v3306_v22 = vadd.f32 %v3290_v34, %v3266_v11  ;;  %v2598_v21 = vmul.f32 %v6395_v19, %v7460_v28  ;;  %v2600_v5 = vmul.f32 %v6395_v19, %v7461_v32  ;;  %v4741_v32 = vld [vmem:[%s7080_s3] sm:$0xff]  }
 0x5e2   : > { %v3320_v6 = vadd.f32 %v3304_v20, %v7462_v42  ;;  %v2574_v49 = vadd.f32 %v2558_v55, %v2534_v3  ;;  %v2576_v38 = vadd.f32 %v2560_v23, %v2536_v50  ;;  %v7469_v30 = vmov 0  }
 0x5e3   : > { %v2663_v35 = vpack.c.bf16 %v2649_v60, %v2647_v10  ;;  %v3322_v18 = vadd.f32 %v3306_v22, %v7465_v24  ;;  %v7472_v10 = vld [vmem:[#allocation68_spill] sm:$0xff] }
 0x5e4   : > { %v3336_v62 = vmax.f32 %v3320_v6, 0.0  ;;  %v2614_v33 = vadd.f32 %v2598_v21, %v2574_v49  ;;  %v2616_v44 = vadd.f32 %v2600_v5, %v2576_v38 }
 0x5e5   : > { %2684 = vmatprep.subr.bf16.mxu1 %v2663_v35  ;;  %v3338_v39 = vmax.f32 %v3322_v18, 0.0 }
 0x5e6   : > { %v2630_v53 = vadd.f32 %v2614_v33, %v7462_v42  ;;  %v2632_v52 = vadd.f32 %v2616_v44, %v7465_v24  ;;  %v4742_v42 = vld [vmem:[%s7080_s3 + $0x8] sm:$0xff]   ;;  %v7473_v44 = vld [vmem:[#allocation67_spill] sm:$0xff] }
 0x5e7   : > { %v3352_v28 = vpack.c.bf16 %v3338_v39, %v3336_v62  ;;  %v4746_v24 = vld [vmem:[%s7080_s3 + $0x28] sm:$0xff]  }
 0x5e8   : > { %v2646_v27 = vmax.f32 %v2630_v53, 0.0  ;;  %v2648_v48 = vmax.f32 %v2632_v52, 0.0 }
 0x5e9   : > { %3375 = vmatpush1.bf16.msra.mxu0 %v3352_v28 }
 0x5ea   : > { %v2662_v19 = vpack.c.bf16 %v2648_v48, %v2646_v27 }
 0x5ec   : > { %2685 = vmatpush1.bf16.msra.mxu1 %v2662_v19  ;;  %4400 = vmatmul.mubr.msk.bf16.vlgmr.msra.gmra.mxu0 %vm1061_vm0, %v4741_v32 }
 0x5ed   : > { %3402 = vmatprep.mubr.bf16.mxu0 %v7469_v30 }
 0x5ef   : > { %4382 = vmatmul.mubr.msk.bf16.vlgmr.msra.gmra.mxu1 %vm1061_vm0, %v4741_v32 }
 0x5f0   : > { %2712 = vmatprep.mubr.bf16.mxu1 %v7469_v30 }
 0x5f4   : > { %4401 = vmatmul.mubr.msk.bf16.gmra.mxu0 %vm1061_vm0, %v4742_v42 }
 0x5f5   : > { %3412 = vmatprep.mubr.bf16.mxu0 %v7469_v30 }
 0x5f7   : > { %4383 = vmatmul.mubr.msk.bf16.gmra.mxu1 %vm1061_vm0, %v4742_v42 }
 0x5f8   : > { %2722 = vmatprep.mubr.bf16.mxu1 %v7469_v30 }
 0x5fc   : > { %4402 = vmatmul.mubr.msk.bf16.gmra.mxu0 %vm1061_vm0, %v4743_v41 }
 0x5fd   : > { %3422 = vmatprep.mubr.bf16.mxu0 %v7469_v30 }
 0x5ff   : > { %4384 = vmatmul.mubr.msk.bf16.gmra.mxu1 %vm1061_vm0, %v4743_v41 }
 0x600   : > { %2732 = vmatprep.mubr.bf16.mxu1 %v7469_v30 }
 0x604   : > { %4403 = vmatmul.mubr.msk.bf16.gmra.mxu0 %vm1061_vm0, %v4744_v31 }
 0x605   : > { %3432 = vmatprep.mubr.bf16.mxu0 %v7469_v30 }
 0x607   : > { %4385 = vmatmul.mubr.msk.bf16.gmra.mxu1 %vm1061_vm0, %v4744_v31 }
 0x608   : > { %2742 = vmatprep.mubr.bf16.mxu1 %v7469_v30 }
 0x60c   : > { %4404 = vmatmul.mubr.msk.bf16.gmra.mxu0 %vm1061_vm0, %v4745_v29 }
 0x60d   : > { %3442 = vmatprep.mubr.bf16.mxu0 %v7469_v30 }
 0x60f   : > { %4386 = vmatmul.mubr.msk.bf16.gmra.mxu1 %vm1061_vm0, %v4745_v29 }
 0x610   : > { %2752 = vmatprep.mubr.bf16.mxu1 %v7469_v30 }
 0x614   : > { %4405 = vmatmul.mubr.msk.bf16.gmra.mxu0 %vm1061_vm0, %v4746_v24 }
 0x615   : > { %3452 = vmatprep.mubr.bf16.mxu0 %v7469_v30 }
 0x617   : > { %4387 = vmatmul.mubr.msk.bf16.gmra.mxu1 %vm1061_vm0, %v4746_v24 }
 0x618   : > { %2762 = vmatprep.mubr.bf16.mxu1 %v7469_v30 }
 0x61c   : > { %4406 = vmatmul.mubr.msk.bf16.gmra.mxu0 %vm1061_vm0, %v4747_v9 }
 0x61d   : > { %3462 = vmatprep.mubr.bf16.mxu0 %v7469_v30 }
 0x61f   : > { %4388 = vmatmul.mubr.msk.bf16.gmra.mxu1 %vm1061_vm0, %v4747_v9 }
 0x620   : > { %2772 = vmatprep.mubr.bf16.mxu1 %v7469_v30 }
 0x624   : > { %4407 = vmatmul.mubr.msk.bf16.gmra.mxu0 %vm1061_vm0, %v4748_v17 }
 0x625   : > { %3472 = vmatprep.mubr.bf16.mxu0 %v7469_v30 }
 0x627   : > { %4389 = vmatmul.mubr.msk.bf16.gmra.mxu1 %vm1061_vm0, %v4748_v17  ;;  %v7474_v17 = vld [vmem:[#allocation66_spill] sm:$0xff] }
 0x628   : > { %2782 = vmatprep.mubr.bf16.mxu1 %v7469_v30 }
 0x62c   : > { %4408 = vmatmul.mubr.msk.bf16.gmra.mxu0 %vm1061_vm0, %v4749_v47 }
 0x62d   : > { %3482 = vmatprep.mubr.bf16.mxu0 %v7469_v30 }
 0x62f   : > { %4390 = vmatmul.mubr.msk.bf16.gmra.mxu1 %vm1061_vm0, %v4749_v47 }
 0x630   : > { %2792 = vmatprep.mubr.bf16.mxu1 %v7469_v30 }
 0x634   : > { %4409 = vmatmul.mubr.msk.bf16.gmra.mxu0 %vm1061_vm0, %v4750_v0 }
 0x635   : > { %3492 = vmatprep.mubr.bf16.mxu0 %v7469_v30 }
 0x637   : > { %4391 = vmatmul.mubr.msk.bf16.gmra.mxu1 %vm1061_vm0, %v4750_v0 }
 0x638   : > { %2802 = vmatprep.mubr.bf16.mxu1 %v7469_v30 }
 0x63c   : > { %4410 = vmatmul.mubr.msk.bf16.gmra.mxu0 %vm1061_vm0, %v4751_v63 }
 0x63d   : > { %3502 = vmatprep.mubr.bf16.mxu0 %v7469_v30 }
 0x63f   : > { %4392 = vmatmul.mubr.msk.bf16.gmra.mxu1 %vm1061_vm0, %v4751_v63 }
 0x640   : > { %2812 = vmatprep.mubr.bf16.mxu1 %v7469_v30 }
 0x644   : > { %4411 = vmatmul.mubr.msk.bf16.gmra.mxu0 %vm1061_vm0, %v4752_v58 }
 0x645   : > { %3512 = vmatprep.mubr.bf16.mxu0 %v7469_v30 }
 0x647   : > { %4393 = vmatmul.mubr.msk.bf16.gmra.mxu1 %vm1061_vm0, %v4752_v58 }
 0x648   : > { %2822 = vmatprep.mubr.bf16.mxu1 %v7469_v30 }
 0x64c   : > { %4412 = vmatmul.mubr.msk.bf16.gmra.mxu0 %vm1061_vm0, %v4753_v13 }
 0x64d   : > { %3522 = vmatprep.mubr.bf16.mxu0 %v7469_v30 }
 0x64f   : > { %4394 = vmatmul.mubr.msk.bf16.gmra.mxu1 %vm1061_vm0, %v4753_v13 }
 0x650   : > { %2832 = vmatprep.mubr.bf16.mxu1 %v7469_v30 }
 0x654   : > { %4413 = vmatmul.mubr.msk.bf16.gmra.mxu0 %vm1061_vm0, %v4754_v4 }
 0x655   : > { %3532 = vmatprep.mubr.bf16.mxu0 %v7469_v30 }
 0x657   : > { %4395 = vmatmul.mubr.msk.bf16.gmra.mxu1 %vm1061_vm0, %v4754_v4 }
 0x658   : > { %2842 = vmatprep.mubr.bf16.mxu1 %v7469_v30 }
 0x65c   : > { %4414 = vmatmul.mubr.msk.bf16.gmra.mxu0 %vm1061_vm0, %v4755_v15 }
 0x65d   : > { %3542 = vmatprep.mubr.bf16.mxu0 %v7469_v30 }
 0x65f   : > { %4396 = vmatmul.mubr.msk.bf16.gmra.mxu1 %vm1061_vm0, %v4755_v15 }
 0x660   : > { %2852 = vmatprep.mubr.bf16.mxu1 %v7469_v30 }
 0x664   : > { %4415 = vmatmul.mubr.msk.bf16.gmra.mxu0 %vm1061_vm0, %v4756_v12 }
 0x667   : > { %4397 = vmatmul.mubr.msk.bf16.gmra.mxu1 %vm1061_vm0, %v4756_v12 }
 0x6ac   : > { %v3394_v46 = vpop.f32.mrf.mxu0 }
 0x6ad   : > { %v3395_v45 = vadd.f32 %v3394_v46, %v7470_v40 }
 0x6ae   : > { %v3396_v43 = vpop.f32.mrf.mxu0 }
 0x6af   : > { %v3397_v56 = vadd.f32 %v3396_v43, %v7470_v40  ;;  %v2704_v57 = vpop.f32.mrf.mxu1  ;;  %v3553_v36 = vmax.f32 %v3395_v45, 0.0 }
 0x6b0   : > { %v2705_v59 = vadd.f32 %v2704_v57, %v7470_v40  ;;  %v3398_v16 = vpop.f32.mrf.mxu0 }
 0x6b1   : > { %v3554_v25 = vmax.f32 %v3397_v56, 0.0  ;;  %v3399_v1 = vadd.f32 %v3398_v16, %v7471_v51  ;;  %v2706_v54 = vpop.f32.mrf.mxu1 }
 0x6b2   : > { %v2707_v26 = vadd.f32 %v2706_v54, %v7470_v40  ;;  %v3400_v37 = vpop.f32.mrf.mxu0  ;;  %v2863_v2 = vmax.f32 %v2705_v59, 0.0  ;;  %v7475_v59 = vld [vmem:[#allocation65_spill] sm:$0xff] }
 0x6b3   : > { %v6662_v14 = vmax.f32 %v3553_v36, %v3554_v25  ;;  %v3401_v7 = vadd.f32 %v3400_v37, %v7471_v51  ;;  %v2708_v34 = vpop.f32.mrf.mxu1  ;;  %v3555_v11 = vmax.f32 %v3399_v1, 0.0 }
 0x6b4   : > { %v2864_v3 = vmax.f32 %v2707_v26, 0.0  ;;  %v2709_v61 = vadd.f32 %v2708_v34, %v7471_v51  ;;  %v3404_v8 = vpop.f32.mrf.mxu0 }
 0x6b5   : > { %v3556_v50 = vmax.f32 %v3401_v7, 0.0  ;;  %v3405_v20 = vadd.f32 %v3404_v8, %v7472_v10  ;;  %v2710_v55 = vpop.f32.mrf.mxu1 }
 0x6b6   : > { %v6667_v23 = vmax.f32 %v2863_v2, %v2864_v3  ;;  %v2711_v60 = vadd.f32 %v2710_v55, %v7471_v51  ;;  %v3406_v22 = vpop.f32.mrf.mxu0  ;;  %v2865_v49 = vmax.f32 %v2709_v61, 0.0 }
 0x6b7   : > { %v6670_v21 = vmax.f32 %v3555_v11, %v3556_v50  ;;  %v3407_v5 = vadd.f32 %v3406_v22, %v7472_v10  ;;  %v2714_v6 = vpop.f32.mrf.mxu1  ;;  %v3557_v62 = vmax.f32 %v3405_v20, 0.0  ;;  %v7476_v11 = vld [vmem:[#allocation64_spill] sm:$0xff] }
 0x6b8   : > { %v2866_v38 = vmax.f32 %v2711_v60, 0.0  ;;  %v2715_v35 = vadd.f32 %v2714_v6, %v7472_v10  ;;  %v3408_v18 = vpop.f32.mrf.mxu0 }
 0x6b9   : > { %v3558_v33 = vmax.f32 %v3407_v5, 0.0  ;;  %v3409_v39 = vadd.f32 %v3408_v18, %v7473_v44  ;;  %v2716_v53 = vpop.f32.mrf.mxu1 }
 0x6ba   : > { %v6675_v52 = vmax.f32 %v2865_v49, %v2866_v38  ;;  %v2717_v28 = vadd.f32 %v2716_v53, %v7472_v10  ;;  %v3410_v27 = vpop.f32.mrf.mxu0  ;;  %v2867_v42 = vmax.f32 %v2715_v35, 0.0 }
 0x6bb   : > { %v6678_v48 = vmax.f32 %v3557_v62, %v3558_v33  ;;  %v3411_v19 = vadd.f32 %v3410_v27, %v7473_v44  ;;  %v2718_v32 = vpop.f32.mrf.mxu1  ;;  %v3559_v24 = vmax.f32 %v3409_v39, 0.0 }
 0x6bc   : > { %v2868_v41 = vmax.f32 %v2717_v28, 0.0  ;;  %v2719_v31 = vadd.f32 %v2718_v32, %v7473_v44  ;;  %v3414_v29 = vpop.f32.mrf.mxu0 }
 0x6bd   : > { %v3560_v9 = vmax.f32 %v3411_v19, 0.0  ;;  %v3415_v47 = vadd.f32 %v3414_v29, %v7474_v17  ;;  %v2720_v0 = vpop.f32.mrf.mxu1 }
 0x6be   : > { %v6683_v63 = vmax.f32 %v2867_v42, %v2868_v41  ;;  %v2721_v58 = vadd.f32 %v2720_v0, %v7473_v44  ;;  %v3416_v13 = vpop.f32.mrf.mxu0  ;;  %v2869_v46 = vmax.f32 %v2719_v31, 0.0  ;;  %v7477_v44 = vld [vmem:[#allocation63_spill] sm:$0xff]  ;;  %v7478_v0 = vld [vmem:[#allocation62_spill] sm:$0xff] }
 0x6bf   : > { %v6686_v4 = vmax.f32 %v3559_v24, %v3560_v9  ;;  %v3417_v15 = vadd.f32 %v3416_v13, %v7474_v17  ;;  %v2724_v12 = vpop.f32.mrf.mxu1  ;;  %v3561_v56 = vmax.f32 %v3415_v47, 0.0 }
 0x6c0   : > { %v2870_v40 = vmax.f32 %v2721_v58, 0.0  ;;  %v2725_v45 = vadd.f32 %v2724_v12, %v7474_v17  ;;  %v3418_v43 = vpop.f32.mrf.mxu0 }
 0x6c1   : > { %v3562_v57 = vmax.f32 %v3417_v15, 0.0  ;;  %v3419_v16 = vadd.f32 %v3418_v43, %v7475_v59  ;;  %v2726_v36 = vpop.f32.mrf.mxu1 }
 0x6c2   : > { %v6691_v25 = vmax.f32 %v2869_v46, %v2870_v40  ;;  %v2727_v51 = vadd.f32 %v2726_v36, %v7474_v17  ;;  %v3420_v1 = vpop.f32.mrf.mxu0  ;;  %v2871_v7 = vmax.f32 %v2725_v45, 0.0 }
 0x6c3   : > { %v3629_v54 = vmax.f32 %v3561_v56, %v3562_v57  ;;  %v3421_v26 = vadd.f32 %v3420_v1, %v7475_v59  ;;  %v2728_v37 = vpop.f32.mrf.mxu1  ;;  %v3563_v61 = vmax.f32 %v3419_v16, 0.0  ;;  %v7479_v1 = vld [vmem:[#allocation61_spill] sm:$0xff] }
 0x6c4   : > { %v2872_v34 = vmax.f32 %v2727_v51, 0.0  ;;  %v2729_v2 = vadd.f32 %v2728_v37, %v7475_v59  ;;  %v3424_v3 = vpop.f32.mrf.mxu0 }
 0x6c5   : > { %v3564_v8 = vmax.f32 %v3421_v26, 0.0  ;;  %v3425_v50 = vadd.f32 %v3424_v3, %v7476_v11  ;;  %v2730_v10 = vpop.f32.mrf.mxu1  ;;  %3630 = vmax.xlane.f32.xlu1 %v3629_v54 }
 0x6c6   : > { %v2939_v20 = vmax.f32 %v2871_v7, %v2872_v34  ;;  %v2731_v55 = vadd.f32 %v2730_v10, %v7475_v59  ;;  %v3426_v60 = vpop.f32.mrf.mxu0  ;;  %v2873_v49 = vmax.f32 %v2729_v2, 0.0 }
 0x6c7   : > { %v3632_v22 = vmax.f32 %v3563_v61, %v3564_v8  ;;  %v3427_v5 = vadd.f32 %v3426_v60, %v7476_v11  ;;  %v2734_v6 = vpop.f32.mrf.mxu1  ;;  %v3565_v62 = vmax.f32 %v3425_v50, 0.0  ;;  %v7480_v60 = vld [vmem:[#allocation60_spill] sm:$0xff] }
 0x6c8   : > { %v2874_v38 = vmax.f32 %v2731_v55, 0.0  ;;  %v2735_v35 = vadd.f32 %v2734_v6, %v7476_v11  ;;  %2940 = vmax.xlane.f32.xlu0 %v2939_v20  ;;  %v3428_v18 = vpop.f32.mrf.mxu0 }
 0x6c9   : > { %v3566_v33 = vmax.f32 %v3427_v5, 0.0  ;;  %v3429_v39 = vadd.f32 %v3428_v18, %v7477_v44  ;;  %v2736_v53 = vpop.f32.mrf.mxu1  ;;  %3633 = vmax.xlane.f32.xlu1 %v3632_v22 }
 0x6ca   : > { %v2942_v28 = vmax.f32 %v2873_v49, %v2874_v38  ;;  %v2737_v27 = vadd.f32 %v2736_v53, %v7476_v11  ;;  %v3430_v19 = vpop.f32.mrf.mxu0  ;;  %v2875_v31 = vmax.f32 %v2735_v35, 0.0 }
 0x6cb   : > { %v3635_v32 = vmax.f32 %v3565_v62, %v3566_v33  ;;  %v3431_v42 = vadd.f32 %v3430_v19, %v7477_v44  ;;  %v2738_v41 = vpop.f32.mrf.mxu1  ;;  %v3567_v17 = vmax.f32 %v3429_v39, 0.0  ;;  %v7481_v19 = vld [vmem:[#allocation59_spill] sm:$0xff] }
 0x6cc   : > { %v2876_v29 = vmax.f32 %v2737_v27, 0.0  ;;  %v2739_v24 = vadd.f32 %v2738_v41, %v7477_v44  ;;  %2943 = vmax.xlane.f32.xlu0 %v2942_v28  ;;  %v3434_v9 = vpop.f32.mrf.mxu0 }
 0x6cd   : > { %v3568_v47 = vmax.f32 %v3431_v42, 0.0  ;;  %v3435_v58 = vadd.f32 %v3434_v9, %v7478_v0  ;;  %v2740_v13 = vpop.f32.mrf.mxu1  ;;  %3636 = vmax.xlane.f32.xlu1 %v3635_v32 }
 0x6ce   : > { %v2945_v15 = vmax.f32 %v2875_v31, %v2876_v29  ;;  %v2741_v12 = vadd.f32 %v2740_v13, %v7477_v44  ;;  %v3436_v46 = vpop.f32.mrf.mxu0  ;;  %v2877_v56 = vmax.f32 %v2739_v24, 0.0 }
 0x6cf   : > { %v3638_v40 = vmax.f32 %v3567_v17, %v3568_v47  ;;  %v3437_v45 = vadd.f32 %v3436_v46, %v7478_v0  ;;  %v2744_v43 = vpop.f32.mrf.mxu1  ;;  %v3569_v36 = vmax.f32 %v3435_v58, 0.0  ;;  %v7482_v46 = vld [vmem:[#allocation58_spill] sm:$0xff] }
 0x6d0   : > { %v2878_v57 = vmax.f32 %v2741_v12, 0.0  ;;  %v2745_v59 = vadd.f32 %v2744_v43, %v7478_v0  ;;  %2946 = vmax.xlane.f32.xlu0 %v2945_v15  ;;  %v3438_v16 = vpop.f32.mrf.mxu0 }
 0x6d1   : > { %v3570_v51 = vmax.f32 %v3437_v45, 0.0  ;;  %v3439_v54 = vadd.f32 %v3438_v16, %v7479_v1  ;;  %v2746_v26 = vpop.f32.mrf.mxu1  ;;  %3639 = vmax.xlane.f32.xlu1 %v3638_v40 }
 0x6d2   : > { %v2948_v37 = vmax.f32 %v2877_v56, %v2878_v57  ;;  %v2747_v7 = vadd.f32 %v2746_v26, %v7478_v0  ;;  %v3440_v34 = vpop.f32.mrf.mxu0  ;;  %v2879_v8 = vmax.f32 %v2745_v59, 0.0 }
 0x6d3   : > { %v3641_v2 = vmax.f32 %v3569_v36, %v3570_v51  ;;  %v3441_v3 = vadd.f32 %v3440_v34, %v7479_v1  ;;  %v2748_v61 = vpop.f32.mrf.mxu1  ;;  %v3571_v20 = vmax.f32 %v3439_v54, 0.0  ;;  %v7483_v34 = vld [vmem:[#allocation57_spill] sm:$0xff] }
 0x6d4   : > { %v2880_v11 = vmax.f32 %v2747_v7, 0.0  ;;  %v2749_v50 = vadd.f32 %v2748_v61, %v7479_v1  ;;  %2949 = vmax.xlane.f32.xlu0 %v2948_v37  ;;  %v3444_v10 = vpop.f32.mrf.mxu0 }
 0x6d5   : > { %v3572_v55 = vmax.f32 %v3441_v3, 0.0  ;;  %v3445_v22 = vadd.f32 %v3444_v10, %v7480_v60  ;;  %v2750_v5 = vpop.f32.mrf.mxu1  ;;  %3642 = vmax.xlane.f32.xlu1 %v3641_v2 }
 0x6d6   : > { %v2951_v6 = vmax.f32 %v2879_v8, %v2880_v11  ;;  %v2751_v49 = vadd.f32 %v2750_v5, %v7479_v1  ;;  %v3446_v38 = vpop.f32.mrf.mxu0  ;;  %v2881_v33 = vmax.f32 %v2749_v50, 0.0 }
 0x6d7   : > { %v3644_v35 = vmax.f32 %v3571_v20, %v3572_v55  ;;  %v3447_v18 = vadd.f32 %v3446_v38, %v7480_v60  ;;  %v2754_v62 = vpop.f32.mrf.mxu1  ;;  %v3573_v28 = vmax.f32 %v3445_v22, 0.0  ;;  %v4879_v55 = vmov 8  }
 0x6d8   : > { %v2882_v44 = vmax.f32 %v2751_v49, 0.0  ;;  %v2755_v39 = vadd.f32 %v2754_v62, %v7480_v60  ;;  %2952 = vmax.xlane.f32.xlu0 %v2951_v6  ;;  %v3448_v53 = vpop.f32.mrf.mxu0  ;;  %4706 = vset.pattern.permute.xlu1 %v4879_v55 }
 0x6d9   : > { %v3574_v27 = vmax.f32 %v3447_v18, 0.0  ;;  %v3449_v32 = vadd.f32 %v3448_v53, %v7481_v19  ;;  %v2756_v42 = vpop.f32.mrf.mxu1  ;;  %3645 = vmax.xlane.f32.xlu1 %v3644_v35  ;;  %4705 = vset.pattern.permute.xlu0 %v4879_v55  ;;  %v7484_v35 = vld [vmem:[#allocation56_spill] sm:$0xff] }
 0x6da   : > { %v2954_v41 = vmax.f32 %v2881_v33, %v2882_v44  ;;  %v2757_v31 = vadd.f32 %v2756_v42, %v7480_v60  ;;  %v3450_v29 = vpop.f32.mrf.mxu0  ;;  %v2883_v47 = vmax.f32 %v2755_v39, 0.0 }
 0x6db   : > { %v3647_v24 = vmax.f32 %v3573_v28, %v3574_v27  ;;  %v3451_v9 = vadd.f32 %v3450_v29, %v7481_v19  ;;  %v2758_v17 = vpop.f32.mrf.mxu1  ;;  %v3575_v15 = vmax.f32 %v3449_v32, 0.0 }
 0x6dc   : > { %v2884_v0 = vmax.f32 %v2757_v31, 0.0  ;;  %v2759_v58 = vadd.f32 %v2758_v17, %v7481_v19  ;;  %2955 = vmax.xlane.f32.xlu0 %v2954_v41  ;;  %v3454_v13 = vpop.f32.mrf.mxu0 }
 0x6dd   : > { %v3576_v12 = vmax.f32 %v3451_v9, 0.0  ;;  %v3455_v40 = vadd.f32 %v3454_v13, %v7482_v46  ;;  %v2760_v45 = vpop.f32.mrf.mxu1  ;;  %3648 = vmax.xlane.f32.xlu1 %v3647_v24  ;;  %v7485_v24 = vld [vmem:[#allocation69_spill] sm:$0xff] }
 0x6de   : > { %v2957_v43 = vmax.f32 %v2883_v47, %v2884_v0  ;;  %v2761_v56 = vadd.f32 %v2760_v45, %v7481_v19  ;;  %v3456_v57 = vpop.f32.mrf.mxu0  ;;  %v2885_v51 = vmax.f32 %v2759_v58, 0.0 }
 0x6df   : > { %v3650_v59 = vmax.f32 %v3575_v15, %v3576_v12  ;;  %v3457_v16 = vadd.f32 %v3456_v57, %v7482_v46  ;;  %v2764_v36 = vpop.f32.mrf.mxu1  ;;  %v3577_v37 = vmax.f32 %v3455_v40, 0.0 }
 0x6e0   : > { %v2886_v1 = vmax.f32 %v2761_v56, 0.0  ;;  %v2765_v54 = vadd.f32 %v2764_v36, %v7482_v46  ;;  %2958 = vmax.xlane.f32.xlu0 %v2957_v43  ;;  %v3458_v26 = vpop.f32.mrf.mxu0 }
 0x6e1   : > { %v3578_v7 = vmax.f32 %v3457_v16, 0.0  ;;  %v3459_v2 = vadd.f32 %v3458_v26, %v7483_v34  ;;  %v2766_v3 = vpop.f32.mrf.mxu1  ;;  %3651 = vmax.xlane.f32.xlu1 %v3650_v59  ;;  %v7486_v59 = vld [vmem:[#allocation85_spill] sm:$0xff] }
 0x6e2   : > { %v2960_v61 = vmax.f32 %v2885_v51, %v2886_v1  ;;  %v2767_v8 = vadd.f32 %v2766_v3, %v7482_v46  ;;  %v3460_v11 = vpop.f32.mrf.mxu0  ;;  %v2887_v60 = vmax.f32 %v2765_v54, 0.0 }
 0x6e3   : > { %v3653_v50 = vmax.f32 %v3577_v37, %v3578_v7  ;;  %v3461_v10 = vadd.f32 %v3460_v11, %v7483_v34  ;;  %v2768_v20 = vpop.f32.mrf.mxu1  ;;  %v3579_v49 = vmax.f32 %v3459_v2, 0.0 }
 0x6e4   : > { %v2888_v22 = vmax.f32 %v2767_v8, 0.0  ;;  %v2769_v5 = vadd.f32 %v2768_v20, %v7483_v34  ;;  %2961 = vmax.xlane.f32.xlu0 %v2960_v61  ;;  %v3464_v6 = vpop.f32.mrf.mxu0 }
 0x6e5   : > { %v3580_v38 = vmax.f32 %v3461_v10, 0.0  ;;  %v3465_v18 = vadd.f32 %v3464_v6, %v7484_v35  ;;  %v2770_v62 = vpop.f32.mrf.mxu1  ;;  %3654 = vmax.xlane.f32.xlu1 %v3653_v50  ;;  %v7487_v50 = vld [vmem:[#allocation84_spill] sm:$0xff] }
 0x6e6   : > { %v2963_v33 = vmax.f32 %v2887_v60, %v2888_v22  ;;  %v2771_v44 = vadd.f32 %v2770_v62, %v7483_v34  ;;  %v3466_v39 = vpop.f32.mrf.mxu0  ;;  %v2889_v19 = vmax.f32 %v2769_v5, 0.0 }
 0x6e7   : > { %v3656_v53 = vmax.f32 %v3579_v49, %v3580_v38  ;;  %v3467_v28 = vadd.f32 %v3466_v39, %v7484_v35  ;;  %v2774_v27 = vpop.f32.mrf.mxu1  ;;  %v3581_v31 = vmax.f32 %v3465_v18, 0.0  ;;  %v7488_v39 = vld [vmem:[#allocation83_spill] sm:$0xff] }
 0x6e8   : > { %v2890_v32 = vmax.f32 %v2771_v44, 0.0  ;;  %v2775_v42 = vadd.f32 %v2774_v27, %v7484_v35  ;;  %2964 = vmax.xlane.f32.xlu0 %v2963_v33  ;;  %v3468_v41 = vpop.f32.mrf.mxu0 }
 0x6e9   : > { %v3582_v29 = vmax.f32 %v3467_v28, 0.0  ;;  %v3469_v9 = vadd.f32 %v3468_v41, %v7485_v24  ;;  %v2776_v17 = vpop.f32.mrf.mxu1  ;;  %3657 = vmax.xlane.f32.xlu1 %v3656_v53 }
 0x6ea   : > { %v2966_v47 = vmax.f32 %v2889_v19, %v2890_v32  ;;  %v2777_v0 = vadd.f32 %v2776_v17, %v7484_v35  ;;  %v3470_v58 = vpop.f32.mrf.mxu0  ;;  %v2891_v46 = vmax.f32 %v2775_v42, 0.0 }
 0x6eb   : > { %v3659_v13 = vmax.f32 %v3581_v31, %v3582_v29  ;;  %v3471_v15 = vadd.f32 %v3470_v58, %v7485_v24  ;;  %v2778_v12 = vpop.f32.mrf.mxu1  ;;  %v3583_v56 = vmax.f32 %v3469_v9, 0.0 }
 0x6ec   : > { %v2892_v40 = vmax.f32 %v2777_v0, 0.0  ;;  %v2779_v45 = vadd.f32 %v2778_v12, %v7485_v24  ;;  %2967 = vmax.xlane.f32.xlu0 %v2966_v47  ;;  %v3474_v43 = vpop.f32.mrf.mxu0 }
 0x6ed   : > { %v3584_v57 = vmax.f32 %v3471_v15, 0.0  ;;  %v3475_v16 = vadd.f32 %v3474_v43, %v7486_v59  ;;  %v2780_v36 = vpop.f32.mrf.mxu1  ;;  %3660 = vmax.xlane.f32.xlu1 %v3659_v13 }
 0x6ee   : > { %v2969_v51 = vmax.f32 %v2891_v46, %v2892_v40  ;;  %v2781_v1 = vadd.f32 %v2780_v36, %v7485_v24  ;;  %v3476_v54 = vpop.f32.mrf.mxu0  ;;  %v2893_v34 = vmax.f32 %v2779_v45, 0.0 }
 0x6ef   : > { %v3662_v26 = vmax.f32 %v3583_v56, %v3584_v57  ;;  %v3477_v37 = vadd.f32 %v3476_v54, %v7486_v59  ;;  %v2784_v7 = vpop.f32.mrf.mxu1  ;;  %v3585_v8 = vmax.f32 %v3475_v16, 0.0  ;;  %v7489_v57 = vld [vmem:[#allocation81_spill] sm:$0xff] }
 0x6f0   : > { %v2894_v2 = vmax.f32 %v2781_v1, 0.0  ;;  %v2785_v3 = vadd.f32 %v2784_v7, %v7486_v59  ;;  %2970 = vmax.xlane.f32.xlu0 %v2969_v51  ;;  %v3478_v61 = vpop.f32.mrf.mxu0 }
 0x6f1   : > { %v3586_v11 = vmax.f32 %v3477_v37, 0.0  ;;  %v3479_v10 = vadd.f32 %v3478_v61, %v7487_v50  ;;  %v2786_v20 = vpop.f32.mrf.mxu1  ;;  %3663 = vmax.xlane.f32.xlu1 %v3662_v26 }
 0x6f2   : > { %v2972_v55 = vmax.f32 %v2893_v34, %v2894_v2  ;;  %v2787_v60 = vadd.f32 %v2786_v20, %v7486_v59  ;;  %v3480_v22 = vpop.f32.mrf.mxu0  ;;  %v2895_v38 = vmax.f32 %v2785_v3, 0.0  ;;  %v7490_v2 = vld [vmem:[#allocation80_spill] sm:$0xff] }
 0x6f3   : > { %v6742_v5 = vmax.f32 %v3585_v8, %v3586_v11  ;;  %v3481_v6 = vadd.f32 %v3480_v22, %v7487_v50  ;;  %v2788_v49 = vpop.f32.mrf.mxu1  ;;  %v3587_v33 = vmax.f32 %v3479_v10, 0.0 }
 0x6f4   : > { %v2896_v35 = vmax.f32 %v2787_v60, 0.0  ;;  %v2789_v18 = vadd.f32 %v2788_v49, %v7487_v50  ;;  %2973 = vmax.xlane.f32.xlu0 %v2972_v55  ;;  %v3484_v62 = vpop.f32.mrf.mxu0 }
 0x6f5   : > { %v3588_v44 = vmax.f32 %v3481_v6, 0.0  ;;  %v3485_v53 = vadd.f32 %v3484_v62, %v7488_v39  ;;  %v2790_v28 = vpop.f32.mrf.mxu1 }
 0x6f6   : > { %v6747_v27 = vmax.f32 %v2895_v38, %v2896_v35  ;;  %v2791_v19 = vadd.f32 %v2790_v28, %v7487_v50  ;;  %v3486_v32 = vpop.f32.mrf.mxu0  ;;  %v2897_v29 = vmax.f32 %v2789_v18, 0.0  ;;  %v7491_v35 = vld [vmem:[#allocation79_spill] sm:$0xff] }
 0x6f7   : > { %v6750_v42 = vmax.f32 %v3587_v33, %v3588_v44  ;;  %v3487_v41 = vadd.f32 %v3486_v32, %v7488_v39  ;;  %v2794_v31 = vpop.f32.mrf.mxu1  ;;  %v3589_v47 = vmax.f32 %v3485_v53, 0.0 }
 0x6f8   : > { %v2898_v24 = vmax.f32 %v2791_v19, 0.0  ;;  %v2795_v9 = vadd.f32 %v2794_v31, %v7488_v39  ;;  %v6754_v17 = vpop.f32.mrf.mxu0 }
 0x6f9   : > { %v3590_v0 = vmax.f32 %v3487_v41, 0.0  ;;  %v2796_v58 = vpop.f32.mrf.mxu1 }
 0x6fa   : > { %v6756_v13 = vmax.f32 %v2897_v29, %v2898_v24  ;;  %v2797_v15 = vadd.f32 %v2796_v58, %v7488_v39  ;;  %v6759_v12 = vpop.f32.mrf.mxu0  ;;  %v2899_v45 = vmax.f32 %v2795_v9, 0.0 }
 0x6fb   : > { %v6761_v46 = vmax.f32 %v3589_v47, %v3590_v0  ;;  %v6763_v40 = vpop.f32.mrf.mxu1  ;;  %v7492_v47 = vld [vmem:[#allocation78_spill] sm:$0xff] }
 0x6fc   : > { %v2900_v43 = vmax.f32 %v2797_v15, 0.0  ;;  %v3494_v56 = vpop.f32.mrf.mxu0 }
 0x6fd   : > { %v3495_v59 = vadd.f32 %v3494_v56, %v7489_v57  ;;  %v6766_v16 = vpop.f32.mrf.mxu1 }
 0x6fe   : > { %v6768_v36 = vmax.f32 %v2899_v45, %v2900_v43  ;;  %v3496_v51 = vpop.f32.mrf.mxu0 }
 0x6ff   : > { %v3497_v1 = vadd.f32 %v3496_v51, %v7489_v57  ;;  %v2804_v54 = vpop.f32.mrf.mxu1  ;;  %v3593_v7 = vmax.f32 %v3495_v59, 0.0 }
 0x700   : > { %v2805_v26 = vadd.f32 %v2804_v54, %v7489_v57  ;;  %v3498_v37 = vpop.f32.mrf.mxu0 }
 0x701   : > { %v3594_v34 = vmax.f32 %v3497_v1, 0.0  ;;  %v3499_v3 = vadd.f32 %v3498_v37, %v7490_v2  ;;  %v2806_v61 = vpop.f32.mrf.mxu1 }
 0x702   : > { %v2807_v8 = vadd.f32 %v2806_v61, %v7489_v57  ;;  %v3500_v11 = vpop.f32.mrf.mxu0  ;;  %v2903_v55 = vmax.f32 %v2805_v26, 0.0 }
 0x703   : > { %v3677_v50 = vmax.f32 %v3593_v7, %v3594_v34  ;;  %v3501_v10 = vadd.f32 %v3500_v11, %v7490_v2  ;;  %v2808_v20 = vpop.f32.mrf.mxu1  ;;  %v3595_v49 = vmax.f32 %v3499_v3, 0.0  ;;  %v7493_v34 = vld [vmem:[#allocation77_spill] sm:$0xff] }
 0x704   : > { %v2904_v60 = vmax.f32 %v2807_v8, 0.0  ;;  %v2809_v22 = vadd.f32 %v2808_v20, %v7490_v2  ;;  %v3504_v6 = vpop.f32.mrf.mxu0 }
 0x705   : > { %v3596_v38 = vmax.f32 %v3501_v10, 0.0  ;;  %v3505_v18 = vadd.f32 %v3504_v6, %v7491_v35  ;;  %v2810_v62 = vpop.f32.mrf.mxu1  ;;  %3678 = vmax.xlane.f32.xlu1 %v3677_v50 }
 0x706   : > { %v2987_v33 = vmax.f32 %v2903_v55, %v2904_v60  ;;  %v2811_v44 = vadd.f32 %v2810_v62, %v7490_v2  ;;  %v3506_v39 = vpop.f32.mrf.mxu0  ;;  %v2905_v32 = vmax.f32 %v2809_v22, 0.0 }
 0x707   : > { %v3680_v53 = vmax.f32 %v3595_v49, %v3596_v38  ;;  %v3507_v28 = vadd.f32 %v3506_v39, %v7491_v35  ;;  %v2814_v19 = vpop.f32.mrf.mxu1  ;;  %v3597_v24 = vmax.f32 %v3505_v18, 0.0 }
 0x708   : > { %v2906_v41 = vmax.f32 %v2811_v44, 0.0  ;;  %v2815_v31 = vadd.f32 %v2814_v19, %v7491_v35  ;;  %2988 = vmax.xlane.f32.xlu0 %v2987_v33  ;;  %v3508_v29 = vpop.f32.mrf.mxu0 }
 0x709   : > { %v3598_v9 = vmax.f32 %v3507_v28, 0.0  ;;  %v3509_v0 = vadd.f32 %v3508_v29, %v7492_v47  ;;  %v2816_v58 = vpop.f32.mrf.mxu1  ;;  %3681 = vmax.xlane.f32.xlu1 %v3680_v53 }
 0x70a   : > { %v2990_v15 = vmax.f32 %v2905_v32, %v2906_v41  ;;  %v2817_v45 = vadd.f32 %v2816_v58, %v7491_v35  ;;  %v3510_v43 = vpop.f32.mrf.mxu0  ;;  %v2907_v51 = vmax.f32 %v2815_v31, 0.0  ;;  %v7494_v35 = vld [vmem:[#allocation76_spill] sm:$0xff] }
 0x70b   : > { %v3683_v56 = vmax.f32 %v3597_v24, %v3598_v9  ;;  %v3511_v57 = vadd.f32 %v3510_v43, %v7492_v47  ;;  %v2818_v59 = vpop.f32.mrf.mxu1  ;;  %v3599_v37 = vmax.f32 %v3509_v0, 0.0 }
 0x70c   : > { %v2908_v1 = vmax.f32 %v2817_v45, 0.0  ;;  %v2819_v54 = vadd.f32 %v2818_v59, %v7492_v47  ;;  %2991 = vmax.xlane.f32.xlu0 %v2990_v15  ;;  %v3514_v26 = vpop.f32.mrf.mxu0 }
 0x70d   : > { %v3600_v7 = vmax.f32 %v3511_v57, 0.0  ;;  %v3515_v2 = vadd.f32 %v3514_v26, %v7493_v34  ;;  %v2820_v3 = vpop.f32.mrf.mxu1  ;;  %3684 = vmax.xlane.f32.xlu1 %v3683_v56 }
 0x70e   : > { %v2993_v61 = vmax.f32 %v2907_v51, %v2908_v1  ;;  %v2821_v8 = vadd.f32 %v2820_v3, %v7492_v47  ;;  %v3516_v11 = vpop.f32.mrf.mxu0  ;;  %v2909_v55 = vmax.f32 %v2819_v54, 0.0  ;;  %v7495_v47 = vld [vmem:[#allocation75_spill] sm:$0xff] }
 0x70f   : > { %v3686_v50 = vmax.f32 %v3599_v37, %v3600_v7  ;;  %v3517_v10 = vadd.f32 %v3516_v11, %v7493_v34  ;;  %v2824_v20 = vpop.f32.mrf.mxu1  ;;  %v3601_v49 = vmax.f32 %v3515_v2, 0.0 }
 0x710   : > { %v2910_v60 = vmax.f32 %v2821_v8, 0.0  ;;  %v2825_v22 = vadd.f32 %v2824_v20, %v7493_v34  ;;  %2994 = vmax.xlane.f32.xlu0 %v2993_v61  ;;  %v3518_v6 = vpop.f32.mrf.mxu0 }
 0x711   : > { %v3602_v38 = vmax.f32 %v3517_v10, 0.0  ;;  %v3519_v18 = vadd.f32 %v3518_v6, %v7494_v35  ;;  %v2826_v62 = vpop.f32.mrf.mxu1  ;;  %3687 = vmax.xlane.f32.xlu1 %v3686_v50 }
 0x712   : > { %v2996_v33 = vmax.f32 %v2909_v55, %v2910_v60  ;;  %v2827_v44 = vadd.f32 %v2826_v62, %v7493_v34  ;;  %v3520_v39 = vpop.f32.mrf.mxu0  ;;  %v2911_v32 = vmax.f32 %v2825_v22, 0.0  ;;  %v7496_v34 = vld [vmem:[#allocation74_spill] sm:$0xff] }
 0x713   : > { %v3689_v53 = vmax.f32 %v3601_v49, %v3602_v38  ;;  %v3521_v28 = vadd.f32 %v3520_v39, %v7494_v35  ;;  %v2828_v19 = vpop.f32.mrf.mxu1  ;;  %v3603_v24 = vmax.f32 %v3519_v18, 0.0 }
 0x714   : > { %v2912_v41 = vmax.f32 %v2827_v44, 0.0  ;;  %v2829_v31 = vadd.f32 %v2828_v19, %v7494_v35  ;;  %2997 = vmax.xlane.f32.xlu0 %v2996_v33  ;;  %v3524_v29 = vpop.f32.mrf.mxu0 }
 0x715   : > { %v3604_v9 = vmax.f32 %v3521_v28, 0.0  ;;  %v3525_v0 = vadd.f32 %v3524_v29, %v7495_v47  ;;  %v2830_v58 = vpop.f32.mrf.mxu1  ;;  %3690 = vmax.xlane.f32.xlu1 %v3689_v53 }
 0x716   : > { %v2999_v15 = vmax.f32 %v2911_v32, %v2912_v41  ;;  %v2831_v45 = vadd.f32 %v2830_v58, %v7494_v35  ;;  %v3526_v43 = vpop.f32.mrf.mxu0  ;;  %v2913_v51 = vmax.f32 %v2829_v31, 0.0  ;;  %v7497_v35 = vld [vmem:[#allocation73_spill] sm:$0xff] }
 0x717   : > { %v3692_v56 = vmax.f32 %v3603_v24, %v3604_v9  ;;  %v3527_v57 = vadd.f32 %v3526_v43, %v7495_v47  ;;  %v2834_v59 = vpop.f32.mrf.mxu1  ;;  %v3605_v37 = vmax.f32 %v3525_v0, 0.0 }
 0x718   : > { %v2914_v1 = vmax.f32 %v2831_v45, 0.0  ;;  %v2835_v54 = vadd.f32 %v2834_v59, %v7495_v47  ;;  %3000 = vmax.xlane.f32.xlu0 %v2999_v15  ;;  %v3528_v26 = vpop.f32.mrf.mxu0 }
 0x719   : > { %v3606_v7 = vmax.f32 %v3527_v57, 0.0  ;;  %v3529_v2 = vadd.f32 %v3528_v26, %v7496_v34  ;;  %v2836_v3 = vpop.f32.mrf.mxu1  ;;  %3693 = vmax.xlane.f32.xlu1 %v3692_v56 }
 0x71a   : > { %v3002_v61 = vmax.f32 %v2913_v51, %v2914_v1  ;;  %v2837_v8 = vadd.f32 %v2836_v3, %v7495_v47  ;;  %v3530_v11 = vpop.f32.mrf.mxu0  ;;  %v2915_v55 = vmax.f32 %v2835_v54, 0.0  ;;  %v7498_v47 = vld [vmem:[#allocation71_spill] sm:$0xff] }
 0x71b   : > { %v3695_v50 = vmax.f32 %v3605_v37, %v3606_v7  ;;  %v3531_v10 = vadd.f32 %v3530_v11, %v7496_v34  ;;  %v2838_v20 = vpop.f32.mrf.mxu1  ;;  %v3607_v49 = vmax.f32 %v3529_v2, 0.0 }
 0x71c   : > { %v2916_v60 = vmax.f32 %v2837_v8, 0.0  ;;  %v2839_v22 = vadd.f32 %v2838_v20, %v7496_v34  ;;  %3003 = vmax.xlane.f32.xlu0 %v3002_v61  ;;  %v3534_v6 = vpop.f32.mrf.mxu0 }
 0x71d   : > { %v3608_v38 = vmax.f32 %v3531_v10, 0.0  ;;  %v3535_v18 = vadd.f32 %v3534_v6, %v7497_v35  ;;  %v2840_v62 = vpop.f32.mrf.mxu1  ;;  %3696 = vmax.xlane.f32.xlu1 %v3695_v50 }
 0x71e   : > { %v3005_v33 = vmax.f32 %v2915_v55, %v2916_v60  ;;  %v2841_v44 = vadd.f32 %v2840_v62, %v7496_v34  ;;  %v3536_v39 = vpop.f32.mrf.mxu0  ;;  %v2917_v32 = vmax.f32 %v2839_v22, 0.0  ;;  %v7499_v34 = vld [vmem:[#allocation55_spill] sm:$0xff] }
 0x71f   : > { %v3698_v53 = vmax.f32 %v3607_v49, %v3608_v38  ;;  %v3537_v28 = vadd.f32 %v3536_v39, %v7497_v35  ;;  %v2844_v19 = vpop.f32.mrf.mxu1  ;;  %v3609_v24 = vmax.f32 %v3535_v18, 0.0  ;;  %v7500_v39 = vld [vmem:[#allocation54_spill] sm:$0xff] }
 0x720   : > { %v2918_v41 = vmax.f32 %v2841_v44, 0.0  ;;  %v2845_v31 = vadd.f32 %v2844_v19, %v7497_v35  ;;  %3006 = vmax.xlane.f32.xlu0 %v3005_v33  ;;  %v3538_v29 = vpop.f32.mrf.mxu0 }
 0x721   : > { %v3610_v9 = vmax.f32 %v3537_v28, 0.0  ;;  %v3539_v0 = vadd.f32 %v3538_v29, %v7498_v47  ;;  %v2846_v58 = vpop.f32.mrf.mxu1  ;;  %3699 = vmax.xlane.f32.xlu1 %v3698_v53  ;;  %v7501_v29 = vld [vmem:[#allocation82_spill] sm:$0xff] }
 0x722   : > { %v3008_v15 = vmax.f32 %v2917_v32, %v2918_v41  ;;  %v2847_v45 = vadd.f32 %v2846_v58, %v7497_v35  ;;  %v3540_v43 = vpop.f32.mrf.mxu0  ;;  %v2919_v51 = vmax.f32 %v2845_v31, 0.0 }
 0x723   : > { %v3701_v56 = vmax.f32 %v3609_v24, %v3610_v9  ;;  %v3541_v57 = vadd.f32 %v3540_v43, %v7498_v47  ;;  %v2848_v59 = vpop.f32.mrf.mxu1  ;;  %v3611_v37 = vmax.f32 %v3539_v0, 0.0  ;;  %v3491_v24 = vadd.f32 %v6759_v12, %v7501_v29 }
 0x724   : > { %v2920_v1 = vmax.f32 %v2847_v45, 0.0  ;;  %v2849_v54 = vadd.f32 %v2848_v59, %v7498_v47  ;;  %3009 = vmax.xlane.f32.xlu0 %v3008_v15  ;;  %v3544_v26 = vpop.f32.mrf.mxu0  ;;  %v3489_v45 = vadd.f32 %v6754_v17, %v7501_v29  ;;  %v2799_v43 = vadd.f32 %v6763_v40, %v7501_v29  ;;  %v4757_v40 = vld [vmem:[#allocation2 + $0x30] sm:$0xff] }
 0x725   : > { %v3612_v7 = vmax.f32 %v3541_v57, 0.0  ;;  %v3545_v2 = vadd.f32 %v3544_v26, %v7499_v34  ;;  %v2850_v3 = vpop.f32.mrf.mxu1  ;;  %3702 = vmax.xlane.f32.xlu1 %v3701_v56  ;;  %v3592_v12 = vmax.f32 %v3491_v24, 0.0 }
 0x726   : > { %v3011_v61 = vmax.f32 %v2919_v51, %v2920_v1  ;;  %v2851_v8 = vadd.f32 %v2850_v3, %v7498_v47  ;;  %v3546_v11 = vpop.f32.mrf.mxu0  ;;  %v2921_v55 = vmax.f32 %v2849_v54, 0.0  ;;  %v2801_v47 = vadd.f32 %v6766_v16, %v7501_v29 }
 0x727   : > { %v3704_v50 = vmax.f32 %v3611_v37, %v3612_v7  ;;  %v3547_v10 = vadd.f32 %v3546_v11, %v7499_v34  ;;  %v2854_v20 = vpop.f32.mrf.mxu1  ;;  %v3613_v49 = vmax.f32 %v3545_v2, 0.0  ;;  %v3591_v26 = vmax.f32 %v3489_v45, 0.0  ;;  %v4758_v2 = vld [vmem:[#allocation2 + $0x28] sm:$0xff] }
 0x728   : > { %v2922_v60 = vmax.f32 %v2851_v8, 0.0  ;;  %v2855_v22 = vadd.f32 %v2854_v20, %v7499_v34  ;;  %3012 = vmax.xlane.f32.xlu0 %v3011_v61  ;;  %v3548_v6 = vpop.f32.mrf.mxu0  ;;  %v2902_v51 = vmax.f32 %v2801_v47, 0.0  ;;  %v2901_v16 = vmax.f32 %v2799_v43, 0.0  ;;  %v4759_v8 = vld [vmem:[#allocation2 + $0x38] sm:$0xff]  ;;  %v7506_v47 = vld [vmem:[#allocation95_spill] sm:$0xff]  ;;  %v7508_v43 = vld [vmem:[#allocation89_spill] sm:$0xff] }
 0x729   : > { %v3614_v38 = vmax.f32 %v3547_v10, 0.0  ;;  %v2856_v35 = vpop.f32.mrf.mxu1  ;;  %3705 = vmax.xlane.f32.xlu1 %v3704_v50  ;;  %v3549_v32 = vadd.f32 %v3548_v6, %v7500_v39  ;;  %v3674_v37 = vmax.f32 %v3591_v26, %v3592_v12  ;;  %v4760_v50 = vld [vmem:[#allocation2 + $0x20] sm:$0xff]  ;;  %v4762_v6 = vld [vmem:[#allocation2 + $0x18] sm:$0xff]  ;;  %v4882_v29 = vmov 10  }
 0x72a   : > { %v3014_v18 = vmax.f32 %v2921_v55, %v2922_v60  ;;  %v2857_v62 = vadd.f32 %v2856_v35, %v7499_v34  ;;  %v3550_v33 = vpop.f32.mrf.mxu0  ;;  %v2923_v19 = vmax.f32 %v2855_v22, 0.0  ;;  %v2984_v7 = vmax.f32 %v2901_v16, %v2902_v51  ;;  %v4761_v60 = vld [vmem:[#allocation2] sm:$0xff] }
 0x72b   : > { %v3707_v44 = vmax.f32 %v3613_v49, %v3614_v38  ;;  %v3551_v53 = vadd.f32 %v3550_v33, %v7500_v39  ;;  %v2858_v28 = vpop.f32.mrf.mxu1  ;;  %v3615_v56 = vmax.f32 %v3549_v32, 0.0  ;;  %v4880_v55 = vmov 9   ;;  %v7502_v33 = vld [vmem:[#allocation86_spill] sm:$0xff] }
 0x72c   : > { %v2924_v41 = vmax.f32 %v2857_v62, 0.0  ;;  %v2859_v31 = vadd.f32 %v2858_v28, %v7500_v39  ;;  %3015 = vmax.xlane.f32.xlu0 %v3014_v18  ;;  %v4881_v35 = vmov 12   ;;  %v4763_v18 = vld [vmem:[#allocation2 + $0x8] sm:$0xff]  ;;  %v4764_v62 = vld [vmem:[#allocation2 + $0x10] sm:$0xff] }
 0x72d   : > { %v2860_v9 = vpop.f32.mrf.mxu1  ;;  %3708 = vmax.xlane.f32.xlu1 %v3707_v44  ;;  %v3616_v58 = vmax.f32 %v3551_v53, 0.0  ;;  %v7503_v44 = vld [vmem:[#allocation87_spill] sm:$0xff]  ;;  %v7505_v28 = vld [vmem:[#allocation94_spill] sm:$0xff] }
 0x72e   : > { %v3017_v0 = vmax.f32 %v2923_v19, %v2924_v41  ;;  %v2861_v15 = vadd.f32 %v2860_v9, %v7500_v39  ;;  %v2925_v57 = vmax.f32 %v2859_v31, 0.0  ;;  %v7504_v39 = vsub.f32 1.0, %v7503_v44 }
 0x72f   : > { %v3710_v1 = vmax.f32 %v3615_v56, %v3616_v58  ;;  %v7507_v58 = vmov 1  }
 0x730   : > { %v2926_v59 = vmax.f32 %v2861_v15, 0.0  ;;  %3018 = vmax.xlane.f32.xlu0 %v3017_v0 }
 0x732   : > { %v3020_v54 = vmax.f32 %v2925_v57, %v2926_v59 }
 0x734   : > { %3711 = vmax.xlane.f32.xlu0 %v3710_v1  ;;  %3021 = vmax.xlane.f32.xlu1 %v3020_v54 }
 0x738   : > { %2985 = vmax.xlane.f32.xlu0 %v2984_v7  ;;  %3675 = vmax.xlane.f32.xlu1 %v3674_v37 }
 0x73c   : > { %2937 = vmax.xlane.f32.xlu0 %v6691_v25  ;;  %3627 = vmax.xlane.f32.xlu1 %v6686_v4 }
 0x740   : > { %2982 = vmax.xlane.f32.xlu0 %v6768_v36  ;;  %3672 = vmax.xlane.f32.xlu1 %v6761_v46 }
 0x744   : > { %2934 = vmax.xlane.f32.xlu0 %v6683_v63  ;;  %3624 = vmax.xlane.f32.xlu1 %v6678_v48 }
 0x748   : > { %2979 = vmax.xlane.f32.xlu0 %v6756_v13  ;;  %3669 = vmax.xlane.f32.xlu1 %v6750_v42 }
 0x74c   : > { %2931 = vmax.xlane.f32.xlu0 %v6675_v52  ;;  %3621 = vmax.xlane.f32.xlu1 %v6670_v21 }
 0x74e   : > { %v6835_v17 = vpop.xlane.xlu1 %3630 }
 0x750   : > { %2976 = vmax.xlane.f32.xlu0 %v6747_v27  ;;  %3666 = vmax.xlane.f32.xlu1 %v6742_v5  ;;  %v788_v5 = vld [vmem:[#allocation6 + $0x8] sm:$0xff] }
 0x751   : > { %v6839_v4 = vpop.xlane.xlu0 %2940  ;;  %3841 = vmatprep.mubr.f32.mxu1 %v788_v5 }
 0x752   : > { %v6841_v25 = vpop.xlane.xlu1 %3633 }
 0x754   : > { %2928 = vmax.xlane.f32.xlu0 %v6667_v23  ;;  %3618 = vmax.xlane.f32.xlu1 %v6662_v14 }
 0x755   : > { %v6845_v48 = vpop.xlane.xlu0 %2943 }
 0x756   : > { %v6847_v63 = vpop.xlane.xlu1 %3636 }
 0x759   : > { %v6849_v52 = vpop.xlane.xlu0 %2946 }
 0x75a   : > { %v6851_v21 = vpop.xlane.xlu1 %3639 }
 0x75d   : > { %v6853_v42 = vpop.xlane.xlu0 %2949 }
 0x75e   : > { %v3643_v27 = vpop.xlane.xlu1 %3642 }
 0x761   : > { %v2953_v13 = vpop.xlane.xlu0 %2952 }
 0x762   : > { %v6856_v46 = vsel %vm1993_vm1, %v2953_v13, %v3643_v27  ;;  %v3646_v23 = vpop.xlane.xlu1 %3645 }
 0x765   : > { %3770 = vperm.xlu1 %4706, %v4757_v40   ;;  %v2956_v14 = vpop.xlane.xlu0 %2955 }
 0x766   : > { %v6859_v36 = vsel %vm1993_vm1, %v2956_v14, %v3646_v23  ;;  %v3649_v34 = vpop.xlane.xlu1 %3648 }
 0x769   : > { %3766 = vperm.xlu1 %4706, %v4758_v2   ;;  %v2959_v3 = vpop.xlane.xlu0 %2958 }
 0x76a   : > { %v6862_v61 = vsel %vm1993_vm1, %v2959_v3, %v3649_v34  ;;  %3774 = vperm.xlu0 %4705, %v4759_v8   ;;  %v3652_v11 = vpop.xlane.xlu1 %3651 }
 0x76d   : > { %3762 = vperm.xlu1 %4706, %v4760_v50   ;;  %v2962_v10 = vpop.xlane.xlu0 %2961 }
 0x76e   : > { %v6865_v20 = vsel %vm1993_vm1, %v2962_v10, %v3652_v11  ;;  %4707 = vset.pattern.permute.xlu0 %v4880_v55  ;;  %v3655_v22 = vpop.xlane.xlu1 %3654 }
 0x76f   : > { %3891 = vperm.xlu0 %4707, %v4761_v60  }
 0x771   : > { %3758 = vperm.xlu1 %4706, %v4762_v6   ;;  %v2965_v49 = vpop.xlane.xlu0 %2964 }
 0x772   : > { %v6868_v38 = vsel %vm1993_vm1, %v2965_v49, %v3655_v22  ;;  %v3658_v53 = vpop.xlane.xlu1 %3657 }
 0x773   : > { %4710 = vset.pattern.permute.xlu0 %v4881_v35 }
 0x774   : > { %3986 = vperm.xlu0 %4710, %v4763_v18  }
 0x775   : > { %3754 = vperm.xlu1 %4706, %v4764_v62   ;;  %v2968_v19 = vpop.xlane.xlu0 %2967 }
 0x776   : > { %v3661_v32 = vpop.xlane.xlu1 %3660  ;;  %v3726_v49 = vsel %vm1993_vm1, %v2968_v19, %v3658_v53 }
 0x778   : > { %2412 = vrot.lane.b32.xlu0 %v7502_v33, %s4875_s17 }
 0x779   : > { %3750 = vperm.xlu1 %4706, %v4763_v18   ;;  %4712 = vset.pattern.permute.xlu0 %v7469_v30  ;;  %v2971_v41 = vpop.xlane.xlu0 %2970 }
 0x77a   : > { %v3664_v31 = vpop.xlane.xlu1 %3663 }
 0x77c   : > { %3108 = vrot.lane.b32.xlu0 %v7504_v39, %s4877_s19 }
 0x77d   : > { %3746 = vperm.xlu1 %4706, %v4761_v60   ;;  %v2974_v24 = vpop.xlane.xlu0 %2973 }
 0x77e   : > { %v3728_v50 = vsel %vm1993_vm1, %v2974_v24, %v3664_v31 }
 0x780   : > { %3112 = vrot.lane.b32.xlu0 %v7505_v28, %s4875_s17  ;;  %s4883_s17 = smov 3  }
 0x781   : > { %4708 = vset.pattern.permute.xlu1 %v4880_v55  ;;  %v3727_v55 = vsel %vm1993_vm1, %v2971_v41, %v3661_v32  ;;  %v3720_v41 = vsel %vm1993_vm1, %v6853_v42, %v6851_v21  ;;  %v3718_v21 = vsel %vm1993_vm1, %v6845_v48, %v6841_v25  ;;  %v3717_v42 = vsel %vm1993_vm1, %v6839_v4, %v6835_v17 }
 0x782   : > { %3895 = vperm.xlu1 %4708, %v4763_v18  }
 0x786   : > { %4709 = vset.pattern.permute.xlu1 %v4881_v35 }
 0x787   : > { %3982 = vperm.xlu1 %4709, %v4761_v60  }
 0x78b   : > { %4711 = vset.pattern.permute.xlu1 %v4882_v29 }
 0x78c   : > { %4001 = vperm.xlu1 %4711, %v4761_v60  }
 0x78e   : > { %v3679_v9 = vpop.xlane.xlu1 %3678 }
 0x790   : > { %2416 = vrot.lane.b32.xlu1 %v7506_v47, %s4876_s18 }
 0x791   : > { %v2989_v0 = vpop.xlane.xlu0 %2988  ;;  %4713 = vset.pattern.permute.xlu1 %v7507_v58 }
 0x792   : > { %v6881_v15 = vpop.xlane.xlu1 %3681  ;;  %v6884_v45 = vsel %vm1993_vm1, %v2989_v0, %v3679_v9 }
 0x794   : > { %2420 = vrot.lane.b32.xlu1 %v7508_v43, %s4883_s17 }
 0x795   : > { %v6888_v56 = vpop.xlane.xlu0 %2991 }
 0x796   : > { %v3685_v57 = vpop.xlane.xlu1 %3684 }
 0x799   : > { %v2995_v59 = vpop.xlane.xlu0 %2994 }
 0x79a   : > { %v3688_v12 = vpop.xlane.xlu1 %3687 }
 0x79d   : > { %v2998_v51 = vpop.xlane.xlu0 %2997 }
 0x79e   : > { %v3691_v1 = vpop.xlane.xlu1 %3690 }
 0x7a1   : > { %v3001_v54 = vpop.xlane.xlu0 %3000 }
 0x7a2   : > { %v3694_v26 = vpop.xlane.xlu1 %3693  ;;  %v3737_v19 = vsel %vm1993_vm1, %v3001_v54, %v3691_v1  ;;  %v791_v1 = vld [vmem:[#allocation6 + $0x20] sm:$0xff]  ;;  %v794_v54 = vld [vmem:[#allocation6 + $0x38] sm:$0xff] }
 0x7a5   : > { %v3004_v16 = vpop.xlane.xlu0 %3003 }
 0x7a6   : > { %v3697_v37 = vpop.xlane.xlu1 %3696  ;;  %v3738_v53 = vsel %vm1993_vm1, %v3004_v16, %v3694_v26  ;;  %v793_v26 = vld [vmem:[#allocation6 + $0x30] sm:$0xff]  ;;  %v796_v16 = vld [vmem:[#allocation6 + $0x48] sm:$0xff] }
 0x7a9   : > { %v3007_v7 = vpop.xlane.xlu0 %3006 }
 0x7aa   : > { %v3700_v27 = vpop.xlane.xlu1 %3699  ;;  %v3739_v44 = vsel %vm1993_vm1, %v3007_v7, %v3697_v37  ;;  %v795_v37 = vld [vmem:[#allocation6 + $0x40] sm:$0xff]  ;;  %v798_v7 = vld [vmem:[#allocation6 + $0x58] sm:$0xff] }
 0x7ad   : > { %v3010_v5 = vpop.xlane.xlu0 %3009 }
 0x7ae   : > { %v3703_v13 = vpop.xlane.xlu1 %3702  ;;  %v3740_v33 = vsel %vm1993_vm1, %v3010_v5, %v3700_v27  ;;  %v797_v27 = vld [vmem:[#allocation6 + $0x50] sm:$0xff]  ;;  %v800_v5 = vld [vmem:[#allocation6 + $0x68] sm:$0xff] }
 0x7b1   : > { %v3013_v23 = vpop.xlane.xlu0 %3012 }
 0x7b2   : > { %v3706_v40 = vpop.xlane.xlu1 %3705  ;;  %v3741_v35 = vsel %vm1993_vm1, %v3013_v23, %v3703_v13  ;;  %v799_v13 = vld [vmem:[#allocation6 + $0x60] sm:$0xff]  ;;  %v802_v23 = vld [vmem:[#allocation6 + $0x78] sm:$0xff] }
 0x7b5   : > { %v3016_v14 = vpop.xlane.xlu0 %3015 }
 0x7b6   : > { %v3709_v34 = vpop.xlane.xlu1 %3708  ;;  %v3742_v6 = vsel %vm1993_vm1, %v3016_v14, %v3706_v40  ;;  %v801_v40 = vld [vmem:[#allocation6 + $0x70] sm:$0xff]  ;;  %v803_v14 = vld [vmem:[%s7084_s7] sm:$0xff] }
 0x7b7   : > { %4592 = vmatprep.mubr.msk.f32.mxu0 %vm1061_vm0, %v803_v14 }
 0x7b9   : > { %v3019_v2 = vpop.xlane.xlu0 %3018 }
 0x7ba   : > { %v3743_v10 = vsel %vm1993_vm1, %v3019_v2, %v3709_v34 }
 0x7bd   : > { %v3022_v3 = vpop.xlane.xlu1 %3021  ;;  %v3712_v8 = vpop.xlane.xlu0 %3711 }
 0x7be   : > { %v3744_v11 = vsel %vm1993_vm1, %v3022_v3, %v3712_v8 }
 0x7bf   : > { %4491 = vmatprep.subr.mxu1 %v3744_v11 }
 0x7c0   : > { %4492 = vmatpush3.msra.mxu1 %v3728_v50 }
 0x7c1   : > { %v3676_v60 = vpop.xlane.xlu1 %3675  ;;  %4493 = vmatprep.subr.mxu1 %v3743_v10  ;;  %v2986_v22 = vpop.xlane.xlu0 %2985 }
 0x7c2   : > { %4494 = vmatpush3.msra.mxu1 %v3727_v55 }
 0x7c3   : > { %4495 = vmatprep.subr.mxu1 %v3742_v6 }
 0x7c4   : > { %4496 = vmatpush3.msra.mxu1 %v3726_v49 }
 0x7c5   : > { %v3628_v18 = vpop.xlane.xlu1 %3627  ;;  %4497 = vmatprep.subr.mxu1 %v3741_v35  ;;  %v2938_v62 = vpop.xlane.xlu0 %2937 }
 0x7c6   : > { %4498 = vmatpush3.msra.mxu1 %v6868_v38  ;;  %v3716_v9 = vsel %vm1993_vm1, %v2938_v62, %v3628_v18 }
 0x7c7   : > { %4499 = vmatprep.subr.mxu1 %v3740_v33 }
 0x7c8   : > { %4500 = vmatpush3.msra.mxu1 %v6865_v20  ;;  %v3736_v20 = vsel %vm1993_vm1, %v2998_v51, %v3688_v12  ;;  %v789_v12 = vld [vmem:[#allocation6 + $0x10] sm:$0xff]  ;;  %v792_v51 = vld [vmem:[#allocation6 + $0x28] sm:$0xff] }
 0x7c9   : > { %v3673_v39 = vpop.xlane.xlu1 %3672  ;;  %4501 = vmatprep.subr.mxu1 %v3739_v44  ;;  %v2983_v28 = vpop.xlane.xlu0 %2982 }
 0x7ca   : > { %4502 = vmatpush3.msra.mxu1 %v6862_v61  ;;  %v3735_v61 = vsel %vm1993_vm1, %v2995_v59, %v3685_v57  ;;  %v3731_v47 = vsel %vm1993_vm1, %v2983_v28, %v3673_v39  ;;  %v790_v59 = vld [vmem:[#allocation6 + $0x18] sm:$0xff] }
 0x7cb   : > { %4503 = vmatprep.subr.mxu1 %v3738_v53 }
 0x7cc   : > { %4504 = vmatpush3.msra.mxu1 %v6859_v36  ;;  %v3719_v36 = vsel %vm1993_vm1, %v6849_v52, %v6847_v63  ;;  %v3732_v52 = vsel %vm1993_vm1, %v2986_v22, %v3676_v60 }
 0x7cd   : > { %v3625_v38 = vpop.xlane.xlu1 %3624  ;;  %4505 = vmatprep.subr.mxu1 %v3737_v19  ;;  %v2935_v32 = vpop.xlane.xlu0 %2934 }
 0x7ce   : > { %4506 = vmatpush3.msra.mxu1 %v6856_v46  ;;  %v3734_v46 = vsel %vm1993_vm1, %v6888_v56, %v6881_v15  ;;  %v3715_v25 = vsel %vm1993_vm1, %v2935_v32, %v3625_v38  ;;  %v787_v56 = vld [vmem:[#allocation6] sm:$0xff] }
 0x7cf   : > { %4507 = vmatprep.subr.mxu1 %v3736_v20 }
 0x7d0   : > { %4508 = vmatpush3.msra.mxu1 %v3720_v41 }
 0x7d1   : > { %v3670_v31 = vpop.xlane.xlu1 %3669  ;;  %4509 = vmatprep.subr.mxu1 %v3735_v61  ;;  %v2980_v29 = vpop.xlane.xlu0 %2979 }
 0x7d2   : > { %4510 = vmatpush3.msra.mxu1 %v3719_v36  ;;  %v3730_v17 = vsel %vm1993_vm1, %v2980_v29, %v3670_v31 }
 0x7d3   : > { %4511 = vmatprep.subr.mxu1 %v3734_v46 }
 0x7d4   : > { %4512 = vmatpush3.msra.mxu1 %v3718_v21 }
 0x7d5   : > { %v3622_v24 = vpop.xlane.xlu1 %3621  ;;  %4513 = vmatprep.subr.mxu1 %v6884_v45  ;;  %v2932_v63 = vpop.xlane.xlu0 %2931 }
 0x7d6   : > { %4514 = vmatpush3.msra.mxu1 %v3717_v42  ;;  %v3714_v4 = vsel %vm1993_vm1, %v2932_v63, %v3622_v24 }
 0x7d7   : > { %4515 = vmatprep.subr.mxu1 %v3732_v52 }
 0x7d8   : > { %4516 = vmatpush3.msra.mxu1 %v3716_v9 }
 0x7d9   : > { %v3667_v48 = vpop.xlane.xlu1 %3666  ;;  %4517 = vmatprep.subr.mxu1 %v3731_v47  ;;  %v2977_v0 = vpop.xlane.xlu0 %2976 }
 0x7da   : > { %4518 = vmatpush3.msra.mxu1 %v3715_v25  ;;  %v3729_v15 = vsel %vm1993_vm1, %v2977_v0, %v3667_v48 }
 0x7db   : > { %4519 = vmatprep.subr.mxu1 %v3730_v17 }
 0x7dc   : > { %4520 = vmatpush3.msra.mxu1 %v3714_v4 }
 0x7dd   : > { %v3619_v45 = vpop.xlane.xlu1 %3618  ;;  %4521 = vmatprep.subr.mxu1 %v3729_v15  ;;  %v2929_v43 = vpop.xlane.xlu0 %2928 }
 0x7de   : > { %v3713_v57 = vsel %vm1993_vm1, %v2929_v43, %v3619_v45 }
 0x7df   : > { %4522 = vmatpush3.msra.mxu1 %v3713_v57 }
 0x7e0   : > { %3842 = vmatmul.mubr.f32.vlgmr.msra.gmra.mxu1 %v787_v56 }
 0x7e1   : > { %3846 = vmatprep.mubr.f32.mxu1 %v790_v59  ;;  %v3771_v11 = vpop.permute.xlu1 %3770 }
 0x7e4   : > { %3847 = vmatmul.mubr.f32.gmra.mxu1 %v789_v12  ;;  %v804_v12 = vld [vmem:[%s7084_s7 + $0x8] sm:$0xff] }
 0x7e5   : > { %3851 = vmatprep.mubr.f32.mxu1 %v792_v51  ;;  %v3767_v60 = vpop.permute.xlu1 %3766  ;;  %v3775_v20 = vpop.permute.xlu0 %3774 }
 0x7e8   : > { %3852 = vmatmul.mubr.f32.gmra.mxu1 %v791_v1 }
 0x7e9   : > { %3856 = vmatprep.mubr.f32.mxu1 %v794_v54  ;;  %v3763_v35 = vpop.permute.xlu1 %3762 }
 0x7ea   : > { %v3892_v51 = vpop.permute.xlu0 %3891 }
 0x7ec   : > { %3857 = vmatmul.mubr.f32.gmra.mxu1 %v793_v26 }
 0x7ed   : > { %3861 = vmatprep.mubr.f32.mxu1 %v796_v16  ;;  %v3759_v44 = vpop.permute.xlu1 %3758 }
 0x7f0   : > { %3862 = vmatmul.mubr.f32.gmra.mxu1 %v795_v37 }
 0x7f1   : > { %3866 = vmatprep.mubr.f32.mxu1 %v798_v7  ;;  %v3755_v41 = vpop.permute.xlu1 %3754 }
 0x7f4   : > { %3867 = vmatmul.mubr.f32.gmra.mxu1 %v797_v27  ;;  %v3987_v27 = vpop.permute.xlu0 %3986 }
 0x7f5   : > { %3871 = vmatprep.mubr.f32.mxu1 %v800_v5  ;;  %v3751_v52 = vpop.permute.xlu1 %3750 }
 0x7f8   : > { %3872 = vmatmul.mubr.f32.gmra.mxu1 %v799_v13 }
 0x7f9   : > { %3876 = vmatprep.mubr.f32.mxu1 %v802_v23  ;;  %v3747_v45 = vpop.permute.xlu1 %3746 }
 0x7fc   : > { %3877 = vmatmul.mubr.f32.gmra.mxu1 %v801_v40 }
 0x7fd   : > { %v3896_v1 = vpop.permute.xlu1 %3895 }
 0x802   : > { %v3983_v23 = vpop.permute.xlu1 %3982 }
 0x8a0   : > { %v4523_v34 = vpop.f32.mrf.mxu1 }
 0x8a2   : > { %v4524_v2 = vpop.f32.mrf.mxu1 }
 0x8a3   : > { %v4525_v48 = vadd.f32 %v4524_v2, %v4523_v34 }
 0x8a4   : > { %v4526_v3 = vpop.f32.mrf.mxu1 }
 0x8a5   : > { %v3844_v43 = vadd.f32 %v4525_v48, %v3747_v45 }
 0x8a6   : > { %v4527_v8 = vpop.f32.mrf.mxu1 }
 0x8a7   : > { %v4528_v9 = vadd.f32 %v4527_v8, %v4526_v3  ;;  %v3882_v59 = vmax.f32 %v3844_v43, 0.0 }
 0x8a8   : > { %v4529_v50 = vpop.f32.mrf.mxu1 }
 0x8a9   : > { %v3849_v4 = vadd.f32 %v4528_v9, %v3751_v52 }
 0x8aa   : > { %v4530_v10 = vpop.f32.mrf.mxu1 }
 0x8ab   : > { %v4531_v42 = vadd.f32 %v4530_v10, %v4529_v50  ;;  %v3883_v57 = vmax.f32 %v3849_v4, 0.0 }
 0x8ac   : > { %v4532_v55 = vpop.f32.mrf.mxu1 }
 0x8ad   : > { %v3854_v0 = vadd.f32 %v4531_v42, %v3755_v41 }
 0x8ae   : > { %v4533_v22 = vpop.f32.mrf.mxu1 }
 0x8af   : > { %v4534_v29 = vadd.f32 %v4533_v22, %v4532_v55  ;;  %v3884_v56 = vmax.f32 %v3854_v0, 0.0 }
 0x8b0   : > { %v4535_v6 = vpop.f32.mrf.mxu1 }
 0x8b1   : > { %v3859_v47 = vadd.f32 %v4534_v29, %v3759_v44 }
 0x8b2   : > { %v4536_v49 = vpop.f32.mrf.mxu1 }
 0x8b3   : > { %v4537_v61 = vadd.f32 %v4536_v49, %v4535_v6  ;;  %v3885_v15 = vmax.f32 %v3859_v47, 0.0 }
 0x8b4   : > { %v4538_v18 = vpop.f32.mrf.mxu1 }
 0x8b5   : > { %v3864_v24 = vadd.f32 %v4537_v61, %v3763_v35 }
 0x8b6   : > { %v4539_v62 = vpop.f32.mrf.mxu1 }
 0x8b7   : > { %v4540_v38 = vadd.f32 %v4539_v62, %v4538_v18  ;;  %v3886_v17 = vmax.f32 %v3864_v24, 0.0 }
 0x8b8   : > { %v4541_v33 = vpop.f32.mrf.mxu1 }
 0x8b9   : > { %v3869_v46 = vadd.f32 %v4540_v38, %v3767_v60  ;;  %v4002_v60 = vpop.permute.xlu1 %4001 }
 0x8ba   : > { %v4542_v39 = vpop.f32.mrf.mxu1 }
 0x8bb   : > { %v4543_v53 = vadd.f32 %v4542_v39, %v4541_v33  ;;  %v3887_v25 = vmax.f32 %v3869_v46, 0.0 }
 0x8bc   : > { %v4544_v28 = vpop.f32.mrf.mxu1 }
 0x8bd   : > { %v3874_v36 = vadd.f32 %v4543_v53, %v3771_v11 }
 0x8be   : > { %v4545_v19 = vpop.f32.mrf.mxu1 }
 0x8bf   : > { %v4546_v32 = vadd.f32 %v4545_v19, %v4544_v28  ;;  %v3888_v63 = vmax.f32 %v3874_v36, 0.0 }
 0x8c1   : > { %v3879_v31 = vadd.f32 %v4546_v32, %v3775_v20 }
 0x8c3   : > { %v3889_v21 = vmax.f32 %v3879_v31, 0.0 }
 0x8c5   : > { %4576 = vmatprep.subr.mxu0 %v3889_v21 }
 0x8c6   : > { %4577 = vmatpush3.msra.mxu0 %v3889_v21 }
 0x8c7   : > { %4578 = vmatprep.subr.mxu0 %v3888_v63 }
 0x8c8   : > { %4579 = vmatpush3.msra.mxu0 %v3888_v63 }
 0x8c9   : > { %4580 = vmatprep.subr.mxu0 %v3887_v25 }
 0x8ca   : > { %4581 = vmatpush3.msra.mxu0 %v3887_v25 }
 0x8cb   : > { %4582 = vmatprep.subr.mxu0 %v3886_v17 }
 0x8cc   : > { %4583 = vmatpush3.msra.mxu0 %v3886_v17 }
 0x8cd   : > { %4584 = vmatprep.subr.mxu0 %v3885_v15 }
 0x8ce   : > { %4585 = vmatpush3.msra.mxu0 %v3885_v15 }
 0x8cf   : > { %4586 = vmatprep.subr.mxu0 %v3884_v56 }
 0x8d0   : > { %4587 = vmatpush3.msra.mxu0 %v3884_v56 }
 0x8d1   : > { %4588 = vmatprep.subr.mxu0 %v3883_v57 }
 0x8d2   : > { %4589 = vmatpush3.msra.mxu0 %v3883_v57 }
 0x8d3   : > { %4590 = vmatprep.subr.mxu0 %v3882_v59 }
 0x8d4   : > { %4591 = vmatpush3.msra.mxu0 %v3882_v59 }
 0x8d5   : > { %4593 = vmatmul.mubr.msk.f32.vlgmr.msra.gmra.mxu0 %vm1061_vm0, %v804_v12  ;;  %vm2457_vm0 = vcmask 65536  }
 0x995   : > { %v4594_v54 = vpop.f32.mrf.mxu0 }
 0x996   : > { %v3976_v26 = vadd.f32 %v4594_v54, %v3896_v1 }
 0x997   : > { %v3970_v16 = vpop.f32.mrf.mxu0 }
 0x998   : > { %v3980_v37 = vmax.f32 %v3976_v26, 0.0  ;;  %v3971_v7 = vadd.f32 %v3970_v16, %v3892_v51 }
 0x99a   : > { %v3990_v5 = vmul.f32 %v3987_v27, %v3980_v37  ;;  %v3979_v13 = vmax.f32 %v3971_v7, 0.0  ;;  %v7509_v7 = vld [vmem:[#allocation93_spill] sm:$0xff]  ;;  %v7510_v27 = vld [vmem:[#allocation90_spill] sm:$0xff] }
 0x99c   : > { %v3989_v40 = vmul.f32 %v3983_v23, %v3979_v13  ;;  %v3992_v14 = vsel %vm2272_vm2, %v3990_v5, 0.0  ;;  %v7511_v5 = vsub.f32 1.0, %v7510_v27  ;;  %v7512_v13 = vld [vmem:[#allocation100_spill] sm:$0xff] }
 0x99d   : > { %v7513_v23 = vld [vmem:[#allocation88_spill] sm:$0xff] }
 0x99e   : > { %v3991_v34 = vsel %vm2272_vm2, %v3989_v40, 0.0  ;;  %v7514_v40 = vsub.f32 1.0, %v7513_v23 }
 0x99f   : > { %v3993_v2 = vadd.f32 %v3992_v14, %v3991_v34  ;;  %v7516_v14 = vld [vmem:[#allocation92_spill] sm:$0xff] }
 0x9a0   : > { %v7517_v34 = vld [vmem:[#allocation96_spill] sm:$0xff] }
 0x9a1   : > { %v3994_v3 = vrot.slane %v3993_v2, 4 }
 0x9a3   : > { %v3995_v8 = vadd.f32 %v3994_v3, %v3993_v2  ;;  %v7518_v2 = vld [vmem:[#allocation98_spill] sm:$0xff]  ;;  %v7519_v3 = vld [vmem:[#allocation99_spill] sm:$0xff] }
 0x9a5   : > { %v3996_v11 = vrot.slane %v3995_v8, 2 }
 0x9a7   : > { %v3997_v50 = vadd.f32 %v3996_v11, %v3995_v8  ;;  %v7522_v11 = vld [vmem:[#allocation97_spill] sm:$0xff] }
 0x9a9   : > { %v3998_v10 = vrot.slane %v3997_v50, 1 }
 0x9ab   : > { %v3999_v55 = vadd.f32 %v3998_v10, %v3997_v50  ;;  %v7523_v50 = vsub.f32 1.0, %v7522_v11  ;;  %v6962_v10 = vpop.permute.xlu0 %2412 }
 0x9ad   : > { %v4004_v22 = vadd.f32 %v4002_v60, %v3999_v55  ;;  %v6964_v55 = vpop.permute.xlu1 %2416 }
 0x9af   : > { %v4005_v6 = vmul.f32 0.31830987, %v4004_v22  ;;  %v6966_v60 = vpop.permute.xlu0 %3108 }
 0x9b1   : > { %vm4006_vm4 = vcmp.ge.f32.partialorder %v4005_v6, 0.0  ;;  %v4007_v49 = vadd.f32 0.5, %v4005_v6  ;;  %v4418_v35 = vadd.f32 -0.5, %v4005_v6 }
 0x9b3   : > { %v4009_v18 = vsel %vm4006_vm4, %v4007_v49, %v4418_v35  ;;  %v6970_v6 = vpop.permute.xlu0 %3112 }
 0x9b4   : > { %v4599_v62 = vtrunc.f32 %v4009_v18 }
 0x9b6   : > { %v4600_v33 = vcvt.f32.s32 %v4599_v62  ;;  %v7524_v62 = vld [vmem:[#allocation18_spill] sm:$0xff] }
 0x9b8   : > { %v4011_v44 = vcvt.s32.f32 %v4600_v33 }
 0x9ba   : > { %v4012_v39 = vmul.f32 3.140625, %v4011_v44  ;;  %v4016_v28 = vmul.f32 0.5, %v4011_v44  ;;  %v4014_v19 = vmul.f32 0.0009676536, %v4011_v44  ;;  %v7525_v44 = vld [vmem:[#allocation16_spill] sm:$0xff] }
 0x9bc   : > { %v4013_v53 = vsub.f32 %v4004_v22, %v4012_v39  ;;  %v4601_v32 = vtrunc.f32 %v4016_v28  ;;  %v6968_v22 = vpop.permute.xlu1 %2420 }
 0x9be   : > { %v4015_v38 = vsub.f32 %v4013_v53, %v4014_v19  ;;  %v4602_v41 = vcvt.f32.s32 %v4601_v32  ;;  %v7527_v19 = vld [vmem:[#allocation19_spill] sm:$0xff] }
 0x9c0   : > { %v4023_v20 = vmul.f32 %v4015_v38, %v4015_v38  ;;  %v4018_v46 = vcvt.s32.f32 %v4602_v41  ;;  %v4096_v41 = vrot.slane %v7525_v44, 4 }
 0x9c2   : > { %v4024_v61 = vmul.f32 -2.5052108e-08, %v4023_v20  ;;  %v4035_v36 = vmul.f32 2.0876756e-09, %v4023_v20  ;;  %v4019_v52 = vsub.f32 %v4016_v28, %v4018_v46  ;;  %v7526_v28 = vld [vmem:[#allocation22_spill] sm:$0xff] }
 0x9c3   : > { %v7529_v46 = vld [vmem:[#allocation26_spill] sm:$0xff] }
 0x9c4   : > { %v4025_v31 = vadd.f32 2.7557319e-06, %v4024_v61  ;;  %v4036_v29 = vadd.f32 -2.755732e-07, %v4035_v36  ;;  %v4020_v0 = vand.u32 2147483647, %v4019_v52 }
 0x9c6   : > { %v4026_v21 = vmul.f32 %v4025_v31, %v4023_v20  ;;  %v4037_v42 = vmul.f32 %v4036_v29, %v4023_v20  ;;  %v4021_v43 = vmul.f32 4.0, %v4020_v0  ;;  %v7528_v31 = vld [vmem:[#allocation24_spill] sm:$0xff] }
 0x9c7   : > { %v4158_v29 = vrot.slane %v7528_v31, 5 }
 0x9c8   : > { %v4027_v24 = vadd.f32 -0.0001984127, %v4026_v21  ;;  %v4038_v63 = vadd.f32 2.4801588e-05, %v4037_v42  ;;  %v4022_v51 = vsub.f32 1.0, %v4021_v43  ;;  %v4159_v21 = vrot.slane %v7529_v46, 5 }
 0x9c9   : > { %v4089_v42 = vrot.slane %v7526_v28, 5 }
 0x9ca   : > { %v4028_v9 = vmul.f32 %v4027_v24, %v4023_v20  ;;  %v4039_v47 = vmul.f32 %v4038_v63, %v4023_v20  ;;  %v4090_v24 = vrot.slane %v7527_v19, 5  ;;  %v7530_v63 = vld [vmem:[#allocation25_spill] sm:$0xff] }
 0x9cb   : > { %v4164_v52 = vrot.slane %v7530_v63, 4 }
 0x9cc   : > { %v4029_v25 = vadd.f32 0.008333334, %v4028_v9  ;;  %v4040_v48 = vadd.f32 -0.0013888889, %v4039_v47  ;;  %v7531_v9 = vld [vmem:[#allocation23_spill] sm:$0xff] }
 0x9cd   : > { %v4165_v47 = vrot.slane %v7531_v9, 4 }
 0x9ce   : > { %v4030_v17 = vmul.f32 %v4029_v25, %v4023_v20  ;;  %v4041_v4 = vmul.f32 %v4040_v48, %v4023_v20 }
 0x9d0   : > { %v4031_v15 = vadd.f32 -0.16666667, %v4030_v17  ;;  %v4042_v45 = vadd.f32 0.041666668, %v4041_v4 }
 0x9d2   : > { %v4032_v56 = vmul.f32 %v4031_v15, %v4023_v20  ;;  %v4043_v57 = vmul.f32 %v4042_v45, %v4023_v20 }
 0x9d4   : > { %v4033_v59 = vadd.f32 1.0, %v4032_v56  ;;  %v4044_v12 = vadd.f32 -0.5, %v4043_v57 }
 0x9d6   : > { %v4034_v1 = vmul.f32 %v4033_v59, %v4015_v38  ;;  %v4045_v54 = vmul.f32 %v4044_v12, %v4023_v20  ;;  %v4095_v20 = vrot.slane %v7524_v62, 4  ;;  %v7532_v12 = vld [vmem:[#allocation31_spill] sm:$0xff] }
 0x9d8   : > { %v4047_v26 = vmul.f32 %v4034_v1, %v4022_v51  ;;  %v4046_v16 = vadd.f32 1.0, %v4045_v54  ;;  %v7533_v1 = vld [vmem:[#allocation33_spill] sm:$0xff] }
 0x9d9   : > { %v4084_v54 = vrot.slane %v7533_v1, 6 }
 0x9da   : > { %4127 = vperm.xlu1 %4713, %v4047_v26   ;;  %4058 = vperm.xlu0 %4712, %v4047_v26   ;;  %v4048_v37 = vmul.f32 %v4046_v16, %v4022_v51  ;;  %v4083_v51 = vrot.slane %v7532_v12, 6 }
 0x9de   : > { %4714 = vset.pattern.permute.xlu1 %v7469_v30  ;;  %3116 = vrot.lane.b32.xlu0 %v7509_v7, %s4876_s18  ;;  %v7515_v30 = vld [vmem:[#allocation101_spill] sm:$0xff]  ;;  %s4886_s18 = smov 6   ;;  %v4099_v7 = vrot.slane %v7532_v12, 3 }
 0x9df   : > { %4051 = vperm.xlu1 %4714, %v4048_v37   ;;  %4716 = vset.pattern.permute.xlu0 %v7507_v58 }
 0x9e2   : > { %3120 = vrot.lane.b32.xlu0 %v7511_v5, %s4883_s17 }
 0x9e3   : > { %4715 = vset.pattern.permute.xlu1 %v7507_v58  ;;  %v7520_v58 = vld [vmem:[#allocation102_spill] sm:$0xff] }
 0x9e4   : > { %4121 = vperm.xlu1 %4715, %v4048_v37   ;;  %v7521_v8 = vsub.f32 1.0, %v7520_v58 }
 0x9e6   : > { %3124 = vrot.lane.b32.xlu0 %v7512_v13, %s4884_s26 }
 0x9e8   : > { %2424 = vrot.lane.b32.xlu1 %v7514_v40, %s4884_s26 }
 0x9ea   : > { %3128 = vrot.lane.b32.xlu0 %v7515_v30, %s4885_s27 }
 0x9ec   : > { %2428 = vrot.lane.b32.xlu1 %v7516_v14, %s4885_s27 }
 0x9ee   : > { %3132 = vrot.lane.b32.xlu0 %v7517_v34, %s4886_s18 }
 0x9f0   : > { %2432 = vrot.lane.b32.xlu1 %v7518_v2, %s4886_s18 }
 0x9f4   : > { %2436 = vrot.lane.b32.xlu1 %v7519_v3, %s4887_s28 }
 0x9f8   : > { %2440 = vrot.lane.b32.xlu1 %v7521_v8, %s4888_s29 }
 0x9fc   : > { %3136 = vrot.lane.b32.xlu1 %v7523_v50, %s4887_s28  ;;  %v4100_v50 = vrot.slane %v7533_v1, 3 }
 0xa55   : > { %v4128_v49 = vpop.permute.xlu1 %4127  ;;  %v4059_v35 = vpop.permute.xlu0 %4058 }
 0xa56   : > { %v4061_v33 = vmul.f32 %v4059_v35, %v7524_v62  ;;  %v4062_v39 = vmul.f32 %v4059_v35, %v7525_v44  ;;  %v4130_v17 = vmul.f32 %v4128_v49, %v7530_v63  ;;  %v4131_v4 = vmul.f32 %v4128_v49, %v7531_v9 }
 0xa59   : > { %v6976_v32 = vpop.permute.xlu0 %3116 }
 0xa5a   : > { %v4052_v18 = vpop.permute.xlu1 %4051 }
 0xa5b   : > { %v4054_v53 = vmul.f32 %v4052_v18, %v7526_v28  ;;  %v4055_v38 = vmul.f32 %v4052_v18, %v7527_v19 }
 0xa5d   : > { %v4063_v61 = vadd.f32 %v4061_v33, %v4054_v53  ;;  %v4064_v36 = vadd.f32 %v4062_v39, %v4055_v38  ;;  %v6992_v26 = vpop.permute.xlu0 %3120 }
 0xa5f   : > { %v4065_v25 = vmul.f32 2.0, %v4063_v61  ;;  %v4066_v48 = vmul.f32 2.0, %v4064_v36  ;;  %v4122_v0 = vpop.permute.xlu1 %4121 }
 0xa60   : > { %v4124_v15 = vmul.f32 %v4122_v0, %v7528_v31  ;;  %v4125_v45 = vmul.f32 %v4122_v0, %v7529_v46 }
 0xa61   : > { %v4067_v43 = vmul.f32 %v4065_v25, %v4052_v18  ;;  %v4068_v56 = vmul.f32 %v4066_v48, %v4052_v18  ;;  %v4071_v57 = vmul.f32 %v4065_v25, %v4059_v35  ;;  %v4072_v59 = vmul.f32 %v4066_v48, %v4059_v35  ;;  %v3125_v39 = vpop.permute.xlu0 %3124 }
 0xa62   : > { %v4132_v16 = vadd.f32 %v4130_v17, %v4124_v15  ;;  %v4133_v37 = vadd.f32 %v4131_v4, %v4125_v45  ;;  %v7534_v4 = vld [vmem:[#allocation9_spill] sm:$0xff]  ;;  %v7535_v45 = vld [vmem:[#allocation11_spill] sm:$0xff] }
 0xa63   : > { %v4073_v27 = vsub.f32 %v7524_v62, %v4071_v57  ;;  %v4074_v5 = vsub.f32 %v7525_v44, %v4072_v59  ;;  %v2425_v13 = vpop.permute.xlu1 %2424  ;;  %v4069_v30 = vsub.f32 %v7526_v28, %v4067_v43  ;;  %v4070_v14 = vsub.f32 %v7527_v19, %v4068_v56 }
 0xa64   : > { %v4134_v23 = vmul.f32 2.0, %v4132_v16  ;;  %v4135_v40 = vmul.f32 2.0, %v4133_v37  ;;  %v4152_v15 = vrot.slane %v7534_v4, 6  ;;  %v4153_v43 = vrot.slane %v7535_v45, 6 }
 0xa65   : > { %v4077_v34 = vrot.slane %v4073_v27, 7  ;;  %v4078_v2 = vrot.slane %v4074_v5, 7  ;;  %v4168_v56 = vrot.slane %v7534_v4, 3  ;;  %v4169_v59 = vrot.slane %v7535_v45, 3  ;;  %v3129_v27 = vpop.permute.xlu0 %3128 }
 0xa66   : > { %v4136_v3 = vmul.f32 %v4134_v23, %v4122_v0  ;;  %v4137_v58 = vmul.f32 %v4135_v40, %v4122_v0  ;;  %v4140_v8 = vmul.f32 %v4134_v23, %v4128_v49  ;;  %v4141_v11 = vmul.f32 %v4135_v40, %v4128_v49 }
 0xa67   : > { %v4104_v35 = vsel %vm4103_vm5, %v4069_v30, %v4077_v34  ;;  %v4105_v18 = vsel %vm4103_vm5, %v4070_v14, %v4078_v2  ;;  %v2429_v62 = vpop.permute.xlu1 %2428 }
 0xa68   : > { %v4107_v33 = vsel %vm4106_vm6, %v4104_v35, %v4083_v51  ;;  %v4108_v44 = vsel %vm4106_vm6, %v4105_v18, %v4084_v54  ;;  %v4142_v53 = vsub.f32 %v7530_v63, %v4140_v8  ;;  %v4143_v19 = vsub.f32 %v7531_v9, %v4141_v11  ;;  %v7538_v54 = vld [vmem:[#allocation91_spill] sm:$0xff] }
 0xa69   : > { %v4110_v49 = vsel %vm4109_vm7, %v4107_v33, %v4089_v42  ;;  %v4111_v28 = vsel %vm4109_vm7, %v4108_v44, %v4090_v24  ;;  %v4138_v36 = vsub.f32 %v7528_v31, %v4136_v3  ;;  %v4139_v25 = vsub.f32 %v7529_v46, %v4137_v58  ;;  %v3133_v30 = vpop.permute.xlu0 %3132 }
 0xa6a   : > { %v4113_v38 = vsel %vm4112_vm8, %v4110_v49, %v4095_v20  ;;  %v4114_v61 = vsel %vm4112_vm8, %v4111_v28, %v4096_v41  ;;  %v4146_v0 = vrot.slane %v4142_v53, 7  ;;  %v4147_v24 = vrot.slane %v4143_v19, 7  ;;  %v7536_v20 = vld [vmem:[#allocation15_spill] sm:$0xff] }
 0xa6b   : > { %v4116_v48 = vsel %vm4115_vm10, %v4113_v38, %v4099_v7  ;;  %v4117_v42 = vsel %vm4115_vm10, %v4114_v61, %v4100_v50  ;;  %v2433_v17 = vpop.permute.xlu1 %2432  ;;  %v7537_v41 = vsub.f32 1.0, %v7536_v20  ;;  %v3139_v16 = vsel %vm1993_vm1, %v6966_v60, %v7538_v54 }
 0xa6c   : > { %4118 = vst [vmem:[%s7008_s14] sm:$0x3f] %v4116_v48  ;;  %4119 = vst [vmem:[%s7008_s14 + $0x8] sm:$0x3f] %v4117_v42  ;;  %v4172_v51 = vsel %vm4103_vm5, %v4138_v36, %v4146_v0  ;;  %v4173_v1 = vsel %vm4103_vm5, %v4139_v25, %v4147_v24 }
 0xa6d   : > { %v2443_v57 = vsel %vm1993_vm1, %v7537_v41, %v6962_v10  ;;  %v4174_v10 = vsel %vm4106_vm6, %v4172_v51, %v4152_v15  ;;  %v4175_v7 = vsel %vm4106_vm6, %v4173_v1, %v4153_v43 }
 0xa6e   : > { %v2444_v12 = vsel %vm2272_vm2, %v2443_v57, %v6964_v55  ;;  %v4176_v55 = vsel %vm4109_vm7, %v4174_v10, %v4158_v29  ;;  %v4177_v5 = vsel %vm4109_vm7, %v4175_v7, %v4159_v21  ;;  %v3140_v21 = vsel %vm2272_vm2, %v3139_v16, %v6970_v6 }
 0xa6f   : > { %v2446_v37 = vsel %vm2445_vm9, %v2444_v12, %v6968_v22  ;;  %v2437_v60 = vpop.permute.xlu1 %2436  ;;  %v4178_v22 = vsel %vm4112_vm8, %v4176_v55, %v4164_v52  ;;  %v4179_v23 = vsel %vm4112_vm8, %v4177_v5, %v4165_v47  ;;  %v3141_v52 = vsel %vm2445_vm9, %v3140_v21, %v6976_v32 }
 0xa70   : > { %v2448_v40 = vsel %vm2447_vm11, %v2446_v37, %v2425_v13  ;;  %v4180_v31 = vsel %vm4115_vm10, %v4178_v22, %v4168_v56  ;;  %v4181_v29 = vsel %vm4115_vm10, %v4179_v23, %v4169_v59  ;;  %v3142_v13 = vsel %vm2447_vm11, %v3141_v52, %v6992_v26 }
 0xa71   : > { %v2450_v46 = vsel %vm2449_vm12, %v2448_v40, %v2429_v62  ;;  %4419 = vst [vmem:[%s7008_s14 + $0x10] sm:$0x3f] %v4180_v31  ;;  %4420 = vst [vmem:[%s7008_s14 + $0x18] sm:$0x3f] %v4181_v29  ;;  %v3143_v14 = vsel %vm2449_vm12, %v3142_v13, %v3125_v39 }
 0xa72   : > { %v2452_v63 = vsel %vm2451_vm13, %v2450_v46, %v2433_v17  ;;  %v3144_v34 = vsel %vm2451_vm13, %v3143_v14, %v3129_v27 }
 0xa73   : > { %v2454_v9 = vsel %vm2453_vm15, %v2452_v63, %v2437_v60  ;;  %v2441_v47 = vpop.permute.xlu1 %2440  ;;  %v3145_v2 = vsel %vm2453_vm15, %v3144_v34, %v3133_v30 }
 0xa74   : > { %v2456_v6 = vsel %vm2455_vm14, %v2454_v9, %v2441_v47 }
 0xa75   : > { %2458 = vst.msk [vmem:[%s414_s20] sm:$0x1] %vm2457_vm0, %v2456_v6 }
 0xa77   : > { %v3137_v3 = vpop.permute.xlu1 %3136 }
 0xa78   : > { %v3146_v58 = vsel %vm2455_vm14, %v3145_v2, %v3137_v3 }
 0xa79   : > { %4399 = vst.msk [vmem:[%s414_s20 + $0x1] sm:$0x1] %vm2457_vm0, %v3146_v58 }
 0xa7a PF: > { %s22_s30 = sadd.s32 1, %s4857_s30  }
 0xa7b   : > { %p19_p3 = scmp.ge.s32.totalorder %s22_s30, 4  }
 0xa7d   :  { %21 = sbr.rel (!%p19_p3) target bundleno = 2 (0x2), region = 114 }
 0xa82   :  { %4224 = vsyncpa [#allocation3], 1 }
 0xa83   :  { %4226 = vsyncpa [#allocation3 + $0x1], 1 }
 0xa84   :  { %4227 = vsyncpa [#allocation5], 1 }

</bundles_post_ra>
